<compile_context>
chip_gen: v5e
topology: v5e:2x2
jax: 0.10.0
libtpu: 0.0.40
codegen_flags: <defaults>
</compile_context>

<pallas_src>
import functools

import numpy as np
import jax
import jax.numpy as jnp
from jax.experimental import pallas as pl
from jax.experimental.pallas import tpu as pltpu

# ----------------------------- config ---------------------------------------
B = 2            # batch
R_CH = 8         # r_channel
E_CH = 16        # e_channel
H_CH = 16        # h_channel
Z_CH = 8         # z_channel
STRIDE = 2       # conv1 kernel_size == stride, 16x16 -> 8x8
HW = 8           # spatial size of z/h/c
K5 = 5           # LSTM / conv2 kernel size
PAD = 2          # padding for the 5x5 convs
CIN_LSTM = E_CH + Z_CH + H_CH           # 40: [lstm_input, z, hidden]
N = B * HW * HW                          # 128: exactly one vreg lane row

K_CONV1 = STRIDE * STRIDE * R_CH         # 32
K_GATES = K5 * K5 * CIN_LSTM             # 1000
K_GATES_PAD = 1024                       # pad K for bf16 sublane / MXU alignment
K_CONV2 = K5 * K5 * H_CH                 # 400 (already multiple of 16)
C_OUT = 2 * Z_CH + 2 * H_CH              # 48: packed [mu; logvar; h_new; c_new]

# bf16 MXU operands on every generation (v5e MXU is natively bf16; only the
# VPU/EUP lack bf16, and all elementwise gating stays f32).
USE_BF16_MXU = True
MXU_DTYPE = jnp.bfloat16 if USE_BF16_MXU else jnp.float32


# ----------------------------- Pallas kernel --------------------------------
def _latent_dist_kernel(pr_ref, z_ref, h0_ref, c0_ref,
                        w1_ref, b1_ref, wg_ref, bg_ref, w2_ref, b2_ref,
                        mask_ref, out_ref,
                        xu_ref, h_ref, c_ref):
    """One DRAW step per grid point t; h/c carried in VMEM scratch.

    pr_ref  : (K_CONV1, N)       conv1 im2col patches (constant over t)
    z_ref   : (zc, N)            latent for step t
    h0_ref  : (hc, N)            initial hidden (read only at t == 0)
    c0_ref  : (hc, N)            initial cell   (read only at t == 0)
    w1_ref  : (ec, K_CONV1)      conv1 weight,  b1_ref: (ec, 1)
    wg_ref  : (4*hc, K_GATES_PAD) fused gate weights [f|i|o|s], bg_ref: (4*hc, 1)
    w2_ref  : (2*zc, K_CONV2)    conv2 weight,  b2_ref: (2*zc, 1)
    mask_ref: (25, 1, N)         per-tap zero-padding validity masks
    out_ref : (C_OUT, N)         packed per-step [mu; logvar; h_new; c_new]
    xu_ref  : (K_GATES_PAD, N)   shared im2col scratch slab (f32)
    h_ref/c_ref : (hc, N)        recurrent state scratch (persists over t)
    """
    t = pl.program_id(0)
    n = pr_ref.shape[1]
    hc = h0_ref.shape[0]
    zc2 = b2_ref.shape[0]
    mxu_dt = w1_ref.dtype

    @pl.when(t == 0)
    def _init():
        h_ref[...] = h0_ref[...]
        c_ref[...] = c0_ref[...]
        if K_GATES_PAD > K_GATES:   # zero the K-pad rows once (weights have 0 cols there)
            xu_ref[K_GATES:K_GATES_PAD, :] = jnp.zeros(
                (K_GATES_PAD - K_GATES, n), jnp.float32)

    # ---- conv1 (kernel == stride, no overlap): one MXU contraction ----------
    lstm_in = jnp.dot(w1_ref[...], pr_ref[...],
                      preferred_element_type=jnp.float32) + b1_ref[...]

    # ---- ConvLSTM input: channel concat along the sublane axis --------------
    x = jnp.concatenate([lstm_in, z_ref[...], h_ref[...]], axis=0)   # (Cin, N) f32

    def fill_taps(v, cin):
        """Scatter the 25 masked lane-rolled taps of v (cin, N) into the shared
        im2col scratch rows [0, 25*cin).  Stores are sublane-aligned (cin % 8 == 0)."""
        for ki in range(K5):
            for kj in range(K5):
                k = ki * K5 + kj
                off = (ki - PAD) * HW + (kj - PAD)
                if off == 0:
                    tap = v                               # center tap: mask all ones
                else:
                    tap = pltpu.roll(v, shift=(-off) % n, axis=1) * mask_ref[k]
                xu_ref[k * cin:(k + 1) * cin, :] = tap

    # ---- 4 LSTM gate convs fused along Cout: ONE K=1024 contraction ---------
    fill_taps(x, CIN_LSTM)
    gates = jnp.dot(wg_ref[...], xu_ref[...].astype(mxu_dt),
                    preferred_element_type=jnp.float32) + bg_ref[...]

    def sigmoid(v):                       # tanh form -> EUP, frees VALU slots
        return 0.5 * jnp.tanh(0.5 * v) + 0.5

    f_g = sigmoid(gates[0 * hc:1 * hc])
    i_g = sigmoid(gates[1 * hc:2 * hc])
    o_g = sigmoid(gates[2 * hc:3 * hc])
    s_g = jnp.tanh(gates[3 * hc:4 * hc])

    c_new = f_g * c_ref[...] + i_g * s_g
    h_new = o_g * jnp.tanh(c_new)
    h_ref[...] = h_new
    c_ref[...] = c_new

    # ---- conv2: reuse the scratch slab (first 25*hc rows), one contraction --
    fill_taps(h_new, hc)
    out2 = jnp.dot(w2_ref[...], xu_ref[0:K_CONV2, :].astype(mxu_dt),
                   preferred_element_type=jnp.float32) + b2_ref[...]

    # ---- single lane-dense packed output slab per step -----------------------
    out_ref[0:zc2, :] = out2
    out_ref[zc2:zc2 + hc, :] = h_new
    out_ref[zc2 + hc:zc2 + 2 * hc, :] = c_new


# ----------------------------- glue helpers ----------------------------------
@functools.lru_cache(maxsize=None)
def _tap_masks(h, w, ksize, pad, batch):
    """(k*k, 1, batch*h*w) 0/1 masks: mask[k,0,p]=1 iff tap k of the zero-padded
    ksize x ksize stencil reads an in-bounds pixel at flat position p."""
    n = batch * h * w
    m = np.zeros((ksize * ksize, 1, n), np.float32)
    for ki in range(ksize):
        for kj in range(ksize):
            di, dj = ki - pad, kj - pad
            k = ki * ksize + kj
            for i in range(h):
                if not (0 <= i + di < h):
                    continue
                for j in range(w):
                    if 0 <= j + dj < w:
                        for bb in range(batch):
                            m[k, 0, bb * h * w + i * w + j] = 1.0
    return m


def _nchw_to_cn(x):
    b, c, h, w = x.shape
    return jnp.transpose(x, (1, 0, 2, 3)).reshape(c, b * h * w)


def _cn_to_nchw(x, b, h, w):
    c = x.shape[0]
    return jnp.transpose(x.reshape(c, b, h, w), (1, 0, 2, 3))


def _conv1_patches(r):
    """Non-overlapping im2col patches, transposed to (s*s*rc, N)."""
    b, rc, hr, wr = r.shape
    s = STRIDE
    ho, wo = hr // s, wr // s
    assert (ho, wo) == (HW, HW) and b * ho * wo == N
    r_nhwc = jnp.transpose(r, (0, 2, 3, 1))
    patches = (r_nhwc.reshape(b, ho, s, wo, s, rc)
               .transpose(0, 1, 3, 2, 4, 5)
               .reshape(b * ho * wo, s * s * rc))
    return patches.T.astype(MXU_DTYPE)


def _pack_weights(params):
    """Repack raw OIHW conv weights into the kernel's matrix layouts (done ONCE
    per pallas_call, amortized over all fused timesteps)."""
    w1m = jnp.transpose(params["w1"], (0, 2, 3, 1)).reshape(E_CH, K_CONV1)
    b1m = params["b1"].reshape(E_CH, 1)

    wg = jnp.concatenate([params["wf"], params["wi"],
                          params["wo"], params["ws"]], axis=0)   # (4*hc, Cin, 5, 5)
    wgm = jnp.transpose(wg, (0, 2, 3, 1)).reshape(4 * H_CH, K_GATES)
    wgm = jnp.pad(wgm, ((0, 0), (0, K_GATES_PAD - K_GATES)))     # zero cols for K pad
    bgm = jnp.concatenate([params["bf"], params["bi"],
                           params["bo"], params["bs"]]).reshape(4 * H_CH, 1)

    w2m = jnp.transpose(params["w2"], (0, 2, 3, 1)).reshape(2 * Z_CH, K_CONV2)
    b2m = params["b2"].reshape(2 * Z_CH, 1)

    if USE_BF16_MXU:
        w1m = w1m.astype(MXU_DTYPE)
        wgm = wgm.astype(MXU_DTYPE)
        w2m = w2m.astype(MXU_DTYPE)
    return w1m, b1m, wgm, bgm, w2m, b2m


def init_params(key):
    ks = jax.random.split(key, 12)
    s = 0.1
    return {
        "w1": s * jax.random.normal(ks[0], (E_CH, R_CH, STRIDE, STRIDE), jnp.float32),
        "b1": s * jax.random.normal(ks[1], (E_CH,), jnp.float32),
        "wf": s * jax.random.normal(ks[2], (H_CH, CIN_LSTM, K5, K5), jnp.float32),
        "bf": s * jax.random.normal(ks[3], (H_CH,), jnp.float32),
        "wi": s * jax.random.normal(ks[4], (H_CH, CIN_LSTM, K5, K5), jnp.float32),
        "bi": s * jax.random.normal(ks[5], (H_CH,), jnp.float32),
        "wo": s * jax.random.normal(ks[6], (H_CH, CIN_LSTM, K5, K5), jnp.float32),
        "bo": s * jax.random.normal(ks[7], (H_CH,), jnp.float32),
        "ws": s * jax.random.normal(ks[8], (H_CH, CIN_LSTM, K5, K5), jnp.float32),
        "bs": s * jax.random.normal(ks[9], (H_CH,), jnp.float32),
        "w2": s * jax.random.normal(ks[10], (2 * Z_CH, H_CH, K5, K5), jnp.float32),
        "b2": s * jax.random.normal(ks[11], (2 * Z_CH,), jnp.float32),
    }


# ----------------------------- fused pallas_call ------------------------------
def _run_fused(patches_t, z_seq, h0, c0, w1m, b1m, wgm, bgm, w2m, b2m, masks):
    """Run T DRAW steps in one pallas_call.  z_seq: (T, zc, N).  Returns the
    packed per-step slab (T, C_OUT, N) = [mu; logvar; h_new; c_new]."""
    T = z_seq.shape[0]
    n = N

    flops_step = 2 * n * (E_CH * K_CONV1 + 4 * H_CH * K_GATES_PAD + 2 * Z_CH * K_CONV2)
    trans_step = 6 * H_CH * n
    bytes_const = int(sum(int(a.size) * a.dtype.itemsize
                          for a in (patches_t, h0, c0, w1m, b1m, wgm, bgm, w2m, b2m, masks)))
    bytes_step = Z_CH * n * 4 + C_OUT * n * 4

    grid_spec = pltpu.PrefetchScalarGridSpec(
        num_scalar_prefetch=0,
        grid=(T,),
        in_specs=[
            # constant block index -> DMA'd once, VMEM-resident across all steps
            pl.BlockSpec(patches_t.shape, lambda t: (0, 0)),
            # per-step latent
            pl.BlockSpec((None, Z_CH, n), lambda t: (t, 0, 0)),
            pl.BlockSpec(h0.shape, lambda t: (0, 0)),
            pl.BlockSpec(c0.shape, lambda t: (0, 0)),
            pl.BlockSpec(w1m.shape, lambda t: (0, 0)),
            pl.BlockSpec(b1m.shape, lambda t: (0, 0)),
            pl.BlockSpec(wgm.shape, lambda t: (0, 0)),
            pl.BlockSpec(bgm.shape, lambda t: (0, 0)),
            pl.BlockSpec(w2m.shape, lambda t: (0, 0)),
            pl.BlockSpec(b2m.shape, lambda t: (0, 0)),
            pl.BlockSpec(masks.shape, lambda t: (0, 0, 0)),
        ],
        out_specs=pl.BlockSpec((None, C_OUT, n), lambda t: (t, 0, 0)),
        scratch_shapes=[
            pltpu.VMEM((K_GATES_PAD, n), jnp.float32),   # shared im2col slab (512 KB)
            pltpu.VMEM((H_CH, n), jnp.float32),          # h carry
            pltpu.VMEM((H_CH, n), jnp.float32),          # c carry
        ],
    )

    # TODO(synk): on v7x, add a leading "parallel" grid axis over independent
    # sequences (>=128 lane-dense positions each) so the second TensorCore is used.
    return pl.pallas_call(
        _latent_dist_kernel,
        out_shape=jax.ShapeDtypeStruct((T, C_OUT, n), jnp.float32),
        grid_spec=grid_spec,
        compiler_params=pltpu.CompilerParams(
            dimension_semantics=("arbitrary",)),        # sequential recurrence over T
        cost_estimate=pl.CostEstimate(
            flops=T * flops_step,
            transcendentals=T * trans_step,
            bytes_accessed=bytes_const + T * bytes_step),
    )(patches_t, z_seq, h0, c0, w1m, b1m, wgm, bgm, w2m, b2m, masks)


# ----------------------------- public wrappers --------------------------------
@jax.jit
def latent_distribution_forward(params, r, z, h, c):
    """Single-step forward — exact semantics of LatentDistribution.forward."""
    b = r.shape[0]
    assert b * HW * HW == N, "lane layout / tap-mask coupling assumes B*8*8 == 128"
    packed = _pack_weights(params)
    patches_t = _conv1_patches(r)
    z_cn = _nchw_to_cn(z)[None]                     # (1, zc, N)
    h_cn, c_cn = _nchw_to_cn(h), _nchw_to_cn(c)
    masks = jnp.asarray(_tap_masks(HW, HW, K5, PAD, b))
    slab = _run_fused(patches_t, z_cn, h_cn, c_cn, *packed, masks)[0]   # (C_OUT, N)

    mu = _cn_to_nchw(slab[0:Z_CH], b, HW, HW)
    logvar = _cn_to_nchw(slab[Z_CH:2 * Z_CH], b, HW, HW)
    h_new = _cn_to_nchw(slab[2 * Z_CH:2 * Z_CH + H_CH], b, HW, HW)
    c_new = _cn_to_nchw(slab[2 * Z_CH + H_CH:2 * Z_CH + 2 * H_CH], b, HW, HW)
    return mu, logvar, h_new, c_new


@jax.jit
def latent_distribution_rollout(params, r, z_seq, h0, c0):
    """T fused DRAW steps in ONE pallas_call (weights VMEM-resident, h/c carried
    in VMEM scratch).  z_seq: (T, B, zc, 8, 8).  Returns per-step (mu, logvar)
    stacks plus the final (h, c)."""
    T, b = z_seq.shape[0], z_seq.shape[1]
    assert b * HW * HW == N
    packed = _pack_weights(params)
    patches_t = _conv1_patches(r)                   # r shared across DRAW steps
    z_cn = jax.vmap(_nchw_to_cn)(z_seq)             # (T, zc, N)
    h_cn, c_cn = _nchw_to_cn(h0), _nchw_to_cn(c0)
    masks = jnp.asarray(_tap_masks(HW, HW, K5, PAD, b))
    slab = _run_fused(patches_t, z_cn, h_cn, c_cn, *packed, masks)      # (T, C_OUT, N)

    mu = jax.vmap(lambda s: _cn_to_nchw(s[0:Z_CH], b, HW, HW))(slab)
    logvar = jax.vmap(lambda s: _cn_to_nchw(s[Z_CH:2 * Z_CH], b, HW, HW))(slab)
    h_T = _cn_to_nchw(slab[-1, 2 * Z_CH:2 * Z_CH + H_CH], b, HW, HW)
    c_T = _cn_to_nchw(slab[-1, 2 * Z_CH + H_CH:], b, HW, HW)
    return mu, logvar, h_T, c_T


# ----------------------------- pure-JAX reference -----------------------------
def _conv_nchw(x, w, bias, stride, pad):
    y = jax.lax.conv_general_dilated(
        x, w, (stride, stride), [(pad, pad), (pad, pad)],
        dimension_numbers=("NCHW", "OIHW", "NCHW"))
    return y + bias[None, :, None, None]


def reference_forward(params, r, z, h, c):
    lstm_in = _conv_nchw(r, params["w1"], params["b1"], STRIDE, 0)
    x = jnp.concatenate([lstm_in, z, h], axis=1)
    f_g = jax.nn.sigmoid(_conv_nchw(x, params["wf"], params["bf"], 1, PAD))
    i_g = jax.nn.sigmoid(_conv_nchw(x, params["wi"], params["bi"], 1, PAD))
    o_g = jax.nn.sigmoid(_conv_nchw(x, params["wo"], params["bo"], 1, PAD))
    s_g = jnp.tanh(_conv_nchw(x, params["ws"], params["bs"], 1, PAD))
    c_new = f_g * c + i_g * s_g
    h_new = o_g * jnp.tanh(c_new)
    y = _conv_nchw(h_new, params["w2"], params["b2"], 1, PAD)
    mu, logvar = jnp.split(y, 2, axis=1)
    return mu, logvar, h_new, c_new


def reference_rollout(params, r, z_seq, h, c):
    mus, logvars = [], []
    for t in range(z_seq.shape[0]):
        mu, logvar, h, c = reference_forward(params, r, z_seq[t], h, c)
        mus.append(mu)
        logvars.append(logvar)
    return jnp.stack(mus), jnp.stack(logvars), h, c


# ----------------------------- main -------------------------------------------
if __name__ == "__main__":
    key = jax.random.PRNGKey(0)
    kp, kr, kz, kh, kc, kzs = jax.random.split(key, 6)
    params = init_params(kp)

    r = jax.random.normal(kr, (B, R_CH, 16, 16), jnp.float32)
    z = jax.random.normal(kz, (B, Z_CH, HW, HW), jnp.float32)
    h = jax.random.normal(kh, (B, H_CH, HW, HW), jnp.float32)
    c = jax.random.normal(kc, (B, H_CH, HW, HW), jnp.float32)

    tol = 1e-1 if USE_BF16_MXU else 2e-3

    # --- single step (module forward semantics) -------------------------------
    outs = jax.block_until_ready(latent_distribution_forward(params, r, z, h, c))
    refs = reference_forward(params, r, z, h, c)
    for name, o, rr in zip(("mu", "logvar", "h", "c"), outs, refs):
        assert o.shape == rr.shape, (name, o.shape, rr.shape)
        assert jnp.allclose(o, rr, atol=tol, rtol=tol), (
            name, float(jnp.max(jnp.abs(o - rr))))

    # --- fused T-step rollout: one pallas_call, grid=(T,) ----------------------
    T = 4
    z_seq = jax.random.normal(kzs, (T, B, Z_CH, HW, HW), jnp.float32)
    outs_r = jax.block_until_ready(latent_distribution_rollout(params, r, z_seq, h, c))
    refs_r = reference_rollout(params, r, z_seq, h, c)
    for name, o, rr in zip(("mu_seq", "logvar_seq", "h_T", "c_T"), outs_r, refs_r):
        assert o.shape == rr.shape, (name, o.shape, rr.shape)
        assert jnp.allclose(o, rr, atol=tol, rtol=tol), (
            name, float(jnp.max(jnp.abs(o - rr))))

    print("KERNEL_OK")
</pallas_src>

<mosaic_0001>
module attributes {stable_mosaic.version = 11 : i64} {
  func.func @_latent_dist_kernel(%arg0: i32, %arg1: memref<32x128xbf16, #tpu.memory_space<vmem>>, %arg2: memref<1x8x128xf32, #tpu.memory_space<vmem>>, %arg3: memref<16x128xf32, #tpu.memory_space<vmem>>, %arg4: memref<16x128xf32, #tpu.memory_space<vmem>>, %arg5: memref<16x32xbf16, #tpu.memory_space<vmem>>, %arg6: memref<16x1xf32, #tpu.memory_space<vmem>>, %arg7: memref<64x1024xbf16, #tpu.memory_space<vmem>>, %arg8: memref<64x1xf32, #tpu.memory_space<vmem>>, %arg9: memref<16x400xbf16, #tpu.memory_space<vmem>>, %arg10: memref<16x1xf32, #tpu.memory_space<vmem>>, %arg11: memref<25x1x128xf32, #tpu.memory_space<vmem>>, %arg12: memref<1x48x128xf32, #tpu.memory_space<vmem>>, %arg13: memref<1024x128xf32, #tpu.memory_space<vmem>>, %arg14: memref<16x128xf32, #tpu.memory_space<vmem>>, %arg15: memref<16x128xf32, #tpu.memory_space<vmem>>) attributes {dimension_semantics = [#tpu.dimension_semantics<arbitrary>], iteration_bounds = array<i64: 1>, scalar_prefetch = 0 : i64, scratch_operands = 3 : i64, tpu.core_type = #tpu.core_type<tc>, window_params = [{pipeline_mode = #tpu.pipeline_mode<synchronous>, transform_indices = @transform_0, window_bounds = array<i64: 32, 128>}, {transform_indices = @transform_1, window_bounds = array<i64: 1, 8, 128>}, {pipeline_mode = #tpu.pipeline_mode<synchronous>, transform_indices = @transform_2, window_bounds = array<i64: 16, 128>}, {pipeline_mode = #tpu.pipeline_mode<synchronous>, transform_indices = @transform_3, window_bounds = array<i64: 16, 128>}, {pipeline_mode = #tpu.pipeline_mode<synchronous>, transform_indices = @transform_4, window_bounds = array<i64: 16, 32>}, {pipeline_mode = #tpu.pipeline_mode<synchronous>, transform_indices = @transform_5, window_bounds = array<i64: 16, 1>}, {pipeline_mode = #tpu.pipeline_mode<synchronous>, transform_indices = @transform_6, window_bounds = array<i64: 64, 1024>}, {pipeline_mode = #tpu.pipeline_mode<synchronous>, transform_indices = @transform_7, window_bounds = array<i64: 64, 1>}, {pipeline_mode = #tpu.pipeline_mode<synchronous>, transform_indices = @transform_8, window_bounds = array<i64: 16, 400>}, {pipeline_mode = #tpu.pipeline_mode<synchronous>, transform_indices = @transform_9, window_bounds = array<i64: 16, 1>}, {pipeline_mode = #tpu.pipeline_mode<synchronous>, transform_indices = @transform_10, window_bounds = array<i64: 25, 1, 128>}, {transform_indices = @transform_11, window_bounds = array<i64: 1, 48, 128>}]} {
    %c0_i32 = arith.constant 0 : i32
    %0 = arith.cmpi eq, %arg0, %c0_i32 : i32
    %1 = arith.extui %0 : i1 to i32
    %c0_i32_0 = arith.constant 0 : i32
    %2 = arith.cmpi ne, %1, %c0_i32_0 : i32
    scf.if %2 {
      %c0_251 = arith.constant 0 : index
      %c0_252 = arith.constant 0 : index
      %360 = vector.load %arg3[%c0_251, %c0_252] : memref<16x128xf32, #tpu.memory_space<vmem>>, vector<16x128xf32>
      %c0_253 = arith.constant 0 : index
      %c0_254 = arith.constant 0 : index
      %361 = vector.load %arg14[%c0_253, %c0_254] : memref<16x128xf32, #tpu.memory_space<vmem>>, vector<16x128xf32>
      tpu.vector_store %arg14[%c0_253, %c0_254], %360 {strides = array<i32>} : memref<16x128xf32, #tpu.memory_space<vmem>>, vector<16x128xf32>,
      %c0_255 = arith.constant 0 : index
      %c0_256 = arith.constant 0 : index
      %362 = vector.load %arg4[%c0_255, %c0_256] : memref<16x128xf32, #tpu.memory_space<vmem>>, vector<16x128xf32>
      %c0_257 = arith.constant 0 : index
      %c0_258 = arith.constant 0 : index
      %363 = vector.load %arg15[%c0_257, %c0_258] : memref<16x128xf32, #tpu.memory_space<vmem>>, vector<16x128xf32>
      tpu.vector_store %arg15[%c0_257, %c0_258], %362 {strides = array<i32>} : memref<16x128xf32, #tpu.memory_space<vmem>>, vector<16x128xf32>,
      %cst_259 = arith.constant 0.000000e+00 : f32
      %364 = vector.broadcast %cst_259 : f32 to vector<24x128xf32>
      %c1000 = arith.constant 1000 : index
      %c0_260 = arith.constant 0 : index
      %365 = vector.load %arg13[%c1000, %c0_260] : memref<1024x128xf32, #tpu.memory_space<vmem>>, vector<24x128xf32>
      tpu.vector_store %arg13[%c1000, %c0_260], %364 {strides = array<i32>} : memref<1024x128xf32, #tpu.memory_space<vmem>>, vector<24x128xf32>,
    } else {
    }
    %c0 = arith.constant 0 : index
    %c0_1 = arith.constant 0 : index
    %3 = vector.load %arg5[%c0, %c0_1] : memref<16x32xbf16, #tpu.memory_space<vmem>>, vector<16x32xbf16>
    %c0_2 = arith.constant 0 : index
    %c0_3 = arith.constant 0 : index
    %4 = vector.load %arg1[%c0_2, %c0_3] : memref<32x128xbf16, #tpu.memory_space<vmem>>, vector<32x128xbf16>
    %cst = arith.constant dense<0.000000e+00> : vector<16x128xf32>
    %5 = tpu.matmul %3, %4, %cst {dimension_numbers = #tpu.dot_dimension_numbers<[1], [0], [0], [1], [0, 0, 1, 1], [], []>} : vector<16x32xbf16>, vector<32x128xbf16>, vector<16x128xf32> -> vector<16x128xf32>
    %c0_4 = arith.constant 0 : index
    %c0_5 = arith.constant 0 : index
    %6 = vector.load %arg6[%c0_4, %c0_5] : memref<16x1xf32, #tpu.memory_space<vmem>>, vector<16x1xf32>
    %7 = vector.broadcast %6 : vector<16x1xf32> to vector<16x128xf32>
    %8 = arith.addf %5, %7 : vector<16x128xf32>
    %c0_6 = arith.constant 0 : index
    %c0_7 = arith.constant 0 : index
    %c0_8 = arith.constant 0 : index
    %9 = vector.load %arg2[%c0_6, %c0_7, %c0_8] : memref<1x8x128xf32, #tpu.memory_space<vmem>>, vector<1x8x128xf32>
    %10 = vector.shape_cast %9 : vector<1x8x128xf32> to vector<8x128xf32>
    %c0_9 = arith.constant 0 : index
    %c0_10 = arith.constant 0 : index
    %11 = vector.load %arg14[%c0_9, %c0_10] : memref<16x128xf32, #tpu.memory_space<vmem>>, vector<16x128xf32>
    %12 = tpu.concatenate %8, %10, %11 in 0 : vector<16x128xf32>, vector<8x128xf32>, vector<16x128xf32> -> vector<40x128xf32>
    %c18_i32 = arith.constant 18 : i32
    %13 = tpu.dynamic_rotate %12 by %c18_i32 dim 1 : vector<40x128xf32>, i32 -> vector<40x128xf32>
    %c0_11 = arith.constant 0 : index
    %c0_12 = arith.constant 0 : index
    %c0_13 = arith.constant 0 : index
    %14 = vector.load %arg11[%c0_11, %c0_12, %c0_13] : memref<25x1x128xf32, #tpu.memory_space<vmem>>, vector<1x1x128xf32>
    %15 = vector.shape_cast %14 : vector<1x1x128xf32> to vector<1x128xf32>
    %16 = vector.broadcast %15 : vector<1x128xf32> to vector<40x128xf32>
    %17 = arith.mulf %13, %16 : vector<40x128xf32>
    %c0_14 = arith.constant 0 : index
    %c0_15 = arith.constant 0 : index
    %18 = vector.load %arg13[%c0_14, %c0_15] : memref<1024x128xf32, #tpu.memory_space<vmem>>, vector<40x128xf32>
    tpu.vector_store %arg13[%c0_14, %c0_15], %17 {strides = array<i32>} : memref<1024x128xf32, #tpu.memory_space<vmem>>, vector<40x128xf32>,
    %c17_i32 = arith.constant 17 : i32
    %19 = tpu.dynamic_rotate %12 by %c17_i32 dim 1 : vector<40x128xf32>, i32 -> vector<40x128xf32>
    %c1 = arith.constant 1 : index
    %c0_16 = arith.constant 0 : index
    %c0_17 = arith.constant 0 : index
    %20 = vector.load %arg11[%c1, %c0_16, %c0_17] : memref<25x1x128xf32, #tpu.memory_space<vmem>>, vector<1x1x128xf32>
    %21 = vector.shape_cast %20 : vector<1x1x128xf32> to vector<1x128xf32>
    %22 = vector.broadcast %21 : vector<1x128xf32> to vector<40x128xf32>
    %23 = arith.mulf %19, %22 : vector<40x128xf32>
    %c40 = arith.constant 40 : index
    %c0_18 = arith.constant 0 : index
    %24 = vector.load %arg13[%c40, %c0_18] : memref<1024x128xf32, #tpu.memory_space<vmem>>, vector<40x128xf32>
    tpu.vector_store %arg13[%c40, %c0_18], %23 {strides = array<i32>} : memref<1024x128xf32, #tpu.memory_space<vmem>>, vector<40x128xf32>,
    %c16_i32 = arith.constant 16 : i32
    %25 = tpu.dynamic_rotate %12 by %c16_i32 dim 1 : vector<40x128xf32>, i32 -> vector<40x128xf32>
    %c2 = arith.constant 2 : index
    %c0_19 = arith.constant 0 : index
    %c0_20 = arith.constant 0 : index
    %26 = vector.load %arg11[%c2, %c0_19, %c0_20] : memref<25x1x128xf32, #tpu.memory_space<vmem>>, vector<1x1x128xf32>
    %27 = vector.shape_cast %26 : vector<1x1x128xf32> to vector<1x128xf32>
    %28 = vector.broadcast %27 : vector<1x128xf32> to vector<40x128xf32>
    %29 = arith.mulf %25, %28 : vector<40x128xf32>
    %c80 = arith.constant 80 : index
    %c0_21 = arith.constant 0 : index
    %30 = vector.load %arg13[%c80, %c0_21] : memref<1024x128xf32, #tpu.memory_space<vmem>>, vector<40x128xf32>
    tpu.vector_store %arg13[%c80, %c0_21], %29 {strides = array<i32>} : memref<1024x128xf32, #tpu.memory_space<vmem>>, vector<40x128xf32>,
    %c15_i32 = arith.constant 15 : i32
    %31 = tpu.dynamic_rotate %12 by %c15_i32 dim 1 : vector<40x128xf32>, i32 -> vector<40x128xf32>
    %c3 = arith.constant 3 : index
    %c0_22 = arith.constant 0 : index
    %c0_23 = arith.constant 0 : index
    %32 = vector.load %arg11[%c3, %c0_22, %c0_23] : memref<25x1x128xf32, #tpu.memory_space<vmem>>, vector<1x1x128xf32>
    %33 = vector.shape_cast %32 : vector<1x1x128xf32> to vector<1x128xf32>
    %34 = vector.broadcast %33 : vector<1x128xf32> to vector<40x128xf32>
    %35 = arith.mulf %31, %34 : vector<40x128xf32>
    %c120 = arith.constant 120 : index
    %c0_24 = arith.constant 0 : index
    %36 = vector.load %arg13[%c120, %c0_24] : memref<1024x128xf32, #tpu.memory_space<vmem>>, vector<40x128xf32>
    tpu.vector_store %arg13[%c120, %c0_24], %35 {strides = array<i32>} : memref<1024x128xf32, #tpu.memory_space<vmem>>, vector<40x128xf32>,
    %c14_i32 = arith.constant 14 : i32
    %37 = tpu.dynamic_rotate %12 by %c14_i32 dim 1 : vector<40x128xf32>, i32 -> vector<40x128xf32>
    %c4 = arith.constant 4 : index
    %c0_25 = arith.constant 0 : index
    %c0_26 = arith.constant 0 : index
    %38 = vector.load %arg11[%c4, %c0_25, %c0_26] : memref<25x1x128xf32, #tpu.memory_space<vmem>>, vector<1x1x128xf32>
    %39 = vector.shape_cast %38 : vector<1x1x128xf32> to vector<1x128xf32>
    %40 = vector.broadcast %39 : vector<1x128xf32> to vector<40x128xf32>
    %41 = arith.mulf %37, %40 : vector<40x128xf32>
    %c160 = arith.constant 160 : index
    %c0_27 = arith.constant 0 : index
    %42 = vector.load %arg13[%c160, %c0_27] : memref<1024x128xf32, #tpu.memory_space<vmem>>, vector<40x128xf32>
    tpu.vector_store %arg13[%c160, %c0_27], %41 {strides = array<i32>} : memref<1024x128xf32, #tpu.memory_space<vmem>>, vector<40x128xf32>,
    %c10_i32 = arith.constant 10 : i32
    %43 = tpu.dynamic_rotate %12 by %c10_i32 dim 1 : vector<40x128xf32>, i32 -> vector<40x128xf32>
    %c5 = arith.constant 5 : index
    %c0_28 = arith.constant 0 : index
    %c0_29 = arith.constant 0 : index
    %44 = vector.load %arg11[%c5, %c0_28, %c0_29] : memref<25x1x128xf32, #tpu.memory_space<vmem>>, vector<1x1x128xf32>
    %45 = vector.shape_cast %44 : vector<1x1x128xf32> to vector<1x128xf32>
    %46 = vector.broadcast %45 : vector<1x128xf32> to vector<40x128xf32>
    %47 = arith.mulf %43, %46 : vector<40x128xf32>
    %c200 = arith.constant 200 : index
    %c0_30 = arith.constant 0 : index
    %48 = vector.load %arg13[%c200, %c0_30] : memref<1024x128xf32, #tpu.memory_space<vmem>>, vector<40x128xf32>
    tpu.vector_store %arg13[%c200, %c0_30], %47 {strides = array<i32>} : memref<1024x128xf32, #tpu.memory_space<vmem>>, vector<40x128xf32>,
    %c9_i32 = arith.constant 9 : i32
    %49 = tpu.dynamic_rotate %12 by %c9_i32 dim 1 : vector<40x128xf32>, i32 -> vector<40x128xf32>
    %c6 = arith.constant 6 : index
    %c0_31 = arith.constant 0 : index
    %c0_32 = arith.constant 0 : index
    %50 = vector.load %arg11[%c6, %c0_31, %c0_32] : memref<25x1x128xf32, #tpu.memory_space<vmem>>, vector<1x1x128xf32>
    %51 = vector.shape_cast %50 : vector<1x1x128xf32> to vector<1x128xf32>
    %52 = vector.broadcast %51 : vector<1x128xf32> to vector<40x128xf32>
    %53 = arith.mulf %49, %52 : vector<40x128xf32>
    %c240 = arith.constant 240 : index
    %c0_33 = arith.constant 0 : index
    %54 = vector.load %arg13[%c240, %c0_33] : memref<1024x128xf32, #tpu.memory_space<vmem>>, vector<40x128xf32>
    tpu.vector_store %arg13[%c240, %c0_33], %53 {strides = array<i32>} : memref<1024x128xf32, #tpu.memory_space<vmem>>, vector<40x128xf32>,
    %c8_i32 = arith.constant 8 : i32
    %55 = tpu.dynamic_rotate %12 by %c8_i32 dim 1 : vector<40x128xf32>, i32 -> vector<40x128xf32>
    %c7 = arith.constant 7 : index
    %c0_34 = arith.constant 0 : index
    %c0_35 = arith.constant 0 : index
    %56 = vector.load %arg11[%c7, %c0_34, %c0_35] : memref<25x1x128xf32, #tpu.memory_space<vmem>>, vector<1x1x128xf32>
    %57 = vector.shape_cast %56 : vector<1x1x128xf32> to vector<1x128xf32>
    %58 = vector.broadcast %57 : vector<1x128xf32> to vector<40x128xf32>
    %59 = arith.mulf %55, %58 : vector<40x128xf32>
    %c280 = arith.constant 280 : index
    %c0_36 = arith.constant 0 : index
    %60 = vector.load %arg13[%c280, %c0_36] : memref<1024x128xf32, #tpu.memory_space<vmem>>, vector<40x128xf32>
    tpu.vector_store %arg13[%c280, %c0_36], %59 {strides = array<i32>} : memref<1024x128xf32, #tpu.memory_space<vmem>>, vector<40x128xf32>,
    %c7_i32 = arith.constant 7 : i32
    %61 = tpu.dynamic_rotate %12 by %c7_i32 dim 1 : vector<40x128xf32>, i32 -> vector<40x128xf32>
    %c8 = arith.constant 8 : index
    %c0_37 = arith.constant 0 : index
    %c0_38 = arith.constant 0 : index
    %62 = vector.load %arg11[%c8, %c0_37, %c0_38] : memref<25x1x128xf32, #tpu.memory_space<vmem>>, vector<1x1x128xf32>
    %63 = vector.shape_cast %62 : vector<1x1x128xf32> to vector<1x128xf32>
    %64 = vector.broadcast %63 : vector<1x128xf32> to vector<40x128xf32>
    %65 = arith.mulf %61, %64 : vector<40x128xf32>
    %c320 = arith.constant 320 : index
    %c0_39 = arith.constant 0 : index
    %66 = vector.load %arg13[%c320, %c0_39] : memref<1024x128xf32, #tpu.memory_space<vmem>>, vector<40x128xf32>
    tpu.vector_store %arg13[%c320, %c0_39], %65 {strides = array<i32>} : memref<1024x128xf32, #tpu.memory_space<vmem>>, vector<40x128xf32>,
    %c6_i32 = arith.constant 6 : i32
    %67 = tpu.dynamic_rotate %12 by %c6_i32 dim 1 : vector<40x128xf32>, i32 -> vector<40x128xf32>
    %c9 = arith.constant 9 : index
    %c0_40 = arith.constant 0 : index
    %c0_41 = arith.constant 0 : index
    %68 = vector.load %arg11[%c9, %c0_40, %c0_41] : memref<25x1x128xf32, #tpu.memory_space<vmem>>, vector<1x1x128xf32>
    %69 = vector.shape_cast %68 : vector<1x1x128xf32> to vector<1x128xf32>
    %70 = vector.broadcast %69 : vector<1x128xf32> to vector<40x128xf32>
    %71 = arith.mulf %67, %70 : vector<40x128xf32>
    %c360 = arith.constant 360 : index
    %c0_42 = arith.constant 0 : index
    %72 = vector.load %arg13[%c360, %c0_42] : memref<1024x128xf32, #tpu.memory_space<vmem>>, vector<40x128xf32>
    tpu.vector_store %arg13[%c360, %c0_42], %71 {strides = array<i32>} : memref<1024x128xf32, #tpu.memory_space<vmem>>, vector<40x128xf32>,
    %c2_i32 = arith.constant 2 : i32
    %73 = tpu.dynamic_rotate %12 by %c2_i32 dim 1 : vector<40x128xf32>, i32 -> vector<40x128xf32>
    %c10 = arith.constant 10 : index
    %c0_43 = arith.constant 0 : index
    %c0_44 = arith.constant 0 : index
    %74 = vector.load %arg11[%c10, %c0_43, %c0_44] : memref<25x1x128xf32, #tpu.memory_space<vmem>>, vector<1x1x128xf32>
    %75 = vector.shape_cast %74 : vector<1x1x128xf32> to vector<1x128xf32>
    %76 = vector.broadcast %75 : vector<1x128xf32> to vector<40x128xf32>
    %77 = arith.mulf %73, %76 : vector<40x128xf32>
    %c400 = arith.constant 400 : index
    %c0_45 = arith.constant 0 : index
    %78 = vector.load %arg13[%c400, %c0_45] : memref<1024x128xf32, #tpu.memory_space<vmem>>, vector<40x128xf32>
    tpu.vector_store %arg13[%c400, %c0_45], %77 {strides = array<i32>} : memref<1024x128xf32, #tpu.memory_space<vmem>>, vector<40x128xf32>,
    %c1_i32 = arith.constant 1 : i32
    %79 = tpu.dynamic_rotate %12 by %c1_i32 dim 1 : vector<40x128xf32>, i32 -> vector<40x128xf32>
    %c11 = arith.constant 11 : index
    %c0_46 = arith.constant 0 : index
    %c0_47 = arith.constant 0 : index
    %80 = vector.load %arg11[%c11, %c0_46, %c0_47] : memref<25x1x128xf32, #tpu.memory_space<vmem>>, vector<1x1x128xf32>
    %81 = vector.shape_cast %80 : vector<1x1x128xf32> to vector<1x128xf32>
    %82 = vector.broadcast %81 : vector<1x128xf32> to vector<40x128xf32>
    %83 = arith.mulf %79, %82 : vector<40x128xf32>
    %c440 = arith.constant 440 : index
    %c0_48 = arith.constant 0 : index
    %84 = vector.load %arg13[%c440, %c0_48] : memref<1024x128xf32, #tpu.memory_space<vmem>>, vector<40x128xf32>
    tpu.vector_store %arg13[%c440, %c0_48], %83 {strides = array<i32>} : memref<1024x128xf32, #tpu.memory_space<vmem>>, vector<40x128xf32>,
    %c480 = arith.constant 480 : index
    %c0_49 = arith.constant 0 : index
    %85 = vector.load %arg13[%c480, %c0_49] : memref<1024x128xf32, #tpu.memory_space<vmem>>, vector<40x128xf32>
    tpu.vector_store %arg13[%c480, %c0_49], %12 {strides = array<i32>} : memref<1024x128xf32, #tpu.memory_space<vmem>>, vector<40x128xf32>,
    %c127_i32 = arith.constant 127 : i32
    %86 = tpu.dynamic_rotate %12 by %c127_i32 dim 1 : vector<40x128xf32>, i32 -> vector<40x128xf32>
    %c13 = arith.constant 13 : index
    %c0_50 = arith.constant 0 : index
    %c0_51 = arith.constant 0 : index
    %87 = vector.load %arg11[%c13, %c0_50, %c0_51] : memref<25x1x128xf32, #tpu.memory_space<vmem>>, vector<1x1x128xf32>
    %88 = vector.shape_cast %87 : vector<1x1x128xf32> to vector<1x128xf32>
    %89 = vector.broadcast %88 : vector<1x128xf32> to vector<40x128xf32>
    %90 = arith.mulf %86, %89 : vector<40x128xf32>
    %c520 = arith.constant 520 : index
    %c0_52 = arith.constant 0 : index
    %91 = vector.load %arg13[%c520, %c0_52] : memref<1024x128xf32, #tpu.memory_space<vmem>>, vector<40x128xf32>
    tpu.vector_store %arg13[%c520, %c0_52], %90 {strides = array<i32>} : memref<1024x128xf32, #tpu.memory_space<vmem>>, vector<40x128xf32>,
    %c126_i32 = arith.constant 126 : i32
    %92 = tpu.dynamic_rotate %12 by %c126_i32 dim 1 : vector<40x128xf32>, i32 -> vector<40x128xf32>
    %c14 = arith.constant 14 : index
    %c0_53 = arith.constant 0 : index
    %c0_54 = arith.constant 0 : index
    %93 = vector.load %arg11[%c14, %c0_53, %c0_54] : memref<25x1x128xf32, #tpu.memory_space<vmem>>, vector<1x1x128xf32>
    %94 = vector.shape_cast %93 : vector<1x1x128xf32> to vector<1x128xf32>
    %95 = vector.broadcast %94 : vector<1x128xf32> to vector<40x128xf32>
    %96 = arith.mulf %92, %95 : vector<40x128xf32>
    %c560 = arith.constant 560 : index
    %c0_55 = arith.constant 0 : index
    %97 = vector.load %arg13[%c560, %c0_55] : memref<1024x128xf32, #tpu.memory_space<vmem>>, vector<40x128xf32>
    tpu.vector_store %arg13[%c560, %c0_55], %96 {strides = array<i32>} : memref<1024x128xf32, #tpu.memory_space<vmem>>, vector<40x128xf32>,
    %c122_i32 = arith.constant 122 : i32
    %98 = tpu.dynamic_rotate %12 by %c122_i32 dim 1 : vector<40x128xf32>, i32 -> vector<40x128xf32>
    %c15 = arith.constant 15 : index
    %c0_56 = arith.constant 0 : index
    %c0_57 = arith.constant 0 : index
    %99 = vector.load %arg11[%c15, %c0_56, %c0_57] : memref<25x1x128xf32, #tpu.memory_space<vmem>>, vector<1x1x128xf32>
    %100 = vector.shape_cast %99 : vector<1x1x128xf32> to vector<1x128xf32>
    %101 = vector.broadcast %100 : vector<1x128xf32> to vector<40x128xf32>
    %102 = arith.mulf %98, %101 : vector<40x128xf32>
    %c600 = arith.constant 600 : index
    %c0_58 = arith.constant 0 : index
    %103 = vector.load %arg13[%c600, %c0_58] : memref<1024x128xf32, #tpu.memory_space<vmem>>, vector<40x128xf32>
    tpu.vector_store %arg13[%c600, %c0_58], %102 {strides = array<i32>} : memref<1024x128xf32, #tpu.memory_space<vmem>>, vector<40x128xf32>,
    %c121_i32 = arith.constant 121 : i32
    %104 = tpu.dynamic_rotate %12 by %c121_i32 dim 1 : vector<40x128xf32>, i32 -> vector<40x128xf32>
    %c16 = arith.constant 16 : index
    %c0_59 = arith.constant 0 : index
    %c0_60 = arith.constant 0 : index
    %105 = vector.load %arg11[%c16, %c0_59, %c0_60] : memref<25x1x128xf32, #tpu.memory_space<vmem>>, vector<1x1x128xf32>
    %106 = vector.shape_cast %105 : vector<1x1x128xf32> to vector<1x128xf32>
    %107 = vector.broadcast %106 : vector<1x128xf32> to vector<40x128xf32>
    %108 = arith.mulf %104, %107 : vector<40x128xf32>
    %c640 = arith.constant 640 : index
    %c0_61 = arith.constant 0 : index
    %109 = vector.load %arg13[%c640, %c0_61] : memref<1024x128xf32, #tpu.memory_space<vmem>>, vector<40x128xf32>
    tpu.vector_store %arg13[%c640, %c0_61], %108 {strides = array<i32>} : memref<1024x128xf32, #tpu.memory_space<vmem>>, vector<40x128xf32>,
    %c120_i32 = arith.constant 120 : i32
    %110 = tpu.dynamic_rotate %12 by %c120_i32 dim 1 : vector<40x128xf32>, i32 -> vector<40x128xf32>
    %c17 = arith.constant 17 : index
    %c0_62 = arith.constant 0 : index
    %c0_63 = arith.constant 0 : index
    %111 = vector.load %arg11[%c17, %c0_62, %c0_63] : memref<25x1x128xf32, #tpu.memory_space<vmem>>, vector<1x1x128xf32>
    %112 = vector.shape_cast %111 : vector<1x1x128xf32> to vector<1x128xf32>
    %113 = vector.broadcast %112 : vector<1x128xf32> to vector<40x128xf32>
    %114 = arith.mulf %110, %113 : vector<40x128xf32>
    %c680 = arith.constant 680 : index
    %c0_64 = arith.constant 0 : index
    %115 = vector.load %arg13[%c680, %c0_64] : memref<1024x128xf32, #tpu.memory_space<vmem>>, vector<40x128xf32>
    tpu.vector_store %arg13[%c680, %c0_64], %114 {strides = array<i32>} : memref<1024x128xf32, #tpu.memory_space<vmem>>, vector<40x128xf32>,
    %c119_i32 = arith.constant 119 : i32
    %116 = tpu.dynamic_rotate %12 by %c119_i32 dim 1 : vector<40x128xf32>, i32 -> vector<40x128xf32>
    %c18 = arith.constant 18 : index
    %c0_65 = arith.constant 0 : index
    %c0_66 = arith.constant 0 : index
    %117 = vector.load %arg11[%c18, %c0_65, %c0_66] : memref<25x1x128xf32, #tpu.memory_space<vmem>>, vector<1x1x128xf32>
    %118 = vector.shape_cast %117 : vector<1x1x128xf32> to vector<1x128xf32>
    %119 = vector.broadcast %118 : vector<1x128xf32> to vector<40x128xf32>
    %120 = arith.mulf %116, %119 : vector<40x128xf32>
    %c720 = arith.constant 720 : index
    %c0_67 = arith.constant 0 : index
    %121 = vector.load %arg13[%c720, %c0_67] : memref<1024x128xf32, #tpu.memory_space<vmem>>, vector<40x128xf32>
    tpu.vector_store %arg13[%c720, %c0_67], %120 {strides = array<i32>} : memref<1024x128xf32, #tpu.memory_space<vmem>>, vector<40x128xf32>,
    %c118_i32 = arith.constant 118 : i32
    %122 = tpu.dynamic_rotate %12 by %c118_i32 dim 1 : vector<40x128xf32>, i32 -> vector<40x128xf32>
    %c19 = arith.constant 19 : index
    %c0_68 = arith.constant 0 : index
    %c0_69 = arith.constant 0 : index
    %123 = vector.load %arg11[%c19, %c0_68, %c0_69] : memref<25x1x128xf32, #tpu.memory_space<vmem>>, vector<1x1x128xf32>
    %124 = vector.shape_cast %123 : vector<1x1x128xf32> to vector<1x128xf32>
    %125 = vector.broadcast %124 : vector<1x128xf32> to vector<40x128xf32>
    %126 = arith.mulf %122, %125 : vector<40x128xf32>
    %c760 = arith.constant 760 : index
    %c0_70 = arith.constant 0 : index
    %127 = vector.load %arg13[%c760, %c0_70] : memref<1024x128xf32, #tpu.memory_space<vmem>>, vector<40x128xf32>
    tpu.vector_store %arg13[%c760, %c0_70], %126 {strides = array<i32>} : memref<1024x128xf32, #tpu.memory_space<vmem>>, vector<40x128xf32>,
    %c114_i32 = arith.constant 114 : i32
    %128 = tpu.dynamic_rotate %12 by %c114_i32 dim 1 : vector<40x128xf32>, i32 -> vector<40x128xf32>
    %c20 = arith.constant 20 : index
    %c0_71 = arith.constant 0 : index
    %c0_72 = arith.constant 0 : index
    %129 = vector.load %arg11[%c20, %c0_71, %c0_72] : memref<25x1x128xf32, #tpu.memory_space<vmem>>, vector<1x1x128xf32>
    %130 = vector.shape_cast %129 : vector<1x1x128xf32> to vector<1x128xf32>
    %131 = vector.broadcast %130 : vector<1x128xf32> to vector<40x128xf32>
    %132 = arith.mulf %128, %131 : vector<40x128xf32>
    %c800 = arith.constant 800 : index
    %c0_73 = arith.constant 0 : index
    %133 = vector.load %arg13[%c800, %c0_73] : memref<1024x128xf32, #tpu.memory_space<vmem>>, vector<40x128xf32>
    tpu.vector_store %arg13[%c800, %c0_73], %132 {strides = array<i32>} : memref<1024x128xf32, #tpu.memory_space<vmem>>, vector<40x128xf32>,
    %c113_i32 = arith.constant 113 : i32
    %134 = tpu.dynamic_rotate %12 by %c113_i32 dim 1 : vector<40x128xf32>, i32 -> vector<40x128xf32>
    %c21 = arith.constant 21 : index
    %c0_74 = arith.constant 0 : index
    %c0_75 = arith.constant 0 : index
    %135 = vector.load %arg11[%c21, %c0_74, %c0_75] : memref<25x1x128xf32, #tpu.memory_space<vmem>>, vector<1x1x128xf32>
    %136 = vector.shape_cast %135 : vector<1x1x128xf32> to vector<1x128xf32>
    %137 = vector.broadcast %136 : vector<1x128xf32> to vector<40x128xf32>
    %138 = arith.mulf %134, %137 : vector<40x128xf32>
    %c840 = arith.constant 840 : index
    %c0_76 = arith.constant 0 : index
    %139 = vector.load %arg13[%c840, %c0_76] : memref<1024x128xf32, #tpu.memory_space<vmem>>, vector<40x128xf32>
    tpu.vector_store %arg13[%c840, %c0_76], %138 {strides = array<i32>} : memref<1024x128xf32, #tpu.memory_space<vmem>>, vector<40x128xf32>,
    %c112_i32 = arith.constant 112 : i32
    %140 = tpu.dynamic_rotate %12 by %c112_i32 dim 1 : vector<40x128xf32>, i32 -> vector<40x128xf32>
    %c22 = arith.constant 22 : index
    %c0_77 = arith.constant 0 : index
    %c0_78 = arith.constant 0 : index
    %141 = vector.load %arg11[%c22, %c0_77, %c0_78] : memref<25x1x128xf32, #tpu.memory_space<vmem>>, vector<1x1x128xf32>
    %142 = vector.shape_cast %141 : vector<1x1x128xf32> to vector<1x128xf32>
    %143 = vector.broadcast %142 : vector<1x128xf32> to vector<40x128xf32>
    %144 = arith.mulf %140, %143 : vector<40x128xf32>
    %c880 = arith.constant 880 : index
    %c0_79 = arith.constant 0 : index
    %145 = vector.load %arg13[%c880, %c0_79] : memref<1024x128xf32, #tpu.memory_space<vmem>>, vector<40x128xf32>
    tpu.vector_store %arg13[%c880, %c0_79], %144 {strides = array<i32>} : memref<1024x128xf32, #tpu.memory_space<vmem>>, vector<40x128xf32>,
    %c111_i32 = arith.constant 111 : i32
    %146 = tpu.dynamic_rotate %12 by %c111_i32 dim 1 : vector<40x128xf32>, i32 -> vector<40x128xf32>
    %c23 = arith.constant 23 : index
    %c0_80 = arith.constant 0 : index
    %c0_81 = arith.constant 0 : index
    %147 = vector.load %arg11[%c23, %c0_80, %c0_81] : memref<25x1x128xf32, #tpu.memory_space<vmem>>, vector<1x1x128xf32>
    %148 = vector.shape_cast %147 : vector<1x1x128xf32> to vector<1x128xf32>
    %149 = vector.broadcast %148 : vector<1x128xf32> to vector<40x128xf32>
    %150 = arith.mulf %146, %149 : vector<40x128xf32>
    %c920 = arith.constant 920 : index
    %c0_82 = arith.constant 0 : index
    %151 = vector.load %arg13[%c920, %c0_82] : memref<1024x128xf32, #tpu.memory_space<vmem>>, vector<40x128xf32>
    tpu.vector_store %arg13[%c920, %c0_82], %150 {strides = array<i32>} : memref<1024x128xf32, #tpu.memory_space<vmem>>, vector<40x128xf32>,
    %c110_i32 = arith.constant 110 : i32
    %152 = tpu.dynamic_rotate %12 by %c110_i32 dim 1 : vector<40x128xf32>, i32 -> vector<40x128xf32>
    %c24 = arith.constant 24 : index
    %c0_83 = arith.constant 0 : index
    %c0_84 = arith.constant 0 : index
    %153 = vector.load %arg11[%c24, %c0_83, %c0_84] : memref<25x1x128xf32, #tpu.memory_space<vmem>>, vector<1x1x128xf32>
    %154 = vector.shape_cast %153 : vector<1x1x128xf32> to vector<1x128xf32>
    %155 = vector.broadcast %154 : vector<1x128xf32> to vector<40x128xf32>
    %156 = arith.mulf %152, %155 : vector<40x128xf32>
    %c960 = arith.constant 960 : index
    %c0_85 = arith.constant 0 : index
    %157 = vector.load %arg13[%c960, %c0_85] : memref<1024x128xf32, #tpu.memory_space<vmem>>, vector<40x128xf32>
    tpu.vector_store %arg13[%c960, %c0_85], %156 {strides = array<i32>} : memref<1024x128xf32, #tpu.memory_space<vmem>>, vector<40x128xf32>,
    %c0_86 = arith.constant 0 : index
    %c0_87 = arith.constant 0 : index
    %158 = vector.load %arg7[%c0_86, %c0_87] : memref<64x1024xbf16, #tpu.memory_space<vmem>>, vector<64x1024xbf16>
    %c0_88 = arith.constant 0 : index
    %c0_89 = arith.constant 0 : index
    %159 = vector.load %arg13[%c0_88, %c0_89] : memref<1024x128xf32, #tpu.memory_space<vmem>>, vector<1024x128xf32>
    %160 = arith.truncf %159 : vector<1024x128xf32> to vector<1024x128xbf16>
    %cst_90 = arith.constant dense<0.000000e+00> : vector<64x128xf32>
    %161 = tpu.matmul %158, %160, %cst_90 {dimension_numbers = #tpu.dot_dimension_numbers<[1], [0], [0], [1], [0, 0, 1, 1], [], []>} : vector<64x1024xbf16>, vector<1024x128xbf16>, vector<64x128xf32> -> vector<64x128xf32>
    %c0_91 = arith.constant 0 : index
    %c0_92 = arith.constant 0 : index
    %162 = vector.load %arg8[%c0_91, %c0_92] : memref<64x1xf32, #tpu.memory_space<vmem>>, vector<64x1xf32>
    %163 = vector.broadcast %162 : vector<64x1xf32> to vector<64x128xf32>
    %164 = arith.addf %161, %163 : vector<64x128xf32>
    %165 = vector.extract_strided_slice %164 {offsets = [0, 0], sizes = [16, 128], strides = [1, 1]} : vector<64x128xf32> to vector<16x128xf32>
    %cst_93 = arith.constant 5.000000e-01 : f32
    %166 = vector.broadcast %cst_93 : f32 to vector<16x128xf32>
    %167 = arith.mulf %166, %165 : vector<16x128xf32>
    %168 = math.tanh %167 : vector<16x128xf32>
    %cst_94 = arith.constant 5.000000e-01 : f32
    %169 = vector.broadcast %cst_94 : f32 to vector<16x128xf32>
    %170 = arith.mulf %169, %168 : vector<16x128xf32>
    %cst_95 = arith.constant 5.000000e-01 : f32
    %171 = vector.broadcast %cst_95 : f32 to vector<16x128xf32>
    %172 = arith.addf %170, %171 : vector<16x128xf32>
    %173 = vector.extract_strided_slice %164 {offsets = [16, 0], sizes = [16, 128], strides = [1, 1]} : vector<64x128xf32> to vector<16x128xf32>
    %cst_96 = arith.constant 5.000000e-01 : f32
    %174 = vector.broadcast %cst_96 : f32 to vector<16x128xf32>
    %175 = arith.mulf %174, %173 : vector<16x128xf32>
    %176 = math.tanh %175 : vector<16x128xf32>
    %cst_97 = arith.constant 5.000000e-01 : f32
    %177 = vector.broadcast %cst_97 : f32 to vector<16x128xf32>
    %178 = arith.mulf %177, %176 : vector<16x128xf32>
    %cst_98 = arith.constant 5.000000e-01 : f32
    %179 = vector.broadcast %cst_98 : f32 to vector<16x128xf32>
    %180 = arith.addf %178, %179 : vector<16x128xf32>
    %181 = vector.extract_strided_slice %164 {offsets = [32, 0], sizes = [16, 128], strides = [1, 1]} : vector<64x128xf32> to vector<16x128xf32>
    %cst_99 = arith.constant 5.000000e-01 : f32
    %182 = vector.broadcast %cst_99 : f32 to vector<16x128xf32>
    %183 = arith.mulf %182, %181 : vector<16x128xf32>
    %184 = math.tanh %183 : vector<16x128xf32>
    %cst_100 = arith.constant 5.000000e-01 : f32
    %185 = vector.broadcast %cst_100 : f32 to vector<16x128xf32>
    %186 = arith.mulf %185, %184 : vector<16x128xf32>
    %cst_101 = arith.constant 5.000000e-01 : f32
    %187 = vector.broadcast %cst_101 : f32 to vector<16x128xf32>
    %188 = arith.addf %186, %187 : vector<16x128xf32>
    %189 = vector.extract_strided_slice %164 {offsets = [48, 0], sizes = [16, 128], strides = [1, 1]} : vector<64x128xf32> to vector<16x128xf32>
    %190 = math.tanh %189 : vector<16x128xf32>
    %c0_102 = arith.constant 0 : index
    %c0_103 = arith.constant 0 : index
    %191 = vector.load %arg15[%c0_102, %c0_103] : memref<16x128xf32, #tpu.memory_space<vmem>>, vector<16x128xf32>
    %192 = arith.mulf %172, %191 : vector<16x128xf32>
    %193 = arith.mulf %180, %190 : vector<16x128xf32>
    %194 = arith.addf %192, %193 : vector<16x128xf32>
    %195 = math.tanh %194 : vector<16x128xf32>
    %196 = arith.mulf %188, %195 : vector<16x128xf32>
    %c0_104 = arith.constant 0 : index
    %c0_105 = arith.constant 0 : index
    %197 = vector.load %arg14[%c0_104, %c0_105] : memref<16x128xf32, #tpu.memory_space<vmem>>, vector<16x128xf32>
    tpu.vector_store %arg14[%c0_104, %c0_105], %196 {strides = array<i32>} : memref<16x128xf32, #tpu.memory_space<vmem>>, vector<16x128xf32>,
    %c0_106 = arith.constant 0 : index
    %c0_107 = arith.constant 0 : index
    %198 = vector.load %arg15[%c0_106, %c0_107] : memref<16x128xf32, #tpu.memory_space<vmem>>, vector<16x128xf32>
    tpu.vector_store %arg15[%c0_106, %c0_107], %194 {strides = array<i32>} : memref<16x128xf32, #tpu.memory_space<vmem>>, vector<16x128xf32>,
    %c18_i32_108 = arith.constant 18 : i32
    %199 = tpu.dynamic_rotate %196 by %c18_i32_108 dim 1 : vector<16x128xf32>, i32 -> vector<16x128xf32>
    %c0_109 = arith.constant 0 : index
    %c0_110 = arith.constant 0 : index
    %c0_111 = arith.constant 0 : index
    %200 = vector.load %arg11[%c0_109, %c0_110, %c0_111] : memref<25x1x128xf32, #tpu.memory_space<vmem>>, vector<1x1x128xf32>
    %201 = vector.shape_cast %200 : vector<1x1x128xf32> to vector<1x128xf32>
    %202 = vector.broadcast %201 : vector<1x128xf32> to vector<16x128xf32>
    %203 = arith.mulf %199, %202 : vector<16x128xf32>
    %c0_112 = arith.constant 0 : index
    %c0_113 = arith.constant 0 : index
    %204 = vector.load %arg13[%c0_112, %c0_113] : memref<1024x128xf32, #tpu.memory_space<vmem>>, vector<16x128xf32>
    tpu.vector_store %arg13[%c0_112, %c0_113], %203 {strides = array<i32>} : memref<1024x128xf32, #tpu.memory_space<vmem>>, vector<16x128xf32>,
    %c17_i32_114 = arith.constant 17 : i32
    %205 = tpu.dynamic_rotate %196 by %c17_i32_114 dim 1 : vector<16x128xf32>, i32 -> vector<16x128xf32>
    %c1_115 = arith.constant 1 : index
    %c0_116 = arith.constant 0 : index
    %c0_117 = arith.constant 0 : index
    %206 = vector.load %arg11[%c1_115, %c0_116, %c0_117] : memref<25x1x128xf32, #tpu.memory_space<vmem>>, vector<1x1x128xf32>
    %207 = vector.shape_cast %206 : vector<1x1x128xf32> to vector<1x128xf32>
    %208 = vector.broadcast %207 : vector<1x128xf32> to vector<16x128xf32>
    %209 = arith.mulf %205, %208 : vector<16x128xf32>
    %c16_118 = arith.constant 16 : index
    %c0_119 = arith.constant 0 : index
    %210 = vector.load %arg13[%c16_118, %c0_119] : memref<1024x128xf32, #tpu.memory_space<vmem>>, vector<16x128xf32>
    tpu.vector_store %arg13[%c16_118, %c0_119], %209 {strides = array<i32>} : memref<1024x128xf32, #tpu.memory_space<vmem>>, vector<16x128xf32>,
    %c16_i32_120 = arith.constant 16 : i32
    %211 = tpu.dynamic_rotate %196 by %c16_i32_120 dim 1 : vector<16x128xf32>, i32 -> vector<16x128xf32>
    %c2_121 = arith.constant 2 : index
    %c0_122 = arith.constant 0 : index
    %c0_123 = arith.constant 0 : index
    %212 = vector.load %arg11[%c2_121, %c0_122, %c0_123] : memref<25x1x128xf32, #tpu.memory_space<vmem>>, vector<1x1x128xf32>
    %213 = vector.shape_cast %212 : vector<1x1x128xf32> to vector<1x128xf32>
    %214 = vector.broadcast %213 : vector<1x128xf32> to vector<16x128xf32>
    %215 = arith.mulf %211, %214 : vector<16x128xf32>
    %c32 = arith.constant 32 : index
    %c0_124 = arith.constant 0 : index
    %216 = vector.load %arg13[%c32, %c0_124] : memref<1024x128xf32, #tpu.memory_space<vmem>>, vector<16x128xf32>
    tpu.vector_store %arg13[%c32, %c0_124], %215 {strides = array<i32>} : memref<1024x128xf32, #tpu.memory_space<vmem>>, vector<16x128xf32>,
    %c15_i32_125 = arith.constant 15 : i32
    %217 = tpu.dynamic_rotate %196 by %c15_i32_125 dim 1 : vector<16x128xf32>, i32 -> vector<16x128xf32>
    %c3_126 = arith.constant 3 : index
    %c0_127 = arith.constant 0 : index
    %c0_128 = arith.constant 0 : index
    %218 = vector.load %arg11[%c3_126, %c0_127, %c0_128] : memref<25x1x128xf32, #tpu.memory_space<vmem>>, vector<1x1x128xf32>
    %219 = vector.shape_cast %218 : vector<1x1x128xf32> to vector<1x128xf32>
    %220 = vector.broadcast %219 : vector<1x128xf32> to vector<16x128xf32>
    %221 = arith.mulf %217, %220 : vector<16x128xf32>
    %c48 = arith.constant 48 : index
    %c0_129 = arith.constant 0 : index
    %222 = vector.load %arg13[%c48, %c0_129] : memref<1024x128xf32, #tpu.memory_space<vmem>>, vector<16x128xf32>
    tpu.vector_store %arg13[%c48, %c0_129], %221 {strides = array<i32>} : memref<1024x128xf32, #tpu.memory_space<vmem>>, vector<16x128xf32>,
    %c14_i32_130 = arith.constant 14 : i32
    %223 = tpu.dynamic_rotate %196 by %c14_i32_130 dim 1 : vector<16x128xf32>, i32 -> vector<16x128xf32>
    %c4_131 = arith.constant 4 : index
    %c0_132 = arith.constant 0 : index
    %c0_133 = arith.constant 0 : index
    %224 = vector.load %arg11[%c4_131, %c0_132, %c0_133] : memref<25x1x128xf32, #tpu.memory_space<vmem>>, vector<1x1x128xf32>
    %225 = vector.shape_cast %224 : vector<1x1x128xf32> to vector<1x128xf32>
    %226 = vector.broadcast %225 : vector<1x128xf32> to vector<16x128xf32>
    %227 = arith.mulf %223, %226 : vector<16x128xf32>
    %c64 = arith.constant 64 : index
    %c0_134 = arith.constant 0 : index
    %228 = vector.load %arg13[%c64, %c0_134] : memref<1024x128xf32, #tpu.memory_space<vmem>>, vector<16x128xf32>
    tpu.vector_store %arg13[%c64, %c0_134], %227 {strides = array<i32>} : memref<1024x128xf32, #tpu.memory_space<vmem>>, vector<16x128xf32>,
    %c10_i32_135 = arith.constant 10 : i32
    %229 = tpu.dynamic_rotate %196 by %c10_i32_135 dim 1 : vector<16x128xf32>, i32 -> vector<16x128xf32>
    %c5_136 = arith.constant 5 : index
    %c0_137 = arith.constant 0 : index
    %c0_138 = arith.constant 0 : index
    %230 = vector.load %arg11[%c5_136, %c0_137, %c0_138] : memref<25x1x128xf32, #tpu.memory_space<vmem>>, vector<1x1x128xf32>
    %231 = vector.shape_cast %230 : vector<1x1x128xf32> to vector<1x128xf32>
    %232 = vector.broadcast %231 : vector<1x128xf32> to vector<16x128xf32>
    %233 = arith.mulf %229, %232 : vector<16x128xf32>
    %c80_139 = arith.constant 80 : index
    %c0_140 = arith.constant 0 : index
    %234 = vector.load %arg13[%c80_139, %c0_140] : memref<1024x128xf32, #tpu.memory_space<vmem>>, vector<16x128xf32>
    tpu.vector_store %arg13[%c80_139, %c0_140], %233 {strides = array<i32>} : memref<1024x128xf32, #tpu.memory_space<vmem>>, vector<16x128xf32>,
    %c9_i32_141 = arith.constant 9 : i32
    %235 = tpu.dynamic_rotate %196 by %c9_i32_141 dim 1 : vector<16x128xf32>, i32 -> vector<16x128xf32>
    %c6_142 = arith.constant 6 : index
    %c0_143 = arith.constant 0 : index
    %c0_144 = arith.constant 0 : index
    %236 = vector.load %arg11[%c6_142, %c0_143, %c0_144] : memref<25x1x128xf32, #tpu.memory_space<vmem>>, vector<1x1x128xf32>
    %237 = vector.shape_cast %236 : vector<1x1x128xf32> to vector<1x128xf32>
    %238 = vector.broadcast %237 : vector<1x128xf32> to vector<16x128xf32>
    %239 = arith.mulf %235, %238 : vector<16x128xf32>
    %c96 = arith.constant 96 : index
    %c0_145 = arith.constant 0 : index
    %240 = vector.load %arg13[%c96, %c0_145] : memref<1024x128xf32, #tpu.memory_space<vmem>>, vector<16x128xf32>
    tpu.vector_store %arg13[%c96, %c0_145], %239 {strides = array<i32>} : memref<1024x128xf32, #tpu.memory_space<vmem>>, vector<16x128xf32>,
    %c8_i32_146 = arith.constant 8 : i32
    %241 = tpu.dynamic_rotate %196 by %c8_i32_146 dim 1 : vector<16x128xf32>, i32 -> vector<16x128xf32>
    %c7_147 = arith.constant 7 : index
    %c0_148 = arith.constant 0 : index
    %c0_149 = arith.constant 0 : index
    %242 = vector.load %arg11[%c7_147, %c0_148, %c0_149] : memref<25x1x128xf32, #tpu.memory_space<vmem>>, vector<1x1x128xf32>
    %243 = vector.shape_cast %242 : vector<1x1x128xf32> to vector<1x128xf32>
    %244 = vector.broadcast %243 : vector<1x128xf32> to vector<16x128xf32>
    %245 = arith.mulf %241, %244 : vector<16x128xf32>
    %c112 = arith.constant 112 : index
    %c0_150 = arith.constant 0 : index
    %246 = vector.load %arg13[%c112, %c0_150] : memref<1024x128xf32, #tpu.memory_space<vmem>>, vector<16x128xf32>
    tpu.vector_store %arg13[%c112, %c0_150], %245 {strides = array<i32>} : memref<1024x128xf32, #tpu.memory_space<vmem>>, vector<16x128xf32>,
    %c7_i32_151 = arith.constant 7 : i32
    %247 = tpu.dynamic_rotate %196 by %c7_i32_151 dim 1 : vector<16x128xf32>, i32 -> vector<16x128xf32>
    %c8_152 = arith.constant 8 : index
    %c0_153 = arith.constant 0 : index
    %c0_154 = arith.constant 0 : index
    %248 = vector.load %arg11[%c8_152, %c0_153, %c0_154] : memref<25x1x128xf32, #tpu.memory_space<vmem>>, vector<1x1x128xf32>
    %249 = vector.shape_cast %248 : vector<1x1x128xf32> to vector<1x128xf32>
    %250 = vector.broadcast %249 : vector<1x128xf32> to vector<16x128xf32>
    %251 = arith.mulf %247, %250 : vector<16x128xf32>
    %c128 = arith.constant 128 : index
    %c0_155 = arith.constant 0 : index
    %252 = vector.load %arg13[%c128, %c0_155] : memref<1024x128xf32, #tpu.memory_space<vmem>>, vector<16x128xf32>
    tpu.vector_store %arg13[%c128, %c0_155], %251 {strides = array<i32>} : memref<1024x128xf32, #tpu.memory_space<vmem>>, vector<16x128xf32>,
    %c6_i32_156 = arith.constant 6 : i32
    %253 = tpu.dynamic_rotate %196 by %c6_i32_156 dim 1 : vector<16x128xf32>, i32 -> vector<16x128xf32>
    %c9_157 = arith.constant 9 : index
    %c0_158 = arith.constant 0 : index
    %c0_159 = arith.constant 0 : index
    %254 = vector.load %arg11[%c9_157, %c0_158, %c0_159] : memref<25x1x128xf32, #tpu.memory_space<vmem>>, vector<1x1x128xf32>
    %255 = vector.shape_cast %254 : vector<1x1x128xf32> to vector<1x128xf32>
    %256 = vector.broadcast %255 : vector<1x128xf32> to vector<16x128xf32>
    %257 = arith.mulf %253, %256 : vector<16x128xf32>
    %c144 = arith.constant 144 : index
    %c0_160 = arith.constant 0 : index
    %258 = vector.load %arg13[%c144, %c0_160] : memref<1024x128xf32, #tpu.memory_space<vmem>>, vector<16x128xf32>
    tpu.vector_store %arg13[%c144, %c0_160], %257 {strides = array<i32>} : memref<1024x128xf32, #tpu.memory_space<vmem>>, vector<16x128xf32>,
    %c2_i32_161 = arith.constant 2 : i32
    %259 = tpu.dynamic_rotate %196 by %c2_i32_161 dim 1 : vector<16x128xf32>, i32 -> vector<16x128xf32>
    %c10_162 = arith.constant 10 : index
    %c0_163 = arith.constant 0 : index
    %c0_164 = arith.constant 0 : index
    %260 = vector.load %arg11[%c10_162, %c0_163, %c0_164] : memref<25x1x128xf32, #tpu.memory_space<vmem>>, vector<1x1x128xf32>
    %261 = vector.shape_cast %260 : vector<1x1x128xf32> to vector<1x128xf32>
    %262 = vector.broadcast %261 : vector<1x128xf32> to vector<16x128xf32>
    %263 = arith.mulf %259, %262 : vector<16x128xf32>
    %c160_165 = arith.constant 160 : index
    %c0_166 = arith.constant 0 : index
    %264 = vector.load %arg13[%c160_165, %c0_166] : memref<1024x128xf32, #tpu.memory_space<vmem>>, vector<16x128xf32>
    tpu.vector_store %arg13[%c160_165, %c0_166], %263 {strides = array<i32>} : memref<1024x128xf32, #tpu.memory_space<vmem>>, vector<16x128xf32>,
    %c1_i32_167 = arith.constant 1 : i32
    %265 = tpu.dynamic_rotate %196 by %c1_i32_167 dim 1 : vector<16x128xf32>, i32 -> vector<16x128xf32>
    %c11_168 = arith.constant 11 : index
    %c0_169 = arith.constant 0 : index
    %c0_170 = arith.constant 0 : index
    %266 = vector.load %arg11[%c11_168, %c0_169, %c0_170] : memref<25x1x128xf32, #tpu.memory_space<vmem>>, vector<1x1x128xf32>
    %267 = vector.shape_cast %266 : vector<1x1x128xf32> to vector<1x128xf32>
    %268 = vector.broadcast %267 : vector<1x128xf32> to vector<16x128xf32>
    %269 = arith.mulf %265, %268 : vector<16x128xf32>
    %c176 = arith.constant 176 : index
    %c0_171 = arith.constant 0 : index
    %270 = vector.load %arg13[%c176, %c0_171] : memref<1024x128xf32, #tpu.memory_space<vmem>>, vector<16x128xf32>
    tpu.vector_store %arg13[%c176, %c0_171], %269 {strides = array<i32>} : memref<1024x128xf32, #tpu.memory_space<vmem>>, vector<16x128xf32>,
    %c192 = arith.constant 192 : index
    %c0_172 = arith.constant 0 : index
    %271 = vector.load %arg13[%c192, %c0_172] : memref<1024x128xf32, #tpu.memory_space<vmem>>, vector<16x128xf32>
    tpu.vector_store %arg13[%c192, %c0_172], %196 {strides = array<i32>} : memref<1024x128xf32, #tpu.memory_space<vmem>>, vector<16x128xf32>,
    %c127_i32_173 = arith.constant 127 : i32
    %272 = tpu.dynamic_rotate %196 by %c127_i32_173 dim 1 : vector<16x128xf32>, i32 -> vector<16x128xf32>
    %c13_174 = arith.constant 13 : index
    %c0_175 = arith.constant 0 : index
    %c0_176 = arith.constant 0 : index
    %273 = vector.load %arg11[%c13_174, %c0_175, %c0_176] : memref<25x1x128xf32, #tpu.memory_space<vmem>>, vector<1x1x128xf32>
    %274 = vector.shape_cast %273 : vector<1x1x128xf32> to vector<1x128xf32>
    %275 = vector.broadcast %274 : vector<1x128xf32> to vector<16x128xf32>
    %276 = arith.mulf %272, %275 : vector<16x128xf32>
    %c208 = arith.constant 208 : index
    %c0_177 = arith.constant 0 : index
    %277 = vector.load %arg13[%c208, %c0_177] : memref<1024x128xf32, #tpu.memory_space<vmem>>, vector<16x128xf32>
    tpu.vector_store %arg13[%c208, %c0_177], %276 {strides = array<i32>} : memref<1024x128xf32, #tpu.memory_space<vmem>>, vector<16x128xf32>,
    %c126_i32_178 = arith.constant 126 : i32
    %278 = tpu.dynamic_rotate %196 by %c126_i32_178 dim 1 : vector<16x128xf32>, i32 -> vector<16x128xf32>
    %c14_179 = arith.constant 14 : index
    %c0_180 = arith.constant 0 : index
    %c0_181 = arith.constant 0 : index
    %279 = vector.load %arg11[%c14_179, %c0_180, %c0_181] : memref<25x1x128xf32, #tpu.memory_space<vmem>>, vector<1x1x128xf32>
    %280 = vector.shape_cast %279 : vector<1x1x128xf32> to vector<1x128xf32>
    %281 = vector.broadcast %280 : vector<1x128xf32> to vector<16x128xf32>
    %282 = arith.mulf %278, %281 : vector<16x128xf32>
    %c224 = arith.constant 224 : index
    %c0_182 = arith.constant 0 : index
    %283 = vector.load %arg13[%c224, %c0_182] : memref<1024x128xf32, #tpu.memory_space<vmem>>, vector<16x128xf32>
    tpu.vector_store %arg13[%c224, %c0_182], %282 {strides = array<i32>} : memref<1024x128xf32, #tpu.memory_space<vmem>>, vector<16x128xf32>,
    %c122_i32_183 = arith.constant 122 : i32
    %284 = tpu.dynamic_rotate %196 by %c122_i32_183 dim 1 : vector<16x128xf32>, i32 -> vector<16x128xf32>
    %c15_184 = arith.constant 15 : index
    %c0_185 = arith.constant 0 : index
    %c0_186 = arith.constant 0 : index
    %285 = vector.load %arg11[%c15_184, %c0_185, %c0_186] : memref<25x1x128xf32, #tpu.memory_space<vmem>>, vector<1x1x128xf32>
    %286 = vector.shape_cast %285 : vector<1x1x128xf32> to vector<1x128xf32>
    %287 = vector.broadcast %286 : vector<1x128xf32> to vector<16x128xf32>
    %288 = arith.mulf %284, %287 : vector<16x128xf32>
    %c240_187 = arith.constant 240 : index
    %c0_188 = arith.constant 0 : index
    %289 = vector.load %arg13[%c240_187, %c0_188] : memref<1024x128xf32, #tpu.memory_space<vmem>>, vector<16x128xf32>
    tpu.vector_store %arg13[%c240_187, %c0_188], %288 {strides = array<i32>} : memref<1024x128xf32, #tpu.memory_space<vmem>>, vector<16x128xf32>,
    %c121_i32_189 = arith.constant 121 : i32
    %290 = tpu.dynamic_rotate %196 by %c121_i32_189 dim 1 : vector<16x128xf32>, i32 -> vector<16x128xf32>
    %c16_190 = arith.constant 16 : index
    %c0_191 = arith.constant 0 : index
    %c0_192 = arith.constant 0 : index
    %291 = vector.load %arg11[%c16_190, %c0_191, %c0_192] : memref<25x1x128xf32, #tpu.memory_space<vmem>>, vector<1x1x128xf32>
    %292 = vector.shape_cast %291 : vector<1x1x128xf32> to vector<1x128xf32>
    %293 = vector.broadcast %292 : vector<1x128xf32> to vector<16x128xf32>
    %294 = arith.mulf %290, %293 : vector<16x128xf32>
    %c256 = arith.constant 256 : index
    %c0_193 = arith.constant 0 : index
    %295 = vector.load %arg13[%c256, %c0_193] : memref<1024x128xf32, #tpu.memory_space<vmem>>, vector<16x128xf32>
    tpu.vector_store %arg13[%c256, %c0_193], %294 {strides = array<i32>} : memref<1024x128xf32, #tpu.memory_space<vmem>>, vector<16x128xf32>,
    %c120_i32_194 = arith.constant 120 : i32
    %296 = tpu.dynamic_rotate %196 by %c120_i32_194 dim 1 : vector<16x128xf32>, i32 -> vector<16x128xf32>
    %c17_195 = arith.constant 17 : index
    %c0_196 = arith.constant 0 : index
    %c0_197 = arith.constant 0 : index
    %297 = vector.load %arg11[%c17_195, %c0_196, %c0_197] : memref<25x1x128xf32, #tpu.memory_space<vmem>>, vector<1x1x128xf32>
    %298 = vector.shape_cast %297 : vector<1x1x128xf32> to vector<1x128xf32>
    %299 = vector.broadcast %298 : vector<1x128xf32> to vector<16x128xf32>
    %300 = arith.mulf %296, %299 : vector<16x128xf32>
    %c272 = arith.constant 272 : index
    %c0_198 = arith.constant 0 : index
    %301 = vector.load %arg13[%c272, %c0_198] : memref<1024x128xf32, #tpu.memory_space<vmem>>, vector<16x128xf32>
    tpu.vector_store %arg13[%c272, %c0_198], %300 {strides = array<i32>} : memref<1024x128xf32, #tpu.memory_space<vmem>>, vector<16x128xf32>,
    %c119_i32_199 = arith.constant 119 : i32
    %302 = tpu.dynamic_rotate %196 by %c119_i32_199 dim 1 : vector<16x128xf32>, i32 -> vector<16x128xf32>
    %c18_200 = arith.constant 18 : index
    %c0_201 = arith.constant 0 : index
    %c0_202 = arith.constant 0 : index
    %303 = vector.load %arg11[%c18_200, %c0_201, %c0_202] : memref<25x1x128xf32, #tpu.memory_space<vmem>>, vector<1x1x128xf32>
    %304 = vector.shape_cast %303 : vector<1x1x128xf32> to vector<1x128xf32>
    %305 = vector.broadcast %304 : vector<1x128xf32> to vector<16x128xf32>
    %306 = arith.mulf %302, %305 : vector<16x128xf32>
    %c288 = arith.constant 288 : index
    %c0_203 = arith.constant 0 : index
    %307 = vector.load %arg13[%c288, %c0_203] : memref<1024x128xf32, #tpu.memory_space<vmem>>, vector<16x128xf32>
    tpu.vector_store %arg13[%c288, %c0_203], %306 {strides = array<i32>} : memref<1024x128xf32, #tpu.memory_space<vmem>>, vector<16x128xf32>,
    %c118_i32_204 = arith.constant 118 : i32
    %308 = tpu.dynamic_rotate %196 by %c118_i32_204 dim 1 : vector<16x128xf32>, i32 -> vector<16x128xf32>
    %c19_205 = arith.constant 19 : index
    %c0_206 = arith.constant 0 : index
    %c0_207 = arith.constant 0 : index
    %309 = vector.load %arg11[%c19_205, %c0_206, %c0_207] : memref<25x1x128xf32, #tpu.memory_space<vmem>>, vector<1x1x128xf32>
    %310 = vector.shape_cast %309 : vector<1x1x128xf32> to vector<1x128xf32>
    %311 = vector.broadcast %310 : vector<1x128xf32> to vector<16x128xf32>
    %312 = arith.mulf %308, %311 : vector<16x128xf32>
    %c304 = arith.constant 304 : index
    %c0_208 = arith.constant 0 : index
    %313 = vector.load %arg13[%c304, %c0_208] : memref<1024x128xf32, #tpu.memory_space<vmem>>, vector<16x128xf32>
    tpu.vector_store %arg13[%c304, %c0_208], %312 {strides = array<i32>} : memref<1024x128xf32, #tpu.memory_space<vmem>>, vector<16x128xf32>,
    %c114_i32_209 = arith.constant 114 : i32
    %314 = tpu.dynamic_rotate %196 by %c114_i32_209 dim 1 : vector<16x128xf32>, i32 -> vector<16x128xf32>
    %c20_210 = arith.constant 20 : index
    %c0_211 = arith.constant 0 : index
    %c0_212 = arith.constant 0 : index
    %315 = vector.load %arg11[%c20_210, %c0_211, %c0_212] : memref<25x1x128xf32, #tpu.memory_space<vmem>>, vector<1x1x128xf32>
    %316 = vector.shape_cast %315 : vector<1x1x128xf32> to vector<1x128xf32>
    %317 = vector.broadcast %316 : vector<1x128xf32> to vector<16x128xf32>
    %318 = arith.mulf %314, %317 : vector<16x128xf32>
    %c320_213 = arith.constant 320 : index
    %c0_214 = arith.constant 0 : index
    %319 = vector.load %arg13[%c320_213, %c0_214] : memref<1024x128xf32, #tpu.memory_space<vmem>>, vector<16x128xf32>
    tpu.vector_store %arg13[%c320_213, %c0_214], %318 {strides = array<i32>} : memref<1024x128xf32, #tpu.memory_space<vmem>>, vector<16x128xf32>,
    %c113_i32_215 = arith.constant 113 : i32
    %320 = tpu.dynamic_rotate %196 by %c113_i32_215 dim 1 : vector<16x128xf32>, i32 -> vector<16x128xf32>
    %c21_216 = arith.constant 21 : index
    %c0_217 = arith.constant 0 : index
    %c0_218 = arith.constant 0 : index
    %321 = vector.load %arg11[%c21_216, %c0_217, %c0_218] : memref<25x1x128xf32, #tpu.memory_space<vmem>>, vector<1x1x128xf32>
    %322 = vector.shape_cast %321 : vector<1x1x128xf32> to vector<1x128xf32>
    %323 = vector.broadcast %322 : vector<1x128xf32> to vector<16x128xf32>
    %324 = arith.mulf %320, %323 : vector<16x128xf32>
    %c336 = arith.constant 336 : index
    %c0_219 = arith.constant 0 : index
    %325 = vector.load %arg13[%c336, %c0_219] : memref<1024x128xf32, #tpu.memory_space<vmem>>, vector<16x128xf32>
    tpu.vector_store %arg13[%c336, %c0_219], %324 {strides = array<i32>} : memref<1024x128xf32, #tpu.memory_space<vmem>>, vector<16x128xf32>,
    %c112_i32_220 = arith.constant 112 : i32
    %326 = tpu.dynamic_rotate %196 by %c112_i32_220 dim 1 : vector<16x128xf32>, i32 -> vector<16x128xf32>
    %c22_221 = arith.constant 22 : index
    %c0_222 = arith.constant 0 : index
    %c0_223 = arith.constant 0 : index
    %327 = vector.load %arg11[%c22_221, %c0_222, %c0_223] : memref<25x1x128xf32, #tpu.memory_space<vmem>>, vector<1x1x128xf32>
    %328 = vector.shape_cast %327 : vector<1x1x128xf32> to vector<1x128xf32>
    %329 = vector.broadcast %328 : vector<1x128xf32> to vector<16x128xf32>
    %330 = arith.mulf %326, %329 : vector<16x128xf32>
    %c352 = arith.constant 352 : index
    %c0_224 = arith.constant 0 : index
    %331 = vector.load %arg13[%c352, %c0_224] : memref<1024x128xf32, #tpu.memory_space<vmem>>, vector<16x128xf32>
    tpu.vector_store %arg13[%c352, %c0_224], %330 {strides = array<i32>} : memref<1024x128xf32, #tpu.memory_space<vmem>>, vector<16x128xf32>,
    %c111_i32_225 = arith.constant 111 : i32
    %332 = tpu.dynamic_rotate %196 by %c111_i32_225 dim 1 : vector<16x128xf32>, i32 -> vector<16x128xf32>
    %c23_226 = arith.constant 23 : index
    %c0_227 = arith.constant 0 : index
    %c0_228 = arith.constant 0 : index
    %333 = vector.load %arg11[%c23_226, %c0_227, %c0_228] : memref<25x1x128xf32, #tpu.memory_space<vmem>>, vector<1x1x128xf32>
    %334 = vector.shape_cast %333 : vector<1x1x128xf32> to vector<1x128xf32>
    %335 = vector.broadcast %334 : vector<1x128xf32> to vector<16x128xf32>
    %336 = arith.mulf %332, %335 : vector<16x128xf32>
    %c368 = arith.constant 368 : index
    %c0_229 = arith.constant 0 : index
    %337 = vector.load %arg13[%c368, %c0_229] : memref<1024x128xf32, #tpu.memory_space<vmem>>, vector<16x128xf32>
    tpu.vector_store %arg13[%c368, %c0_229], %336 {strides = array<i32>} : memref<1024x128xf32, #tpu.memory_space<vmem>>, vector<16x128xf32>,
    %c110_i32_230 = arith.constant 110 : i32
    %338 = tpu.dynamic_rotate %196 by %c110_i32_230 dim 1 : vector<16x128xf32>, i32 -> vector<16x128xf32>
    %c24_231 = arith.constant 24 : index
    %c0_232 = arith.constant 0 : index
    %c0_233 = arith.constant 0 : index
    %339 = vector.load %arg11[%c24_231, %c0_232, %c0_233] : memref<25x1x128xf32, #tpu.memory_space<vmem>>, vector<1x1x128xf32>
    %340 = vector.shape_cast %339 : vector<1x1x128xf32> to vector<1x128xf32>
    %341 = vector.broadcast %340 : vector<1x128xf32> to vector<16x128xf32>
    %342 = arith.mulf %338, %341 : vector<16x128xf32>
    %c384 = arith.constant 384 : index
    %c0_234 = arith.constant 0 : index
    %343 = vector.load %arg13[%c384, %c0_234] : memref<1024x128xf32, #tpu.memory_space<vmem>>, vector<16x128xf32>
    tpu.vector_store %arg13[%c384, %c0_234], %342 {strides = array<i32>} : memref<1024x128xf32, #tpu.memory_space<vmem>>, vector<16x128xf32>,
    %c0_235 = arith.constant 0 : index
    %c0_236 = arith.constant 0 : index
    %344 = vector.load %arg9[%c0_235, %c0_236] : memref<16x400xbf16, #tpu.memory_space<vmem>>, vector<16x400xbf16>
    %c0_237 = arith.constant 0 : index
    %c0_238 = arith.constant 0 : index
    %345 = vector.load %arg13[%c0_237, %c0_238] : memref<1024x128xf32, #tpu.memory_space<vmem>>, vector<400x128xf32>
    %346 = arith.truncf %345 : vector<400x128xf32> to vector<400x128xbf16>
    %cst_239 = arith.constant dense<0.000000e+00> : vector<16x128xf32>
    %347 = tpu.matmul %344, %346, %cst_239 {dimension_numbers = #tpu.dot_dimension_numbers<[1], [0], [0], [1], [0, 0, 1, 1], [], []>} : vector<16x400xbf16>, vector<400x128xbf16>, vector<16x128xf32> -> vector<16x128xf32>
    %c0_240 = arith.constant 0 : index
    %c0_241 = arith.constant 0 : index
    %348 = vector.load %arg10[%c0_240, %c0_241] : memref<16x1xf32, #tpu.memory_space<vmem>>, vector<16x1xf32>
    %349 = vector.broadcast %348 : vector<16x1xf32> to vector<16x128xf32>
    %350 = arith.addf %347, %349 : vector<16x128xf32>
    %c0_242 = arith.constant 0 : index
    %c0_243 = arith.constant 0 : index
    %c0_244 = arith.constant 0 : index
    %351 = vector.load %arg12[%c0_242, %c0_243, %c0_244] : memref<1x48x128xf32, #tpu.memory_space<vmem>>, vector<1x16x128xf32>
    %352 = vector.shape_cast %351 : vector<1x16x128xf32> to vector<16x128xf32>
    %353 = vector.shape_cast %350 : vector<16x128xf32> to vector<1x16x128xf32>
    tpu.vector_store %arg12[%c0_242, %c0_243, %c0_244], %353 {strides = array<i32>} : memref<1x48x128xf32, #tpu.memory_space<vmem>>, vector<1x16x128xf32>,
    %c0_245 = arith.constant 0 : index
    %c16_246 = arith.constant 16 : index
    %c0_247 = arith.constant 0 : index
    %354 = vector.load %arg12[%c0_245, %c16_246, %c0_247] : memref<1x48x128xf32, #tpu.memory_space<vmem>>, vector<1x16x128xf32>
    %355 = vector.shape_cast %354 : vector<1x16x128xf32> to vector<16x128xf32>
    %356 = vector.shape_cast %196 : vector<16x128xf32> to vector<1x16x128xf32>
    tpu.vector_store %arg12[%c0_245, %c16_246, %c0_247], %356 {strides = array<i32>} : memref<1x48x128xf32, #tpu.memory_space<vmem>>, vector<1x16x128xf32>,
    %c0_248 = arith.constant 0 : index
    %c32_249 = arith.constant 32 : index
    %c0_250 = arith.constant 0 : index
    %357 = vector.load %arg12[%c0_248, %c32_249, %c0_250] : memref<1x48x128xf32, #tpu.memory_space<vmem>>, vector<1x16x128xf32>
    %358 = vector.shape_cast %357 : vector<1x16x128xf32> to vector<16x128xf32>
    %359 = vector.shape_cast %194 : vector<16x128xf32> to vector<1x16x128xf32>
    tpu.vector_store %arg12[%c0_248, %c32_249, %c0_250], %359 {strides = array<i32>} : memref<1x48x128xf32, #tpu.memory_space<vmem>>, vector<1x16x128xf32>,
    return
  }
  func.func @transform_0(%arg0: i32) -> (i32, i32) {
    %c0_i32 = arith.constant 0 : i32
    %c0_i32_0 = arith.constant 0 : i32
    %c0_i32_1 = arith.constant 0 : i32
    return %c0_i32, %c0_i32_0 : i32, i32
  }
  func.func @transform_1(%arg0: i32) -> (i32, i32, i32) {
    %c0_i32 = arith.constant 0 : i32
    %c0_i32_0 = arith.constant 0 : i32
    %c0_i32_1 = arith.constant 0 : i32
    return %arg0, %c0_i32, %c0_i32_0 : i32, i32, i32
  }
  func.func @transform_2(%arg0: i32) -> (i32, i32) {
    %c0_i32 = arith.constant 0 : i32
    %c0_i32_0 = arith.constant 0 : i32
    %c0_i32_1 = arith.constant 0 : i32
    return %c0_i32, %c0_i32_0 : i32, i32
  }
  func.func @transform_3(%arg0: i32) -> (i32, i32) {
    %c0_i32 = arith.constant 0 : i32
    %c0_i32_0 = arith.constant 0 : i32
    %c0_i32_1 = arith.constant 0 : i32
    return %c0_i32, %c0_i32_0 : i32, i32
  }
  func.func @transform_4(%arg0: i32) -> (i32, i32) {
    %c0_i32 = arith.constant 0 : i32
    %c0_i32_0 = arith.constant 0 : i32
    %c0_i32_1 = arith.constant 0 : i32
    return %c0_i32, %c0_i32_0 : i32, i32
  }
  func.func @transform_5(%arg0: i32) -> (i32, i32) {
    %c0_i32 = arith.constant 0 : i32
    %c0_i32_0 = arith.constant 0 : i32
    %c0_i32_1 = arith.constant 0 : i32
    return %c0_i32, %c0_i32_0 : i32, i32
  }
  func.func @transform_6(%arg0: i32) -> (i32, i32) {
    %c0_i32 = arith.constant 0 : i32
    %c0_i32_0 = arith.constant 0 : i32
    %c0_i32_1 = arith.constant 0 : i32
    return %c0_i32, %c0_i32_0 : i32, i32
  }
  func.func @transform_7(%arg0: i32) -> (i32, i32) {
    %c0_i32 = arith.constant 0 : i32
    %c0_i32_0 = arith.constant 0 : i32
    %c0_i32_1 = arith.constant 0 : i32
    return %c0_i32, %c0_i32_0 : i32, i32
  }
  func.func @transform_8(%arg0: i32) -> (i32, i32) {
    %c0_i32 = arith.constant 0 : i32
    %c0_i32_0 = arith.constant 0 : i32
    %c0_i32_1 = arith.constant 0 : i32
    return %c0_i32, %c0_i32_0 : i32, i32
  }
  func.func @transform_9(%arg0: i32) -> (i32, i32) {
    %c0_i32 = arith.constant 0 : i32
    %c0_i32_0 = arith.constant 0 : i32
    %c0_i32_1 = arith.constant 0 : i32
    return %c0_i32, %c0_i32_0 : i32, i32
  }
  func.func @transform_10(%arg0: i32) -> (i32, i32, i32) {
    %c0_i32 = arith.constant 0 : i32
    %c0_i32_0 = arith.constant 0 : i32
    %c0_i32_1 = arith.constant 0 : i32
    %c0_i32_2 = arith.constant 0 : i32
    return %c0_i32, %c0_i32_0, %c0_i32_1 : i32, i32, i32
  }
  func.func @transform_11(%arg0: i32) -> (i32, i32, i32) {
    %c0_i32 = arith.constant 0 : i32
    %c0_i32_0 = arith.constant 0 : i32
    %c0_i32_1 = arith.constant 0 : i32
    return %arg0, %c0_i32, %c0_i32_0 : i32, i32, i32
  }
}

</mosaic_0001>

<bundles_post_ra>
// kernel: latent_distribution_forward.1
= control target key start
LH: loop header
LB: loop body
LE: loop exit
PB: predicated region body
PF: predicated region fallthrough
CT: control target
= control target key end

     0   :  { %v2231_v1 = vmov 0   ;;  %vm89_vm0 = vcmask 261120   ;;  %s3457_s27 = smov 7   ;;  %s3461_s28 = smov 6   ;;  %vm1820_vm1 = vcmask 130048   ;;  %s3441_s0 = inlined_call_operand.vmem [shape: bf16[32,128], index: 0, kind: input, shape index: {}]   ;;  %s3442_s5 = inlined_call_operand.vmem [shape: f32[16,1], index: 5, kind: input, shape index: {}]   ;;  %s3443_s2 = inlined_call_operand.vmem [shape: f32[16,128], index: 2, kind: input, shape index: {}]   ;;  %s3444_s1 = inlined_call_operand.vmem [shape: f32[1,8,128], index: 1, kind: input, shape index: {}]   ;;  %s3445_s4 = inlined_call_operand.vmem [shape: bf16[16,32], index: 4, kind: input, shape index: {}]   ;;  %s3446_s10 = inlined_call_operand.vmem [shape: f32[25,1,128], index: 10, kind: input, shape index: {}]   ;;  %s3447_s6 = inlined_call_operand.vmem [shape: bf16[64,1024], index: 6, kind: input, shape index: {}]   ;;  %s3448_s7 = inlined_call_operand.vmem [shape: f32[64,1], index: 7, kind: input, shape index: {}]   ;;  %s3449_s3 = inlined_call_operand.vmem [shape: f32[16,128], index: 3, kind: input, shape index: {}]   ;;  %s3450_s11 = inlined_call_operand.vmem [shape: f32[1,48,128], index: 11, kind: output, shape index: {}]   ;;  %s3451_s9 = inlined_call_operand.vmem [shape: f32[16,1], index: 9, kind: input, shape index: {}]   ;;  %s3452_s8 = inlined_call_operand.vmem [shape: bf16[16,400], index: 8, kind: input, shape index: {}]  }
   0x1   :  { %v2096_v0 = vld [vmem:[%s3441_s0 + $0x8] sm:$0xff]  ;;  %2158 = vset.pattern.permute.xlu0 %v2231_v1  ;;  %2160 = vset.pattern.permute.xlu1 %v2231_v1  ;;  %v60_v2 = vld [vmem:[%s3442_s5] sm:$0xff]  ;;  %s3459_s15 = smov 16   ;;  %s2235_s16 = smov 10  }
   0x2   :  { %v2325_v3 = vld [vmem:[%s3443_s2 + $0x8] sm:$0xff]  ;;  %2159 = vset.pattern.permute.xlu2 %v2231_v1  ;;  %99 = vmatpush.bf16.msra.mxu0 %v2096_v0  ;;  %v2095_v4 = vld [vmem:[%s3441_s0] sm:$0xff]  ;;  %s2238_s17 = smov 8   ;;  %s3475_s18 = smov 1  }
   0x3   :  { %64 = vperm.xlu0 %2158, %v60_v2   ;;  %v2333_v5 = vld [vmem:[%s3444_s1] sm:$0xff]  ;;  %317 = vrot.lane.b32.xlu1 %v2325_v3, %s3457_s27  ;;  %v61_v7 = vld [vmem:[%s3442_s5 + $0x8] sm:$0xff]  ;;  %s3471_s5 = smov 14   ;;  %s2240_s19 = smov 9  }
   0x4   :  { %338 = vrot.lane.b32.xlu2 %v2333_v5, %s3461_s28  ;;  %v2094_v6 = vld [vmem:[%s3445_s4] sm:$0xff]  ;;  %s3455_s4 = smov 17   ;;  %s3453_s20 = smov 18   ;;  %v2483_v32 = vld [vmem:[%s3446_s10 + $0xb] ss:$0 sm:$0xff] }
   0x5   :  { %v2348_v8 = vld [vmem:[%s3443_s2] sm:$0xff]  ;;  %s3467_s21 = smov 15   ;;  %s3469_s22 = smov 2   ;;  %v2594_v61 = vld [vmem:[%s3446_s10 + $0x9] ss:$0 sm:$0xff] }
   0x6   :  { %100 = vmatpush.bf16.msra.mxu0 %v2095_v4  ;;  %v905_v9 = vpack.c.bf16 %v2348_v8, %v2333_v5  ;;  %s2244_s25 = smov 118   ;;  %s2245_s26 = smov 122   ;;  %v2605_v62 = vld [vmem:[%s3446_s10 + $0x2] ss:$0 sm:$0xff]  ;;  %v2610_v63 = vld [vmem:[%s3446_s10 + $0x3] ss:$0 sm:$0xff] }
   0x7   :  { %s3465_s29 = smov 119   ;;  %s2247_s30 = smov 112   ;;  %v2161_v2 = vld [vmem:[%s3446_s10 + $0x8] ss:$0 sm:$0xff] }
   0x8   :  { %s2248_s0 = smov 113   ;;  %s2249_s12 = smov 126  }
   0x9   :  { %1902 = vmatmul.msk.bf16.vlgmr.msra.gmra.mxu0 %vm89_vm0, %v2094_v6  ;;  %s3463_s13 = smov 120   ;;  %s3473_s14 = smov 110  }
   0xa   :  { %1233 = vmatpush.bf16.msrb.mxu0 %v905_v9  ;;  %s2252_s23 = smov 114   ;;  %s3477_s24 = smov 1  }
   0xb   :  { %69 = vperm.xlu0 %2158, %v61_v7   ;;  %165 = vrot.lane.b32.xlu1 %v2348_v8, %s3459_s15 }
   0xc   :  { %240 = vrot.lane.b32.xlu2 %v2348_v8, %s2235_s16 }
  0x13   :  { %167 = vrot.lane.b32.xlu0 %v2325_v3, %s3459_s15  ;;  %313 = vrot.lane.b32.xlu1 %v2333_v5, %s3457_s27 }
  0x14   :  { %315 = vrot.lane.b32.xlu2 %v2348_v8, %s3457_s27 }
  0x1b   :  { %242 = vrot.lane.b32.xlu0 %v2325_v3, %s2235_s16  ;;  %142 = vrot.lane.b32.xlu1 %v2325_v3, %s3455_s4 }
  0x1c   :  { %217 = vrot.lane.b32.xlu2 %v2325_v3, %s3471_s5 }
  0x23   :  { %163 = vrot.lane.b32.xlu0 %v2333_v5, %s3459_s15  ;;  %290 = vrot.lane.b32.xlu1 %v2348_v8, %s2238_s17 }
  0x24   :  { %213 = vrot.lane.b32.xlu2 %v2333_v5, %s3471_s5 }
  0x2b   :  { %238 = vrot.lane.b32.xlu0 %v2333_v5, %s2235_s16  ;;  %392 = vrot.lane.b32.xlu1 %v2325_v3, %s3475_s18 }
  0x2c   :  { %292 = vrot.lane.b32.xlu2 %v2325_v3, %s2238_s17 }
  0x33   :  { %140 = vrot.lane.b32.xlu0 %v2348_v8, %s3455_s4  ;;  %288 = vrot.lane.b32.xlu1 %v2333_v5, %s2238_s17 }
  0x34   :  { %267 = vrot.lane.b32.xlu2 %v2325_v3, %s2240_s19 }
  0x3b   :  { %215 = vrot.lane.b32.xlu0 %v2348_v8, %s3471_s5  ;;  %118 = vrot.lane.b32.xlu1 %v2325_v3, %s3453_s20 }
  0x3c   :  { %265 = vrot.lane.b32.xlu2 %v2348_v8, %s2240_s19 }
  0x43   :  { %390 = vrot.lane.b32.xlu0 %v2348_v8, %s3475_s18  ;;  %192 = vrot.lane.b32.xlu1 %v2325_v3, %s3467_s21 }
  0x4b   :  { %138 = vrot.lane.b32.xlu0 %v2333_v5, %s3455_s4  ;;  %367 = vrot.lane.b32.xlu1 %v2325_v3, %s3469_s22 }
  0x53   :  { %388 = vrot.lane.b32.xlu0 %v2333_v5, %s3475_s18  ;;  %116 = vrot.lane.b32.xlu1 %v2348_v8, %s3453_s20 }
  0x5b   :  { %190 = vrot.lane.b32.xlu0 %v2348_v8, %s3467_s21  ;;  %263 = vrot.lane.b32.xlu1 %v2333_v5, %s2240_s19 }
  0x5e   :  { %v2446_v23 = vpop.permute.xlu2 %338 }
  0x5f   :  { %v351_v4 = vmul.f32 %v2594_v61, %v2446_v23 }
  0x63   :  { %114 = vrot.lane.b32.xlu0 %v2333_v5, %s3453_s20  ;;  %365 = vrot.lane.b32.xlu1 %v2348_v8, %s3469_s22 }
  0x66   :  { %v2458_v26 = vpop.permute.xlu2 %240 }
  0x6b   :  { %188 = vrot.lane.b32.xlu0 %v2333_v5, %s3467_s21 }
  0x6e   :  { %v2470_v29 = vpop.permute.xlu2 %315 }
  0x73   :  { %363 = vrot.lane.b32.xlu0 %v2333_v5, %s3469_s22 }
  0x75   :  { %v65_v10 = vpop.permute.xlu0 %64  ;;  %v2416_v11 = vpop.permute.xlu1 %317 }
  0x76   :  { %v2492_v34 = vpop.permute.xlu2 %217  ;;  %v328_v23 = vmul.f32 %v2161_v2, %v2416_v11 }
  0x7d   :  { %v70_v12 = vpop.permute.xlu0 %69  ;;  %v2420_v15 = vpop.permute.xlu1 %165 }
  0x7e   :  { %v2503_v39 = vpop.permute.xlu2 %213 }
  0x85   :  { %v2418_v13 = vpop.permute.xlu0 %167  ;;  %v2434_v20 = vpop.permute.xlu1 %313 }
  0x86   :  { %v102_v14 = vpop.f32.mrf.mxu0  ;;  %v2515_v42 = vpop.permute.xlu2 %292  ;;  %v178_v9 = vmul.f32 %v2605_v62, %v2418_v13  ;;  %v326_v13 = vmul.f32 %v2161_v2, %v2434_v20  ;;  %v2166_v20 = vld [vmem:[%s3446_s10 + $0x7] ss:$0 sm:$0xff] }
  0x87   :  { %v2422_v16 = vadd.f32 %v102_v14, %v65_v10 }
  0x89   :  { %159 = vrot.lane.b32.xlu0 %v2422_v16, %s3459_s15  ;;  %334 = vrot.lane.b32.xlu2 %v2422_v16, %s3461_s28 }
  0x8a   :  { %259 = vrot.lane.b32.xlu1 %v2422_v16, %s2240_s19 }
  0x8d   :  { %v2430_v17 = vpop.permute.xlu0 %242  ;;  %v2454_v24 = vpop.permute.xlu1 %142 }
  0x8e   :  { %v104_v18 = vpop.f32.mrf.mxu0  ;;  %v2527_v45 = vpop.permute.xlu2 %267 }
  0x8f   :  { %v2432_v19 = vadd.f32 %v104_v18, %v70_v12  ;;  %v177_v18 = vmul.f32 %v2605_v62, %v2420_v15 }
  0x91   :  { %234 = vrot.lane.b32.xlu0 %v2422_v16, %s2235_s16  ;;  %134 = vrot.lane.b32.xlu2 %v2422_v16, %s3455_s4  ;;  %v904_v21 = vpack.c.bf16 %v2432_v19, %v2422_v16 }
  0x92   :  { %184 = vrot.lane.b32.xlu1 %v2422_v16, %s3467_s21 }
  0x93   :  { %1234 = vmatpush.bf16.msrb.mxu0 %v904_v21 }
  0x95   :  { %v2444_v22 = vpop.permute.xlu0 %163  ;;  %v2466_v27 = vpop.permute.xlu1 %290 }
  0x96   :  { %v2543_v48 = vpop.permute.xlu2 %265  ;;  %v176_v21 = vmul.f32 %v2605_v62, %v2444_v22 }
  0x99   :  { %284 = vrot.lane.b32.xlu0 %v2422_v16, %s2238_s17  ;;  %384 = vrot.lane.b32.xlu2 %v2422_v16, %s3475_s18 }
  0x9a   :  { %309 = vrot.lane.b32.xlu1 %v2422_v16, %s3457_s27 }
  0x9d   :  { %v2456_v25 = vpop.permute.xlu0 %238  ;;  %v393_v31 = vpop.permute.xlu1 %392 }
  0x9e   :  { %v403_v33 = vmul.f32 %v2483_v32, %v393_v31 }
  0xa1   :  { %286 = vrot.lane.b32.xlu0 %v2432_v19, %s2238_s17  ;;  %110 = vrot.lane.b32.xlu2 %v2422_v16, %s3453_s20 }
  0xa2   :  { %209 = vrot.lane.b32.xlu1 %v2422_v16, %s3471_s5 }
  0xa5   :  { %v2468_v28 = vpop.permute.xlu0 %140  ;;  %v2495_v38 = vpop.permute.xlu1 %288 }
  0xa9   :  { %112 = vrot.lane.b32.xlu0 %v2432_v19, %s3453_s20  ;;  %336 = vrot.lane.b32.xlu2 %v2432_v19, %s3461_s28 }
  0xaa   :  { %261 = vrot.lane.b32.xlu1 %v2432_v19, %s2240_s19 }
  0xad   :  { %v2478_v30 = vpop.permute.xlu0 %215  ;;  %v2511_v41 = vpop.permute.xlu1 %118 }
  0xb1   :  { %340 = vrot.lane.b32.xlu0 %v2348_v8, %s3461_s28  ;;  %236 = vrot.lane.b32.xlu2 %v2432_v19, %s2235_s16 }
  0xb2   :  { %161 = vrot.lane.b32.xlu1 %v2432_v19, %s3459_s15  ;;  %s2255_s15 = smov 121  }
  0xb5   :  { %v391_v35 = vpop.permute.xlu0 %390  ;;  %v2525_v44 = vpop.permute.xlu1 %192 }
  0xb6   :  { %v402_v36 = vmul.f32 %v2483_v32, %v391_v35 }
  0xb8   :  { %v903_v37 = vpack.c.bf16 %v403_v33, %v402_v36  ;;  %v327_v33 = vmul.f32 %v2161_v2, %v2470_v29  ;;  %v880_v36 = vpack.c.bf16 %v177_v18, %v176_v21  ;;  %v301_v21 = vmul.f32 %v2166_v20, %v2495_v38  ;;  %v2165_v38 = vld [vmem:[%s3446_s10 + $0x1] ss:$0 sm:$0xff] }
  0xb9   :  { %564 = vrot.lane.b32.xlu0 %v2422_v16, %s2244_s25  ;;  %311 = vrot.lane.b32.xlu2 %v2432_v19, %s3457_s27  ;;  %s2253_s27 = smov 127  }
  0xba   :  { %359 = vrot.lane.b32.xlu1 %v2422_v16, %s3469_s22  ;;  %1235 = vmatpush.bf16.msrb.mxu0 %v903_v37  ;;  %v895_v37 = vpack.c.bf16 %v327_v33, %v326_v13 }
  0xbd   :  { %v2505_v40 = vpop.permute.xlu0 %138  ;;  %v2537_v47 = vpop.permute.xlu1 %367 }
  0xc1   :  { %470 = vrot.lane.b32.xlu0 %v2348_v8, %s2245_s26  ;;  %136 = vrot.lane.b32.xlu2 %v2432_v19, %s3455_s4  ;;  %s3486_s4 = smov 120  }
  0xc2   :  { %342 = vrot.lane.b32.xlu1 %v2325_v3, %s3461_s28  ;;  %s2254_s28 = smov 111  }
  0xc5   :  { %v2521_v43 = vpop.permute.xlu0 %388  ;;  %v2549_v50 = vpop.permute.xlu1 %116 }
  0xc9   :  { %545 = vrot.lane.b32.xlu0 %v2348_v8, %s3465_s29  ;;  %211 = vrot.lane.b32.xlu2 %v2432_v19, %s3471_s5  ;;  %s3479_s5 = smov 2  }
  0xca   :  { %639 = vrot.lane.b32.xlu1 %v2422_v16, %s2247_s30 }
  0xcd   :  { %v2535_v46 = vpop.permute.xlu0 %190  ;;  %v2563_v53 = vpop.permute.xlu1 %263 }
  0xd1   :  { %466 = vrot.lane.b32.xlu0 %v2432_v19, %s2245_s26  ;;  %386 = vrot.lane.b32.xlu2 %v2432_v19, %s3475_s18 }
  0xd2   :  { %472 = vrot.lane.b32.xlu1 %v2325_v3, %s2245_s26 }
  0xd5   :  { %v2547_v49 = vpop.permute.xlu0 %114  ;;  %v2577_v56 = vpop.permute.xlu1 %365 }
  0xd9   :  { %541 = vrot.lane.b32.xlu0 %v2432_v19, %s3465_s29  ;;  %186 = vrot.lane.b32.xlu2 %v2432_v19, %s3467_s21  ;;  %s3482_s21 = smov 16  }
  0xda   :  { %620 = vrot.lane.b32.xlu1 %v2348_v8, %s2248_s0 }
  0xdd   :  { %v2557_v52 = vpop.permute.xlu0 %188 }
  0xe1   :  { %447 = vrot.lane.b32.xlu0 %v2325_v3, %s2249_s12  ;;  %361 = vrot.lane.b32.xlu2 %v2432_v19, %s3469_s22  ;;  %s3483_s22 = smov 119  }
  0xe2   :  { %468 = vrot.lane.b32.xlu1 %v2333_v5, %s2245_s26 }
  0xe3   :  { %v335_v51 = vpop.permute.xlu2 %334 }
  0xe4   :  { %v349_v12 = vmul.f32 %v2594_v61, %v335_v51 }
  0xe5   :  { %v2573_v55 = vpop.permute.xlu0 %363 }
  0xe6   :  { %v896_v15 = vpack.c.bf16 %v349_v12, %v328_v23 }
  0xe9   :  { %522 = vrot.lane.b32.xlu0 %v2325_v3, %s3463_s13  ;;  %547 = vrot.lane.b32.xlu2 %v2325_v3, %s3465_s29 }
  0xea   :  { %616 = vrot.lane.b32.xlu1 %v2432_v19, %s2248_s0 }
  0xeb   :  { %v2567_v54 = vpop.permute.xlu2 %134 }
  0xf1   :  { %697 = vrot.lane.b32.xlu0 %v2325_v3, %s3473_s14  ;;  %641 = vrot.lane.b32.xlu2 %v2432_v19, %s2247_s30 }
  0xf2   :  { %464 = vrot.lane.b32.xlu1 %v2422_v16, %s2245_s26 }
  0xf3   :  { %v2579_v57 = vpop.permute.xlu2 %384 }
  0xf9   :  { %516 = vrot.lane.b32.xlu0 %v2432_v19, %s3463_s13  ;;  %543 = vrot.lane.b32.xlu2 %v2333_v5, %s3465_s29 }
  0xfa   :  { %597 = vrot.lane.b32.xlu1 %v2325_v3, %s2252_s23 }
  0xfb   :  { %v2587_v58 = vpop.permute.xlu0 %159  ;;  %v2589_v59 = vpop.permute.xlu2 %110 }
  0xfc   :  { %v260_v60 = vpop.permute.xlu1 %259 }
 0x101   :  { %595 = vrot.lane.b32.xlu0 %v2348_v8, %s2252_s23  ;;  %622 = vrot.lane.b32.xlu2 %v2325_v3, %s2248_s0 }
 0x102   :  { %443 = vrot.lane.b32.xlu1 %v2333_v5, %s2249_s12 }
 0x103   :  { %v2612_v0 = vpop.permute.xlu0 %234  ;;  %v337_v1 = vpop.permute.xlu2 %336 }
 0x104   :  { %v350_v6 = vmul.f32 %v2594_v61, %v337_v1  ;;  %v185_v7 = vpop.permute.xlu1 %184 }
 0x105   :  { %v199_v10 = vmul.f32 %v2610_v63, %v185_v7  ;;  %v302_v7 = vmul.f32 %v2166_v20, %v2466_v27  ;;  %v2172_v27 = vld [vmem:[%s3446_s10 + $0x6] ss:$0 sm:$0xff] }
 0x106   :  { %v897_v14 = vpack.c.bf16 %v351_v4, %v350_v6  ;;  %v274_v23 = vmul.f32 %v2172_v27, %v260_v60  ;;  %v276_v60 = vmul.f32 %v2172_v27, %v2563_v53  ;;  %v1936_v53 = vld [vmem:[%s3447_s6 + $0x8] sm:$0xf] }
 0x107   :  { %v881_v31 = vpack.c.bf16 %v199_v10, %v178_v9  ;;  %v303_v9 = vmul.f32 %v2166_v20, %v2515_v42 }
 0x108   :  { %1204 = vmatpush.bf16.msra.mxu3 %v897_v14 }
 0x109   :  { %1146 = vmatpush.bf16.msra.mxu1 %v881_v31  ;;  %439 = vrot.lane.b32.xlu0 %v2422_v16, %s2249_s12  ;;  %v893_v14 = vpack.c.bf16 %v303_v9, %v302_v7  ;;  %v174_v7 = vmul.f32 %v2605_v62, %v2587_v58 }
 0x10a   :  { %539 = vrot.lane.b32.xlu2 %v2422_v16, %s3465_s29  ;;  %518 = vrot.lane.b32.xlu1 %v2333_v5, %s3463_s13  ;;  %s3484_s29 = smov 7  }
 0x10b   :  { %v285_v22 = vpop.permute.xlu0 %284  ;;  %v237_v35 = vpop.permute.xlu2 %236 }
 0x10c   :  { %v310_v11 = vpop.permute.xlu1 %309  ;;  %1205 = vmatpush.bf16.msra.mxu3 %v896_v15  ;;  %v299_v33 = vmul.f32 %v2166_v20, %v285_v22  ;;  %v277_v22 = vmul.f32 %v2172_v27, %v2543_v48  ;;  %v2102_v48 = vld [vmem:[%s3447_s6 + $0x24] sm:$0xf0] }
 0x10d   :  { %1147 = vmatpush.bf16.msra.mxu1 %v880_v36  ;;  %v324_v1 = vmul.f32 %v2161_v2, %v310_v11 }
 0x110   :  { %1206 = vmatpush.bf16.msra.mxu3 %v895_v37 }
 0x111   :  { %514 = vrot.lane.b32.xlu0 %v2422_v16, %s3463_s13 }
 0x112   :  { %618 = vrot.lane.b32.xlu2 %v2333_v5, %s2248_s0  ;;  %693 = vrot.lane.b32.xlu1 %v2333_v5, %s3473_s14 }
 0x113   :  { %v287_v29 = vpop.permute.xlu0 %286  ;;  %v312_v51 = vpop.permute.xlu2 %311 }
 0x114   :  { %v325_v4 = vmul.f32 %v2161_v2, %v312_v51  ;;  %v2646_v6 = vpop.permute.xlu1 %209  ;;  %v300_v12 = vmul.f32 %v2166_v20, %v287_v29  ;;  %v2164_v2 = vld [vmem:[%s3446_s10 + $0x5] ss:$0 sm:$0xff]  ;;  %v278_v29 = vmul.f32 %v2172_v27, %v2527_v45 }
 0x115   :  { %v253_v36 = vmul.f32 %v2164_v2, %v2430_v17  ;;  %v252_v11 = vmul.f32 %v2164_v2, %v2458_v26  ;;  %v250_v26 = vmul.f32 %v2164_v2, %v237_v35  ;;  %v2168_v35 = vld [vmem:[%s3446_s10 + $0x4] ss:$0 sm:$0xff] }
 0x116   :  { %v894_v10 = vpack.c.bf16 %v325_v4, %v324_v1  ;;  %v892_v15 = vpack.c.bf16 %v301_v21, %v300_v12  ;;  %v891_v17 = vpack.c.bf16 %v299_v33, %v278_v29  ;;  %v251_v4 = vmul.f32 %v2164_v2, %v2456_v25 }
 0x117   :  { %v888_v51 = vpack.c.bf16 %v253_v36, %v252_v11  ;;  %v152_v12 = vmul.f32 %v2165_v38, %v2468_v28  ;;  %v1937_v25 = vor.u32 %v2102_v48, %v1936_v53  ;;  %v226_v58 = vmul.f32 %v2168_v35, %v2503_v39  ;;  %v2169_v39 = vld [vmem:[%s3446_s10] ss:$0 sm:$0xff] }
 0x118   :  { %1207 = vmatpush.bf16.msra.mxu3 %v894_v10  ;;  %v153_v10 = vmul.f32 %v2165_v38, %v2454_v24  ;;  %v227_v28 = vmul.f32 %v2168_v35, %v2478_v30  ;;  %v401_v30 = vmul.f32 %v2483_v32, %v2521_v43  ;;  %v399_v36 = vmul.f32 %v2483_v32, %v2579_v57 }
 0x119   :  { %689 = vrot.lane.b32.xlu0 %v2422_v16, %s3473_s14 }
 0x11a   :  { %520 = vrot.lane.b32.xlu2 %v2348_v8, %s3463_s13  ;;  %441 = vrot.lane.b32.xlu1 %v2432_v19, %s2249_s12  ;;  %v878_v24 = vpack.c.bf16 %v153_v10, %v152_v12  ;;  %v2097_v10 = vld [vmem:[%s3447_s6 + $0x4] sm:$0xf]  ;;  %s3485_s13 = smov 17  }
 0x11b   :  { %v2662_v42 = vpop.permute.xlu0 %112  ;;  %v137_v18 = vpop.permute.xlu2 %136  ;;  %v1930_v12 = vld [vmem:[%s3447_s6 + $0x20] sm:$0xf0] }
 0x11c   :  { %v262_v31 = vpop.permute.xlu1 %261  ;;  %1208 = vmatpush.bf16.msra.mxu3 %v893_v14  ;;  %v890_v14 = vpack.c.bf16 %v277_v22, %v276_v60  ;;  %v885_v22 = vpack.c.bf16 %v227_v28, %v226_v58 }
 0x11d   :  { %v275_v13 = vmul.f32 %v2172_v27, %v262_v31  ;;  %v249_v27 = vmul.f32 %v2164_v2, %v2612_v0  ;;  %v887_v31 = vpack.c.bf16 %v251_v4, %v250_v26  ;;  %v202_v26 = vmul.f32 %v2610_v63, %v2535_v46 }
 0x11e   :  { %v127_v46 = vmul.f32 %v2169_v39, %v2549_v50  ;;  %v2110_v50 = vld [vmem:[%s3447_s6 + $0x64] sm:$0xf0] }
 0x11f   :  { %v889_v37 = vpack.c.bf16 %v275_v13, %v274_v23  ;;  %v228_v23 = vmul.f32 %v2168_v35, %v2492_v34  ;;  %v2714_v13 = vld [vmem:[%s3446_s10 + $0xa] ss:$0 sm:$0xff] }
 0x120   :  { %1209 = vmatpush.bf16.msra.mxu3 %v892_v15  ;;  %v151_v15 = vmul.f32 %v2165_v38, %v2505_v40  ;;  %v378_v43 = vmul.f32 %v2714_v13, %v2537_v47  ;;  %v203_v40 = vmul.f32 %v2610_v63, %v2525_v44  ;;  %v126_v47 = vmul.f32 %v2169_v39, %v2547_v49 }
 0x121   :  { %1175 = vmatpush.bf16.msra.mxu2 %v889_v37  ;;  %422 = vrot.lane.b32.xlu0 %v2325_v3, %s2253_s27  ;;  %v886_v2 = vpack.c.bf16 %v249_v27, %v228_v23  ;;  %v149_v37 = vmul.f32 %v2165_v38, %v2567_v54  ;;  %v377_v54 = vmul.f32 %v2714_v13, %v2577_v56 }
 0x122   :  { %614 = vrot.lane.b32.xlu2 %v2422_v16, %s2248_s0  ;;  %589 = vrot.lane.b32.xlu1 %v2422_v16, %s2252_s23  ;;  %v901_v44 = vpack.c.bf16 %v399_v36, %v378_v43  ;;  %v883_v49 = vpack.c.bf16 %v203_v40, %v202_v26  ;;  %v875_v48 = vpack.c.bf16 %v127_v46, %v126_v47  ;;  %v1960_v40 = vld [vmem:[%s3447_s6 + $0x40] sm:$0xf] }
 0x123   :  { %v2679_v45 = vpop.permute.xlu0 %340  ;;  %v212_v20 = vpop.permute.xlu2 %211  ;;  %v1933_v23 = vor.u32 %v2097_v10, %v1930_v12  ;;  %v2109_v26 = vld [vmem:[%s3447_s6 + $0x5c] sm:$0xf0]  ;;  %v939_v10 = vld [vmem:[%s3448_s7 + $0x8] sm:$0xff] }
 0x124   :  { %v162_v1 = vpop.permute.xlu1 %161  ;;  %1210 = vmatpush.bf16.msra.mxu3 %v891_v17  ;;  %v225_v29 = vmul.f32 %v2168_v35, %v212_v20  ;;  %v128_v17 = vmul.f32 %v2169_v39, %v2511_v41  ;;  %v376_v41 = vmul.f32 %v2714_v13, %v2573_v55  ;;  %v1968_v20 = vld [vmem:[%s3447_s6 + $0x48] sm:$0xf]  ;;  %v352_v58 = vmul.f32 %v2594_v61, %v2679_v45  ;;  %v2792_v45 = vld [vmem:[%s3446_s10 + $0xf] ss:$0 sm:$0xff] }
 0x125   :  { %v175_v9 = vmul.f32 %v2605_v62, %v162_v1  ;;  %1176 = vmatpush.bf16.msra.mxu2 %v888_v51  ;;  %v150_v62 = vmul.f32 %v2165_v38, %v137_v18  ;;  %v125_v1 = vmul.f32 %v2169_v39, %v2662_v42  ;;  %v1969_v4 = vor.u32 %v2110_v50, %v1968_v20  ;;  %v2101_v42 = vld [vmem:[%s3447_s6 + $0x1c] sm:$0xf0]  ;;  %v1970_v20 = vld [vmem:[%s3447_s6 + $0x68] sm:$0xf0] }
 0x126   :  { %v900_v51 = vpack.c.bf16 %v377_v54, %v376_v41  ;;  %v1962_v54 = vld [vmem:[%s3447_s6 + $0x60] sm:$0xf0] }
 0x127   :  { %v879_v21 = vpack.c.bf16 %v175_v9, %v174_v7  ;;  %v877_v60 = vpack.c.bf16 %v151_v15, %v150_v62  ;;  %v201_v7 = vmul.f32 %v2610_v63, %v2557_v52  ;;  %v124_v9 = vmul.f32 %v2169_v39, %v2589_v59  ;;  %v2782_v62 = vld [vmem:[%s3446_s10 + $0x13] ss:$0 sm:$0xff]  ;;  %v1938_v39 = vld [vmem:[%s3447_s6 + $0x28] sm:$0xf0] }
 0x128   :  { %1211 = vmatpush.bf16.msra.mxu3 %v890_v14 }
 0x129   :  { %1148 = vmatpush.bf16.msra.mxu1 %v879_v21  ;;  %1177 = vmatpush.bf16.msra.mxu2 %v887_v31 }
 0x12a   :  { %570 = vrot.lane.b32.xlu0 %v2348_v8, %s2244_s25  ;;  %445 = vrot.lane.b32.xlu2 %v2348_v8, %s2249_s12 }
 0x12b   :  { %691 = vrot.lane.b32.xlu1 %v2432_v19, %s3473_s14  ;;  %v2706_v0 = vpop.permute.xlu0 %564  ;;  %v387_v34 = vpop.permute.xlu2 %386  ;;  %1212 = vmatmul.bf16.vlgmr.msra.gmra.mxu3 %v1937_v25 }
 0x12c   :  { %v400_v18 = vmul.f32 %v2483_v32, %v387_v34  ;;  %v360_v33 = vpop.permute.xlu1 %359  ;;  %v224_v32 = vmul.f32 %v2168_v35, %v2646_v6  ;;  %v876_v6 = vpack.c.bf16 %v149_v37, %v128_v17  ;;  %v1928_v35 = vld [vmem:[%s3447_s6] sm:$0xf]  ;;  %v2787_v34 = vld [vmem:[%s3446_s10 + $0x12] ss:$0 sm:$0xff]  ;;  %v2000_v37 = vld [vmem:[%s3447_s6 + $0x88] sm:$0xf] }
 0x12d   :  { %1149 = vmatpush.bf16.msra.mxu1 %v878_v24  ;;  %1178 = vmatpush.bf16.msra.mxu2 %v886_v2  ;;  %v374_v27 = vmul.f32 %v2714_v13, %v360_v33  ;;  %v1929_v25 = vor.u32 %v2101_v42, %v1928_v35  ;;  %v2098_v2 = vld [vmem:[%s3447_s6 + $0xc] sm:$0xf]  ;;  %v579_v33 = vmul.f32 %v2782_v62, %v2706_v0  ;;  %v2820_v0 = vld [vmem:[%s3446_s10 + $0x16] ss:$0 sm:$0xff] }
 0x12e   :  { %v902_v11 = vpack.c.bf16 %v401_v30, %v400_v18  ;;  %v884_v55 = vpack.c.bf16 %v225_v29, %v224_v32  ;;  %v2118_v29 = vld [vmem:[%s3447_s6 + $0xa4] sm:$0xf0]  ;;  %v2105_v32 = vld [vmem:[%s3447_s6 + $0x44] sm:$0xf] }
 0x12f   :  { %v2001_v43 = vor.u32 %v2118_v29, %v2000_v37 }
 0x130   :  { %1236 = vmatpush.bf16.msrb.mxu0 %v902_v11  ;;  %v1941_v11 = vor.u32 %v2098_v2, %v1938_v39  ;;  %v2896_v2 = vld [vmem:[%s3446_s10 + $0xe] ss:$0 sm:$0xff]  ;;  %v944_v39 = vld [vmem:[%s3448_s7 + $0x30] sm:$0xff] }
 0x131   :  { %1150 = vmatpush.bf16.msra.mxu1 %v877_v60  ;;  %1179 = vmatpush.bf16.msra.mxu2 %v885_v22 }
 0x132   :  { %672 = vrot.lane.b32.xlu0 %v2325_v3, %s2254_s28  ;;  %593 = vrot.lane.b32.xlu2 %v2333_v5, %s2252_s23 }
 0x133   :  { %493 = vrot.lane.b32.xlu1 %v2333_v5, %s2255_s15  ;;  %v471_v56 = vpop.permute.xlu0 %470  ;;  %v187_v57 = vpop.permute.xlu2 %186 }
 0x134   :  { %v343_v38 = vpop.permute.xlu1 %342  ;;  %1237 = vmatpush.bf16.msrb.mxu0 %v901_v44  ;;  %v200_v53 = vmul.f32 %v2610_v63, %v187_v57  ;;  %v874_v63 = vpack.c.bf16 %v125_v1, %v124_v9  ;;  %v1961_v57 = vor.u32 %v2109_v26, %v1960_v40  ;;  %v943_v26 = vld [vmem:[%s3448_s7 + $0x28] sm:$0xff] }
 0x135   :  { %1151 = vmatpush.bf16.msra.mxu1 %v876_v6  ;;  %1180 = vmatpush.bf16.msra.mxu2 %v884_v55  ;;  %v353_v24 = vmul.f32 %v2594_v61, %v343_v38  ;;  %v1965_v6 = vor.u32 %v2105_v32, %v1962_v54  ;;  %v2106_v38 = vld [vmem:[%s3447_s6 + $0x4c] sm:$0xf]  ;;  %v2026_v32 = vld [vmem:[%s3447_s6 + $0xe0] sm:$0xf0] }
 0x136   :  { %v882_v14 = vpack.c.bf16 %v201_v7, %v200_v53  ;;  %v2229_v54 = vld [vmem:[%s3444_s1] sm:$0xff]  ;;  %s3478_s1 = smov 14  }
 0x137   :  { %v898_v61 = vpack.c.bf16 %v353_v24, %v352_v58 }
 0x138   :  { %1238 = vmatpush.bf16.msrb.mxu0 %v900_v51 }
 0x139   :  { %1152 = vmatpush.bf16.msra.mxu1 %v875_v48  ;;  %1181 = vmatpush.bf16.msra.mxu2 %v883_v49  ;;  %v1973_v48 = vor.u32 %v2106_v38, %v1970_v20  ;;  %v2179_v38 = vld [vmem:[%s3446_s10 + $0x11] ss:$0 sm:$0xff]  ;;  %v2122_v20 = vld [vmem:[%s3447_s6 + $0xcc] sm:$0xf] }
 0x13a   :  { %489 = vrot.lane.b32.xlu0 %v2422_v16, %s2255_s15  ;;  %695 = vrot.lane.b32.xlu2 %v2348_v8, %s3473_s14 }
 0x13b   :  { %572 = vrot.lane.b32.xlu1 %v2325_v3, %s2244_s25  ;;  %v2772_v52 = vpop.permute.xlu0 %545  ;;  %v362_v59 = vpop.permute.xlu2 %361  ;;  %1217 = vmatmul.bf16.gmra.mxu3 %v1969_v4  ;;  %v2032_v4 = vld [vmem:[%s3447_s6 + $0xc8] sm:$0xf] }
 0x13c   :  { %v375_v21 = vmul.f32 %v2714_v13, %v362_v59  ;;  %v640_v31 = vpop.permute.xlu1 %639  ;;  %v482_v13 = vmul.f32 %v2792_v45, %v471_v56  ;;  %v557_v50 = vmul.f32 %v2787_v34, %v2772_v52  ;;  %v2873_v52 = vld [vmem:[%s3446_s10 + $0x15] ss:$0 sm:$0xff]  ;;  %v1992_v59 = vld [vmem:[%s3447_s6 + $0x80] sm:$0xf] }
 0x13d   :  { %1153 = vmatpush.bf16.msra.mxu1 %v874_v63  ;;  %1182 = vmatpush.bf16.msra.mxu2 %v882_v14  ;;  %v654_v46 = vmul.f32 %v2820_v0, %v640_v31  ;;  %v2117_v63 = vld [vmem:[%s3447_s6 + $0x9c] sm:$0xf0]  ;;  %v2113_v14 = vld [vmem:[%s3447_s6 + $0x84] sm:$0xf] }
 0x13e   :  { %v899_v28 = vpack.c.bf16 %v375_v21, %v374_v27  ;;  %v1994_v27 = vld [vmem:[%s3447_s6 + $0xa0] sm:$0xf0]  ;;  %v1993_v24 = vor.u32 %v2117_v63, %v1992_v59 }
 0x140   :  { %1154 = vmatmul.bf16.vlgmr.msra.gmra.mxu1 %v1929_v25  ;;  %1183 = vmatmul.bf16.vlgmr.msra.gmra.mxu2 %v1933_v23 }
 0x141   :  { %1239 = vmatpush.bf16.msrb.mxu0 %v899_v28  ;;  %v1997_v28 = vor.u32 %v2113_v14, %v1994_v27 }
 0x142   :  { %568 = vrot.lane.b32.xlu0 %v2333_v5, %s2244_s25  ;;  %497 = vrot.lane.b32.xlu2 %v2325_v3, %s2255_s15 }
 0x143   :  { %416 = vrot.lane.b32.xlu1 %v2432_v19, %s2253_s27  ;;  %v467_v30 = vpop.permute.xlu0 %466  ;;  %v548_v18 = vpop.permute.xlu2 %547 }
 0x144   :  { %v558_v15 = vmul.f32 %v2787_v34, %v548_v18  ;;  %v473_v36 = vpop.permute.xlu1 %472  ;;  %v480_v35 = vmul.f32 %v2792_v45, %v467_v30  ;;  %v2002_v30 = vld [vmem:[%s3447_s6 + $0xa8] sm:$0xf0] }
 0x145   :  { %v483_v60 = vmul.f32 %v2792_v45, %v473_v36  ;;  %1240 = vmatpush.bf16.msrb.mxu0 %v898_v61 }
 0x146   :  { %v921_v22 = vpack.c.bf16 %v579_v33, %v558_v15 }
 0x147   :  { %v913_v17 = vpack.c.bf16 %v483_v60, %v482_v13  ;;  %v2114_v13 = vld [vmem:[%s3447_s6 + $0x8c] sm:$0xf] }
 0x148   :  { %1291 = vmatpush.bf16.msrb.mxu2 %v921_v22  ;;  %1241 = vmatmul.bf16.vlgmr.msrb.gmra.mxu0 %v1941_v11  ;;  %v2005_v37 = vor.u32 %v2114_v13, %v2002_v30 }
 0x149   :  { %1262 = vmatpush.bf16.msrb.mxu1 %v913_v17 }
 0x14a   :  { %414 = vrot.lane.b32.xlu0 %v2422_v16, %s2253_s27  ;;  %591 = vrot.lane.b32.xlu2 %v2432_v19, %s2252_s23 }
 0x14b   :  { %491 = vrot.lane.b32.xlu1 %v2432_v19, %s2255_s15  ;;  %v2840_v41 = vpop.permute.xlu0 %541  ;;  %v642_v44 = vpop.permute.xlu2 %641  ;;  %1222 = vmatmul.bf16.gmra.mxu3 %v2001_v43 }
 0x14c   :  { %v655_v47 = vmul.f32 %v2820_v0, %v642_v44  ;;  %v621_v56 = vpop.permute.xlu1 %620  ;;  %v555_v29 = vmul.f32 %v2787_v34, %v2840_v41 }
 0x14d   :  { %v632_v25 = vmul.f32 %v2873_v52, %v621_v56 }
 0x14e   :  { %v929_v55 = vpack.c.bf16 %v655_v47, %v654_v46 }
 0x150   :  { %1159 = vmatmul.bf16.gmra.mxu1 %v1961_v57  ;;  %1188 = vmatmul.bf16.gmra.mxu2 %v1965_v6 }
 0x151   :  { %1320 = vmatpush.bf16.msrb.mxu3 %v929_v55 }
 0x152   :  { %643 = vrot.lane.b32.xlu0 %v2333_v5, %s2247_s30  ;;  %420 = vrot.lane.b32.xlu2 %v2348_v8, %s2253_s27  ;;  %v2126_v5 = vld [vmem:[%s3447_s6 + $0xe4] sm:$0xf0] }
 0x153   :  { %666 = vrot.lane.b32.xlu1 %v2432_v19, %s2254_s28  ;;  %v448_v49 = vpop.permute.xlu0 %447  ;;  %v544_v51 = vpop.permute.xlu2 %543  ;;  %v2033_v12 = vor.u32 %v2126_v5, %v2032_v4 }
 0x154   :  { %v556_v1 = vmul.f32 %v2787_v34, %v544_v51  ;;  %v469_v53 = vpop.permute.xlu1 %468  ;;  %v458_v18 = vmul.f32 %v2896_v2, %v448_v49 }
 0x155   :  { %v481_v7 = vmul.f32 %v2792_v45, %v469_v53 }
 0x156   :  { %v920_v9 = vpack.c.bf16 %v557_v50, %v556_v1  ;;  %v2034_v50 = vld [vmem:[%s3447_s6 + $0xe8] sm:$0xf0] }
 0x157   :  { %v912_v42 = vpack.c.bf16 %v481_v7, %v480_v35  ;;  %v2181_v35 = vld [vmem:[%s3446_s10 + $0x14] ss:$0 sm:$0xff] }
 0x158   :  { %1292 = vmatpush.bf16.msrb.mxu2 %v920_v9  ;;  %1246 = vmatmul.bf16.gmra.mxu0 %v1973_v48  ;;  %v2037_v48 = vor.u32 %v2122_v20, %v2034_v50 }
 0x159   :  { %1263 = vmatpush.bf16.msrb.mxu1 %v912_v42 }
 0x15a   :  { %953 = vperm.xlu0 %2158, %v939_v10   ;;  %495 = vrot.lane.b32.xlu2 %v2348_v8, %s2255_s15 }
 0x15b   :  { %v523_v21 = vpop.permute.xlu0 %522  ;;  %v623_v31 = vpop.permute.xlu2 %622  ;;  %647 = vrot.lane.b32.xlu1 %v2325_v3, %s2247_s30  ;;  %1227 = vmatmul.bf16.gmra.mxu3 %v2033_v12  ;;  %v2904_v3 = vld [vmem:[%s3446_s10 + $0x18] ss:$0 sm:$0xff] }
 0x15c   :  { %v633_v23 = vmul.f32 %v2873_v52, %v623_v31  ;;  %v617_v58 = vpop.permute.xlu1 %616  ;;  %v533_v49 = vmul.f32 %v2179_v38, %v523_v21 }
 0x15d   :  { %v630_v57 = vmul.f32 %v2873_v52, %v617_v58 }
 0x15e   :  { %v928_v61 = vpack.c.bf16 %v633_v23, %v632_v25 }
 0x160   :  { %1164 = vmatmul.bf16.gmra.mxu1 %v1993_v24  ;;  %1193 = vmatmul.bf16.gmra.mxu2 %v1997_v28 }
 0x161   :  { %1321 = vmatpush.bf16.msrb.mxu3 %v928_v61 }
 0x162   :  { %978 = vperm.xlu0 %2158, %v944_v39   ;;  %670 = vrot.lane.b32.xlu2 %v2348_v8, %s2254_s28 }
 0x163   :  { %v698_v33 = vpop.permute.xlu0 %697  ;;  %645 = vrot.lane.b32.xlu1 %v2348_v8, %s2247_s30  ;;  %v2024_v8 = vld [vmem:[%s3447_s6 + $0xc0] sm:$0xf] }
 0x164   :  { %v708_v15 = vmul.f32 %v2904_v3, %v698_v33  ;;  %v540_v36 = vpop.permute.xlu2 %539  ;;  %v465_v11 = vpop.permute.xlu1 %464 }
 0x165   :  { %v554_v60 = vmul.f32 %v2787_v34, %v540_v36  ;;  %v479_v22 = vmul.f32 %v2792_v45, %v465_v11  ;;  %v2125_v34 = vld [vmem:[%s3447_s6 + $0xdc] sm:$0xf0]  ;;  %v2121_v45 = vld [vmem:[%s3447_s6 + $0xc4] sm:$0xf] }
 0x166   :  { %v936_v17 = vpack.c.bf16 0.0, %v708_v15  ;;  %v2025_v47 = vor.u32 %v2125_v34, %v2024_v8  ;;  %v2029_v56 = vor.u32 %v2121_v45, %v2026_v32 }
 0x167   :  { %v911_v43 = vpack.c.bf16 %v479_v22, %v458_v18  ;;  %v919_v40 = vpack.c.bf16 %v555_v29, %v554_v60  ;;  %v2183_v60 = vld [vmem:[%s3446_s10 + $0x10] ss:$0 sm:$0xff] }
 0x168   :  { %1251 = vmatmul.bf16.gmra.mxu0 %v2005_v37 }
 0x169   :  { %1264 = vmatpush.bf16.msrb.mxu1 %v911_v43  ;;  %1293 = vmatpush.bf16.msrb.mxu2 %v919_v40 }
 0x16a   :  { %973 = vperm.xlu0 %2158, %v943_v26   ;;  %418 = vrot.lane.b32.xlu2 %v2229_v54, %s2253_s27  ;;  %v940_v26 = vld [vmem:[%s3448_s7 + $0x10] sm:$0xff] }
 0x16b   :  { %v517_v41 = vpop.permute.xlu0 %516  ;;  %1350 = vmatpush.bf16.msra.mxu0 %v936_v17  ;;  %958 = vperm.xlu1 %2160, %v940_v26  }
 0x16c   :  { %v619_v44 = vpop.permute.xlu2 %618  ;;  %v598_v46 = vpop.permute.xlu1 %597  ;;  %v530_v10 = vmul.f32 %v2179_v38, %v517_v41 }
 0x16d   :  { %v631_v6 = vmul.f32 %v2873_v52, %v619_v44 }
 0x16f   :  { %v927_v55 = vpack.c.bf16 %v631_v6, %v630_v57  ;;  %v2182_v57 = vld [vmem:[%s3446_s10 + $0xd] ss:$0 sm:$0xff] }
 0x170   :  { %1169 = vmatmul.bf16.gmra.mxu1 %v2025_v47  ;;  %1198 = vmatmul.bf16.gmra.mxu2 %v2029_v56  ;;  %v938_v56 = vld [vmem:[%s3448_s7] sm:$0xff] }
 0x171   :  { %1322 = vmatpush.bf16.msrb.mxu3 %v927_v55 }
 0x172   :  { %566 = vrot.lane.b32.xlu2 %v2432_v19, %s2244_s25  ;;  %v608_v19 = vmul.f32 %v2181_v35, %v598_v46 }
 0x173   :  { %v596_v51 = vpop.permute.xlu0 %595 }
 0x174   :  { %v521_v1 = vpop.permute.xlu2 %520  ;;  %v444_v53 = vpop.permute.xlu1 %443  ;;  %v607_v24 = vmul.f32 %v2181_v35, %v596_v51 }
 0x175   :  { %v532_v4 = vmul.f32 %v2179_v38, %v521_v1  ;;  %v456_v25 = vmul.f32 %v2896_v2, %v444_v53 }
 0x177   :  { %v918_v5 = vpack.c.bf16 %v533_v49, %v532_v4 }
 0x178   :  { %1256 = vmatmul.bf16.gmra.mxu0 %v2037_v48 }
 0x179   :  { %1294 = vmatpush.bf16.msrb.mxu2 %v918_v5 }
 0x17a   :  { %668 = vrot.lane.b32.xlu2 %v2229_v54, %s2254_s28 }
 0x17b   :  { %v440_v7 = vpop.permute.xlu0 %439 }
 0x17c   :  { %v615_v9 = vpop.permute.xlu2 %614  ;;  %v519_v42 = vpop.permute.xlu1 %518  ;;  %v454_v39 = vmul.f32 %v2896_v2, %v440_v7 }
 0x17d   :  { %v629_v12 = vmul.f32 %v2873_v52, %v615_v9  ;;  %v531_v59 = vmul.f32 %v2179_v38, %v519_v42  ;;  %v941_v9 = vld [vmem:[%s3448_s7 + $0x18] sm:$0xff]  ;;  %v2989_v42 = vld [vmem:[%s3446_s10 + $0x17] ss:$0 sm:$0xff] }
 0x17f   :  { %v917_v63 = vpack.c.bf16 %v531_v59, %v530_v10  ;;  %v926_v14 = vpack.c.bf16 %v629_v12, %v608_v19 }
 0x181   :  { %1295 = vmatpush.bf16.msrb.mxu2 %v917_v63  ;;  %1323 = vmatpush.bf16.msrb.mxu3 %v926_v14 }
 0x182   :  { %664 = vrot.lane.b32.xlu2 %v2422_v16, %s2254_s28 }
 0x183   :  { %v515_v27 = vpop.permute.xlu0 %514 }
 0x184   :  { %v446_v21 = vpop.permute.xlu2 %445  ;;  %v694_v31 = vpop.permute.xlu1 %693 }
 0x185   :  { %v457_v23 = vmul.f32 %v2896_v2, %v446_v21  ;;  %v706_v11 = vmul.f32 %v2904_v3, %v694_v31  ;;  %v945_v31 = vld [vmem:[%s3448_s7 + $0x38] sm:$0xff] }
 0x186   :  { %983 = vperm.xlu1 %2160, %v945_v31  }
 0x187   :  { %v910_v58 = vpack.c.bf16 %v457_v23, %v456_v25 }
 0x189   :  { %1265 = vmatpush.bf16.msrb.mxu1 %v910_v58  ;;  %v2099_v58 = vld [vmem:[%s3447_s6 + $0x14] sm:$0xf] }
 0x18a   :  { %948 = vperm.xlu2 %2159, %v938_v56  }
 0x18b   :  { %v690_v28 = vpop.permute.xlu0 %689 }
 0x18c   :  { %v594_v52 = vpop.permute.xlu2 %593  ;;  %v442_v61 = vpop.permute.xlu1 %441  ;;  %v704_v8 = vmul.f32 %v2904_v3, %v690_v28 }
 0x18d   :  { %v606_v13 = vmul.f32 %v2181_v35, %v594_v52  ;;  %v455_v30 = vmul.f32 %v2896_v2, %v442_v61  ;;  %v529_v2 = vmul.f32 %v2179_v38, %v515_v27 }
 0x18f   :  { %v909_v18 = vpack.c.bf16 %v455_v30, %v454_v39  ;;  %v925_v16 = vpack.c.bf16 %v607_v24, %v606_v13  ;;  %v1946_v24 = vld [vmem:[%s3447_s6 + $0x30] sm:$0xf0] }
 0x190   :  { %v1949_v61 = vor.u32 %v2099_v58, %v1946_v24  ;;  %v1984_v24 = vld [vmem:[%s3447_s6 + $0x58] sm:$0xf] }
 0x191   :  { %1266 = vmatpush.bf16.msrb.mxu1 %v909_v18  ;;  %1324 = vmatpush.bf16.msrb.mxu3 %v925_v16  ;;  %v942_v16 = vld [vmem:[%s3448_s7 + $0x20] sm:$0xff] }
 0x192   :  { %963 = vperm.xlu2 %2159, %v941_v9   ;;  %v1976_v9 = vld [vmem:[%s3447_s6 + $0x50] sm:$0xf] }
 0x193   :  { %v423_v33 = vpop.permute.xlu0 %422 }
 0x194   :  { %v696_v15 = vpop.permute.xlu2 %695  ;;  %v590_v36 = vpop.permute.xlu1 %589  ;;  %v433_v6 = vmul.f32 %v2182_v57, %v423_v33 }
 0x195   :  { %v707_v37 = vmul.f32 %v2904_v3, %v696_v15  ;;  %v604_v44 = vmul.f32 %v2181_v35, %v590_v36 }
 0x197   :  { %v935_v29 = vpack.c.bf16 %v707_v37, %v706_v11 }
 0x199   :  { %1351 = vmatpush.bf16.msra.mxu0 %v935_v29 }
 0x19a   :  { %968 = vperm.xlu2 %2159, %v942_v16  }
 0x19c   :  { %v571_v22 = vpop.permute.xlu0 %570  ;;  %v498_v17 = vpop.permute.xlu2 %497 }
 0x19d   :  { %v508_v43 = vmul.f32 %v2183_v60, %v498_v17  ;;  %v692_v40 = vpop.permute.xlu1 %691  ;;  %v582_v55 = vmul.f32 %v2782_v62, %v571_v22  ;;  %v1944_v22 = vld [vmem:[%s3447_s6 + $0x10] sm:$0xf] }
 0x19e   :  { %v705_v34 = vmul.f32 %v2904_v3, %v692_v40  ;;  %v2103_v17 = vld [vmem:[%s3447_s6 + $0x2c] sm:$0xf0]  ;;  %v2230_v40 = vld [vmem:[%s3443_s2 + $0x8] sm:$0xff]  ;;  %s3481_s2 = smov 6  }
 0x19f   :  { %v916_v45 = vpack.c.bf16 %v529_v2, %v508_v43 }
 0x1a0   :  { %v934_v32 = vpack.c.bf16 %v705_v34, %v704_v8 }
 0x1a1   :  { %1296 = vmatpush.bf16.msrb.mxu2 %v916_v45  ;;  %v1945_v45 = vor.u32 %v2103_v17, %v1944_v22 }
 0x1a2   :  { %1352 = vmatpush.bf16.msra.mxu0 %v934_v32 }
 0x1a4   :  { %v673_v54 = vpop.permute.xlu0 %672  ;;  %v592_v41 = vpop.permute.xlu2 %591 }
 0x1a5   :  { %v605_v46 = vmul.f32 %v2181_v35, %v592_v41  ;;  %v494_v47 = vpop.permute.xlu1 %493  ;;  %v683_v12 = vmul.f32 %v2989_v42, %v673_v54 }
 0x1a6   :  { %v506_v5 = vmul.f32 %v2183_v60, %v494_v47 }
 0x1a7   :  { %v924_v3 = vpack.c.bf16 %v605_v46, %v604_v44  ;;  %v1952_v44 = vld [vmem:[%s3447_s6 + $0x18] sm:$0xf] }
 0x1a8   :  { %v2104_v46 = vld [vmem:[%s3447_s6 + $0x34] sm:$0xf0] }
 0x1a9   :  { %1325 = vmatpush.bf16.msrb.mxu3 %v924_v3 }
 0x1ac   :  { %v490_v38 = vpop.permute.xlu0 %489  ;;  %v421_v20 = vpop.permute.xlu2 %420 }
 0x1ad   :  { %v432_v50 = vmul.f32 %v2182_v57, %v421_v20  ;;  %v573_v49 = vpop.permute.xlu1 %572  ;;  %v504_v25 = vmul.f32 %v2183_v60, %v490_v38 }
 0x1ae   :  { %v583_v51 = vmul.f32 %v2782_v62, %v573_v49  ;;  %v2991_v19 = vpop.f32.mrf.mxu3 }
 0x1af   :  { %v908_v1 = vpack.c.bf16 %v433_v6, %v432_v50 }
 0x1b0   :  { %v923_v53 = vpack.c.bf16 %v583_v51, %v582_v55  ;;  %v1953_v55 = vor.u32 %v2104_v46, %v1952_v44 }
 0x1b1   :  { %1267 = vmatpush.bf16.msrb.mxu1 %v908_v1 }
 0x1b2   :  { %1326 = vmatpush.bf16.msrb.mxu3 %v923_v53 }
 0x1b4   :  { %v569_v48 = vpop.permute.xlu0 %568  ;;  %v496_v4 = vpop.permute.xlu2 %495 }
 0x1b5   :  { %v507_v35 = vmul.f32 %v2183_v60, %v496_v4  ;;  %v417_v7 = vpop.permute.xlu1 %416  ;;  %v581_v2 = vmul.f32 %v2782_v62, %v569_v48 }
 0x1b6   :  { %v1215_v13 = vpop.f32.mrf.mxu3  ;;  %v430_v33 = vmul.f32 %v2182_v57, %v417_v7 }
 0x1b7   :  { %v915_v10 = vpack.c.bf16 %v507_v35, %v506_v5 }
 0x1b9   :  { %1297 = vmatpush.bf16.msrb.mxu2 %v915_v10  ;;  %v2111_v10 = vld [vmem:[%s3447_s6 + $0x6c] sm:$0xf0] }
 0x1bc   :  { %v415_v59 = vpop.permute.xlu0 %414  ;;  %v671_v63 = vpop.permute.xlu2 %670 }
 0x1bd   :  { %v682_v14 = vmul.f32 %v2989_v42, %v671_v63  ;;  %v492_v27 = vpop.permute.xlu1 %491  ;;  %v2995_v21 = vpop.f32.mrf.mxu1  ;;  %v429_v37 = vmul.f32 %v2182_v57, %v415_v59 }
 0x1be   :  { %v505_v23 = vmul.f32 %v2183_v60, %v492_v27  ;;  %v3032_v47 = vpop.f32.mrf.mxu3 }
 0x1bf   :  { %v933_v28 = vpack.c.bf16 %v683_v12, %v682_v14  ;;  %v906_v26 = vpack.c.bf16 %v429_v37, %v2230_v40  ;;  %v1977_v14 = vor.u32 %v2111_v10, %v1976_v9 }
 0x1c0   :  { %v914_v52 = vpack.c.bf16 %v505_v23, %v504_v25 }
 0x1c1   :  { %1353 = vmatpush.bf16.msra.mxu0 %v933_v28  ;;  %v2112_v28 = vld [vmem:[%s3447_s6 + $0x74] sm:$0xf0] }
 0x1c2   :  { %1298 = vmatpush.bf16.msrb.mxu2 %v914_v52 }
 0x1c3   :  { %v3006_v39 = vpop.f32.mrf.mxu2 }
 0x1c4   :  { %v644_v30 = vpop.permute.xlu0 %643  ;;  %v419_v18 = vpop.permute.xlu2 %418 }
 0x1c5   :  { %v431_v15 = vmul.f32 %v2182_v57, %v419_v18  ;;  %v1157_v36 = vpop.f32.mrf.mxu1  ;;  %1299 = vmatmul.bf16.vlgmr.msrb.gmra.mxu2 %v1949_v61  ;;  %v3011_v11 = vpop.f32.mrf.mxu0  ;;  %v2107_v57 = vld [vmem:[%s3447_s6 + $0x54] sm:$0xf]  ;;  %v656_v27 = vmul.f32 %v2820_v0, %v644_v30  ;;  %v1985_v30 = vor.u32 %v2112_v28, %v1984_v24 }
 0x1c6   :  { %v667_v60 = vpop.permute.xlu1 %666  ;;  %v3050_v7 = vpop.f32.mrf.mxu3  ;;  %v2115_v61 = vld [vmem:[%s3447_s6 + $0x94] sm:$0xf] }
 0x1c7   :  { %v907_v29 = vpack.c.bf16 %v431_v15, %v430_v33  ;;  %v680_v53 = vmul.f32 %v2989_v42, %v667_v60  ;;  %v2100_v33 = vld [vmem:[%s3447_s6 + $0x1c] sm:$0xf] }
 0x1c8   :  { %v1954_v15 = vld [vmem:[%s3447_s6 + $0x38] sm:$0xf0] }
 0x1c9   :  { %1268 = vmatpush.bf16.msrb.mxu1 %v907_v29  ;;  %v1957_v29 = vor.u32 %v2100_v33, %v1954_v15 }
 0x1cb   :  { %v1186_v43 = vpop.f32.mrf.mxu2 }
 0x1cc   :  { %v954_v8 = vpop.permute.xlu0 %953  ;;  %v567_v34 = vpop.permute.xlu2 %566 }
 0x1cd   :  { %v1158_v32 = vadd.f32 %v1157_v36, %v954_v8  ;;  %v580_v54 = vmul.f32 %v2782_v62, %v567_v34  ;;  %v3024_v41 = vpop.f32.mrf.mxu1  ;;  %1269 = vmatpush.bf16.msrb.mxu1 %v906_v26  ;;  %v1244_v56 = vpop.f32.mrf.mxu0  ;;  %v1978_v62 = vld [vmem:[%s3447_s6 + $0x70] sm:$0xf0] }
 0x1ce   :  { %v648_v38 = vpop.permute.xlu1 %647  ;;  %v1981_v50 = vor.u32 %v2107_v57, %v1978_v62  ;;  %v3082_v16 = vpop.f32.mrf.mxu3  ;;  %v2042_v57 = vld [vmem:[%s3447_s6 + $0xf0] sm:$0xf0] }
 0x1cf   :  { %v1187_v3 = vadd.f32 %v1186_v43, %v1158_v32  ;;  %v922_v6 = vpack.c.bf16 %v581_v2, %v580_v54  ;;  %v658_v31 = vmul.f32 %v2820_v0, %v648_v38  ;;  %v2008_v2 = vld [vmem:[%s3447_s6 + $0x90] sm:$0xf]  ;;  %v2016_v32 = vld [vmem:[%s3447_s6 + $0x98] sm:$0xf] }
 0x1d0   :  { %1270 = vmatmul.bf16.vlgmr.msrb.gmra.mxu1 %v1945_v45  ;;  %v2119_v43 = vld [vmem:[%s3447_s6 + $0xac] sm:$0xf0]  ;;  %v2120_v54 = vld [vmem:[%s3447_s6 + $0xb4] sm:$0xf0] }
 0x1d1   :  { %v1216_v20 = vadd.f32 %v1215_v13, %v1187_v3  ;;  %1327 = vmatpush.bf16.msrb.mxu3 %v922_v6  ;;  %v2009_v45 = vor.u32 %v2119_v43, %v2008_v2  ;;  %v2017_v3 = vor.u32 %v2120_v54, %v2016_v32  ;;  %v2108_v6 = vld [vmem:[%s3447_s6 + $0x5c] sm:$0xf] }
 0x1d3   :  { %v3040_v49 = vadd.f32 %v1244_v56, %v1216_v20  ;;  %v3042_v51 = vpop.f32.mrf.mxu2  ;;  %v2123_v56 = vld [vmem:[%s3447_s6 + $0xd4] sm:$0xf] }
 0x1d4   :  { %v669_v1 = vpop.permute.xlu2 %668  ;;  %1328 = vmatmul.bf16.vlgmr.msrb.gmra.mxu3 %v1953_v55  ;;  %v3080_v13 = vpop.permute.xlu0 %978  ;;  %v1986_v55 = vld [vmem:[%s3447_s6 + $0x78] sm:$0xf0]  ;;  %v2045_v38 = vor.u32 %v2123_v56, %v2042_v57 }
 0x1d5   :  { %v681_v48 = vmul.f32 %v2989_v42, %v669_v1  ;;  %v3046_v4 = vpop.f32.mrf.mxu1  ;;  %1304 = vmatmul.bf16.gmra.mxu2 %v1981_v50  ;;  %v3048_v5 = vpop.f32.mrf.mxu0  ;;  %v1989_v20 = vor.u32 %v2108_v6, %v1986_v55  ;;  %v2040_v50 = vld [vmem:[%s3447_s6 + $0xd0] sm:$0xf] }
 0x1d6   :  { %v646_v12 = vpop.permute.xlu1 %645  ;;  %v1225_v8 = vpop.f32.mrf.mxu3  ;;  %v2127_v1 = vld [vmem:[%s3447_s6 + $0xec] sm:$0xf0] }
 0x1d7   :  { %v932_v35 = vpack.c.bf16 %v681_v48, %v680_v53  ;;  %v657_v58 = vmul.f32 %v2820_v0, %v646_v12  ;;  %v2041_v53 = vor.u32 %v2127_v1, %v2040_v50  ;;  %v2048_v48 = vld [vmem:[%s3447_s6 + $0xd8] sm:$0xf]  ;;  %v2116_v12 = vld [vmem:[%s3447_s6 + $0x9c] sm:$0xf] }
 0x1d9   :  { %1354 = vmatpush.bf16.msra.mxu0 %v932_v35  ;;  %v930_v18 = vpack.c.bf16 %v657_v58, %v656_v27  ;;  %v2128_v35 = vld [vmem:[%s3447_s6 + $0xf4] sm:$0xf0] }
 0x1da   :  { %v2049_v9 = vor.u32 %v2128_v35, %v2048_v48 }
 0x1db   :  { %v3058_v59 = vpop.f32.mrf.mxu2 }
 0x1dc   :  { %v665_v63 = vpop.permute.xlu2 %664  ;;  %v974_v17 = vpop.permute.xlu0 %973 }
 0x1dd   :  { %v679_v25 = vmul.f32 %v2989_v42, %v665_v63  ;;  %v3063_v23 = vpop.f32.mrf.mxu1  ;;  %v3072_v52 = vpop.f32.mrf.mxu0  ;;  %v2010_v42 = vld [vmem:[%s3447_s6 + $0xb0] sm:$0xf0]  ;;  %v2018_v63 = vld [vmem:[%s3447_s6 + $0xb8] sm:$0xf0] }
 0x1de   :  { %v2013_v36 = vor.u32 %v2115_v61, %v2010_v42  ;;  %v959_v28 = vpop.permute.xlu1 %958  ;;  %v2124_v61 = vld [vmem:[%s3447_s6 + $0xdc] sm:$0xf]  ;;  %v1228_v2 = vpop.f32.mrf.mxu3 }
 0x1df   :  { %v931_v0 = vpack.c.bf16 %v679_v25, %v658_v31  ;;  %v2021_v31 = vor.u32 %v2116_v12, %v2018_v63  ;;  %v2050_v42 = vld [vmem:[%s3447_s6 + $0xf8] sm:$0xf0]  ;;  %s3480_s6 = smov 15  }
 0x1e0   :  { %1275 = vmatmul.bf16.gmra.mxu1 %v1977_v14 }
 0x1e1   :  { %1355 = vmatpush.bf16.msra.mxu0 %v931_v0 }
 0x1e3   :  { %v3090_v37 = vpop.f32.mrf.mxu2 }
 0x1e4   :  { %1333 = vmatmul.bf16.gmra.mxu3 %v1985_v30  ;;  %v949_v10 = vpop.permute.xlu2 %948 }
 0x1e5   :  { %1356 = vmatpush.bf16.msra.mxu0 %v930_v18  ;;  %1309 = vmatmul.bf16.gmra.mxu2 %v2013_v36  ;;  %v1252_v60 = vpop.f32.mrf.mxu0  ;;  %v1167_v22 = vpop.f32.mrf.mxu1  ;;  %v1156_v14 = vadd.f32 %v2995_v21, %v949_v10 }
 0x1e6   :  { %v1168_v40 = vadd.f32 %v1167_v22, %v974_v17 }
 0x1e7   :  { %v1185_v27 = vadd.f32 %v3006_v39, %v1156_v14  ;;  %v1161_v39 = vadd.f32 %v3024_v41, %v959_v28 }
 0x1e8   :  { %1357 = vmatmul.bf16.vlgmr.msra.gmra.mxu0 %v1957_v29 }
 0x1e9   :  { %v1214_v25 = vadd.f32 %v2991_v19, %v1185_v27  ;;  %v1190_v19 = vadd.f32 %v3042_v51, %v1161_v39 }
 0x1eb   :  { %v1196_v26 = vpop.f32.mrf.mxu2  ;;  %v1243_v58 = vadd.f32 %v3011_v11, %v1214_v25  ;;  %v2053_v11 = vor.u32 %v2124_v61, %v2050_v42  ;;  %v1219_v30 = vadd.f32 %v3032_v47, %v1190_v19 }
 0x1ec   :  { %v1197_v34 = vadd.f32 %v1196_v26, %v1168_v40  ;;  %v964_v24 = vpop.permute.xlu2 %963 }
 0x1ed   :  { %v1254_v46 = vpop.f32.mrf.mxu0  ;;  %v1163_v21 = vadd.f32 %v3046_v4, %v964_v24  ;;  %v1248_v33 = vadd.f32 %v3048_v5, %v1219_v30  ;;  %v1170_v22 = vpop.f32.mrf.mxu1 }
 0x1ee   :  { %v1226_v44 = vadd.f32 %v1225_v8, %v1197_v34  ;;  %v1171_v1 = vadd.f32 %v1170_v22, %v3080_v13 }
 0x1ef   :  { %v1192_v0 = vadd.f32 %v3058_v59, %v1163_v21 }
 0x1f0   :  { %v3110_v62 = vadd.f32 %v1254_v46, %v1226_v44  ;;  %1280 = vmatmul.bf16.gmra.mxu1 %v2009_v45 }
 0x1f1   :  { %v1221_v18 = vadd.f32 %v3050_v7, %v1192_v0  ;;  %v1230_v7 = vpop.f32.mrf.mxu3 }
 0x1f3   :  { %v1250_v15 = vadd.f32 %v3072_v52, %v1221_v18  ;;  %v1199_v51 = vpop.f32.mrf.mxu2 }
 0x1f4   :  { %1338 = vmatmul.bf16.gmra.mxu3 %v2017_v3  ;;  %v969_v36 = vpop.permute.xlu2 %968  ;;  %v1200_v35 = vadd.f32 %v1199_v51, %v1171_v1 }
 0x1f5   :  { %1314 = vmatmul.bf16.gmra.mxu2 %v2045_v38  ;;  %v1166_v29 = vadd.f32 %v3063_v23, %v969_v36  ;;  %v1172_v17 = vpop.f32.mrf.mxu1  ;;  %v1257_v5 = vpop.f32.mrf.mxu0 }
 0x1f6   :  { %v1229_v28 = vadd.f32 %v1228_v2, %v1200_v35 }
 0x1f7   :  { %v1195_v4 = vadd.f32 %v3090_v37, %v1166_v29 }
 0x1f8   :  { %1362 = vmatmul.bf16.gmra.mxu0 %v1989_v20  ;;  %v1258_v19 = vadd.f32 %v1257_v5, %v1229_v28 }
 0x1f9   :  { %v1224_v41 = vadd.f32 %v3082_v16, %v1195_v4 }
 0x1fb   :  { %v1253_v59 = vadd.f32 %v1252_v60, %v1224_v41  ;;  %v1201_v47 = vpop.f32.mrf.mxu2 }
 0x1fd   :  { %v1259_v34 = vpop.f32.mrf.mxu0 }
 0x200   :  { %1285 = vmatmul.bf16.gmra.mxu1 %v2041_v53 }
 0x204   :  { %1343 = vmatmul.bf16.gmra.mxu3 %v2049_v9  ;;  %v984_v9 = vpop.permute.xlu1 %983 }
 0x205   :  { %v1173_v61 = vadd.f32 %v1172_v17, %v984_v9 }
 0x208   :  { %1367 = vmatmul.bf16.gmra.mxu0 %v2021_v31 }
 0x218   :  { %1372 = vmatmul.bf16.gmra.mxu0 %v2053_v11  ;;  %v1202_v11 = vadd.f32 %v1201_v47, %v1173_v61 }
 0x21a   :  { %v1231_v51 = vadd.f32 %v1230_v7, %v1202_v11 }
 0x248   :  { %v1300_v40 = vpop.f32.mrf.mxu2 }
 0x24d   :  { %v1271_v43 = vpop.f32.mrf.mxu1 }
 0x24e   :  { %v1272_v38 = vadd.f32 %v1271_v43, %v1243_v58 }
 0x250   :  { %v1302_v8 = vpop.f32.mrf.mxu2  ;;  %v1301_v53 = vadd.f32 %v1300_v40, %v1272_v38 }
 0x255   :  { %v1273_v26 = vpop.f32.mrf.mxu1 }
 0x256   :  { %v1274_v27 = vadd.f32 %v1273_v26, %v3040_v49 }
 0x257   :  { %v1329_v52 = vpop.f32.mrf.mxu3 }
 0x258   :  { %v1305_v32 = vpop.f32.mrf.mxu2  ;;  %v1330_v10 = vadd.f32 %v1329_v52, %v1301_v53  ;;  %v1303_v21 = vadd.f32 %v1302_v8, %v1274_v27  ;;  %v1260_v52 = vadd.f32 %v1259_v34, %v1231_v51 }
 0x25d   :  { %v1276_v23 = vpop.f32.mrf.mxu1 }
 0x25e   :  { %v1277_v50 = vadd.f32 %v1276_v23, %v1248_v33 }
 0x25f   :  { %v1331_v45 = vpop.f32.mrf.mxu3 }
 0x260   :  { %v1307_v44 = vpop.f32.mrf.mxu2  ;;  %v1306_v12 = vadd.f32 %v1305_v32, %v1277_v50  ;;  %v1332_v30 = vadd.f32 %v1331_v45, %v1303_v21 }
 0x265   :  { %v1358_v37 = vpop.f32.mrf.mxu0  ;;  %v1278_v16 = vpop.f32.mrf.mxu1 }
 0x266   :  { %v1359_v31 = vadd.f32 %v1358_v37, %v1330_v10  ;;  %v1279_v24 = vadd.f32 %v1278_v16, %v1250_v15 }
 0x267   :  { %v1334_v54 = vpop.f32.mrf.mxu3 }
 0x268   :  { %v1310_v3 = vpop.f32.mrf.mxu2  ;;  %v1335_v25 = vadd.f32 %v1334_v54, %v1306_v12  ;;  %v1378_v39 = vmul.f32 0.5, %v1359_v31  ;;  %v1308_v13 = vadd.f32 %v1307_v44, %v1279_v24  ;;  %v48_v31 = vld [vmem:[%s3449_s3 + $0x8] sm:$0xff] }
 0x26a   :  { %2209 = vtanh.f32 %v1378_v39 }
 0x26d   :  { %v1360_v60 = vpop.f32.mrf.mxu0  ;;  %v1281_v56 = vpop.f32.mrf.mxu1 }
 0x26e   :  { %v1282_v0 = vadd.f32 %v1281_v56, %v1253_v59  ;;  %v1361_v49 = vadd.f32 %v1360_v60, %v1332_v30 }
 0x26f   :  { %v1336_v46 = vpop.f32.mrf.mxu3 }
 0x270   :  { %v1312_v48 = vpop.f32.mrf.mxu2  ;;  %v1337_v33 = vadd.f32 %v1336_v46, %v1308_v13  ;;  %v1311_v41 = vadd.f32 %v1310_v3, %v1282_v0  ;;  %v1379_v2 = vmul.f32 0.5, %v1361_v49  ;;  %v2210_v26 = vpop.eup %2209 }
 0x271   :  { %v1382_v16 = vmul.f32 0.5, %v2210_v26 }
 0x273   :  { %v1384_v3 = vadd.f32 0.5, %v1382_v16  ;;  %v2193_v16 = vld [vmem:[%s3446_s10 + $0xe] ss:$0 sm:$0xff] }
 0x275   :  { %v1363_v57 = vpop.f32.mrf.mxu0  ;;  %v1283_v20 = vpop.f32.mrf.mxu1 }
 0x276   :  { %v1364_v58 = vadd.f32 %v1363_v57, %v1335_v25  ;;  %v1284_v43 = vadd.f32 %v1283_v20, %v3110_v62 }
 0x277   :  { %v1339_v6 = vpop.f32.mrf.mxu3 }
 0x278   :  { %v1386_v18 = vmul.f32 0.5, %v1364_v58  ;;  %v1315_v36 = vpop.f32.mrf.mxu2  ;;  %v1340_v17 = vadd.f32 %v1339_v6, %v1311_v41  ;;  %v1313_v32 = vadd.f32 %v1312_v48, %v1284_v43  ;;  %v47_v6 = vld [vmem:[%s3449_s3] sm:$0xff] }
 0x279   :  { %v1406_v35 = vmul.f32 %v1384_v3, %v47_v6 }
 0x27a   :  { %2211 = vtanh.f32 %v1386_v18 }
 0x27b   :  { %2213 = vtanh.f32 %v1379_v2  ;;  %v1789_v2 = vld [vmem:[%s3451_s9] sm:$0xff] }
 0x27d   :  { %v1365_v55 = vpop.f32.mrf.mxu0  ;;  %v1286_v42 = vpop.f32.mrf.mxu1 }
 0x27e   :  { %v1287_v4 = vadd.f32 %v1286_v42, %v1258_v19  ;;  %v1366_v15 = vadd.f32 %v1365_v55, %v1337_v33 }
 0x27f   :  { %v1341_v63 = vpop.f32.mrf.mxu3 }
 0x280   :  { %v1316_v59 = vadd.f32 %v1315_v36, %v1287_v4  ;;  %v1387_v40 = vmul.f32 0.5, %v1366_v15  ;;  %v2212_v23 = vpop.eup %2211  ;;  %v1317_v60 = vpop.f32.mrf.mxu2  ;;  %v1342_v44 = vadd.f32 %v1341_v63, %v1313_v32 }
 0x281   :  { %v1390_v62 = vmul.f32 0.5, %v2212_v23  ;;  %v2214_v34 = vpop.eup %2213 }
 0x282   :  { %2215 = vtanh.f32 %v1387_v40  ;;  %v1383_v9 = vmul.f32 0.5, %v2214_v34 }
 0x283   :  { %v1392_v20 = vadd.f32 0.5, %v1390_v62 }
 0x284   :  { %v1385_v27 = vadd.f32 0.5, %v1383_v9 }
 0x285   :  { %v1368_v14 = vpop.f32.mrf.mxu0  ;;  %v1288_v47 = vpop.f32.mrf.mxu1 }
 0x286   :  { %v1369_v5 = vadd.f32 %v1368_v14, %v1340_v17  ;;  %v1289_v37 = vadd.f32 %v1288_v47, %v1260_v52  ;;  %v1407_v61 = vmul.f32 %v1385_v27, %v48_v31  ;;  %v1790_v17 = vld [vmem:[%s3451_s9 + $0x8] sm:$0xff] }
 0x287   :  { %v1344_v22 = vpop.f32.mrf.mxu3  ;;  %v2190_v52 = vld [vmem:[%s3446_s10 + $0xf] ss:$0 sm:$0xff] }
 0x288   :  { %v1345_v8 = vadd.f32 %v1344_v22, %v1316_v59  ;;  %v1394_v7 = vmul.f32 0.5, %v1369_v5  ;;  %v1318_v56 = vadd.f32 %v1317_v60, %v1289_v37  ;;  %v2216_v38 = vpop.eup %2215 }
 0x289   :  { %v1391_v63 = vmul.f32 0.5, %v2216_v38 }
 0x28b   :  { %v1393_v24 = vadd.f32 0.5, %v1391_v63  ;;  %v2186_v63 = vld [vmem:[%s3446_s10 + $0x6] ss:$0 sm:$0xff] }
 0x28d   :  { %v1370_v29 = vpop.f32.mrf.mxu0 }
 0x28e   :  { %v1371_v57 = vadd.f32 %v1370_v29, %v1342_v44 }
 0x28f   :  { %v1346_v46 = vpop.f32.mrf.mxu3 }
 0x290   :  { %v1347_v55 = vadd.f32 %v1346_v46, %v1318_v56  ;;  %v1395_v53 = vmul.f32 0.5, %v1371_v57  ;;  %v2196_v57 = vld [vmem:[%s3446_s10 + $0xd] ss:$0 sm:$0xff] }
 0x295   :  { %v1373_v45 = vpop.f32.mrf.mxu0 }
 0x296   :  { %v1374_v54 = vadd.f32 %v1373_v45, %v1345_v8 }
 0x298   :  { %2217 = vtanh.f32 %v1374_v54 }
 0x299   :  { %2219 = vtanh.f32 %v1394_v7 }
 0x29d   :  { %v1375_v50 = vpop.f32.mrf.mxu0 }
 0x29e   :  { %v2218_v1 = vpop.eup %2217  ;;  %v1376_v48 = vadd.f32 %v1375_v50, %v1347_v55  ;;  %v2185_v50 = vld [vmem:[%s3446_s10 + $0x7] ss:$0 sm:$0xff] }
 0x29f   :  { %v1408_v10 = vmul.f32 %v2218_v1, %v1392_v20  ;;  %v2220_v12 = vpop.eup %2219 }
 0x2a0   :  { %2221 = vtanh.f32 %v1376_v48  ;;  %v1398_v25 = vmul.f32 0.5, %v2220_v12 }
 0x2a1   :  { %v1410_v14 = vadd.f32 %v1408_v10, %v1406_v35  ;;  %2223 = vtanh.f32 %v1395_v53 }
 0x2a2   :  { %v1400_v21 = vadd.f32 0.5, %v1398_v25 }
 0x2a3   :  { %2225 = vtanh.f32 %v1410_v14  ;;  %1884 = vst [vmem:[%s3450_s11 + $0x20] sm:$0xff] %v1410_v14  ;;  %v2189_v14 = vld [vmem:[%s3446_s10 + $0x17] ss:$0 sm:$0xff] }
 0x2a6   :  { %v2222_v28 = vpop.eup %2221 }
 0x2a7   :  { %v1409_v58 = vmul.f32 %v2222_v28, %v1393_v24  ;;  %v2224_v42 = vpop.eup %2223 }
 0x2a8   :  { %v1399_v19 = vmul.f32 0.5, %v2224_v42 }
 0x2a9   :  { %v2226_v39 = vpop.eup %2225  ;;  %v1411_v13 = vadd.f32 %v1409_v58, %v1407_v61 }
 0x2aa   :  { %v3169_v0 = vmul.f32 %v2226_v39, %v1400_v21  ;;  %v1401_v11 = vadd.f32 0.5, %v1399_v19  ;;  %v2187_v39 = vld [vmem:[%s3446_s10 + $0x5] ss:$0 sm:$0xff] }
 0x2ab   :  { %2227 = vtanh.f32 %v1411_v13  ;;  %1885 = vst [vmem:[%s3450_s11 + $0x28] sm:$0xff] %v1411_v13  ;;  %v2192_v13 = vld [vmem:[%s3446_s10 + $0x16] ss:$0 sm:$0xff] }
 0x2ac   :  { %1504 = vrot.lane.b32.xlu2 %v3169_v0, %s2238_s17  ;;  %1686 = vrot.lane.b32.xlu0 %v3169_v0, %s2254_s28  ;;  %1882 = vst [vmem:[%s3450_s11 + $0x10] sm:$0xff] %v3169_v0 }
 0x2ad   :  { %1590 = vrot.lane.b32.xlu1 %v3169_v0, %s2245_s26 }
 0x2b1   :  { %v2228_v30 = vpop.eup %2227 }
 0x2b2   :  { %v3184_v18 = vmul.f32 %v2228_v30, %v1401_v11 }
 0x2b4   :  { %1492 = vrot.lane.b32.xlu2 %v3169_v0, %s2240_s19  ;;  %1674 = vrot.lane.b32.xlu0 %v3169_v0, %s2247_s30  ;;  %1883 = vst [vmem:[%s3450_s11 + $0x18] sm:$0xff] %v3184_v18  ;;  %v1776_v1 = vpack.c.bf16 %v3184_v18, %v3169_v0 }
 0x2b5   :  { %1578 = vrot.lane.b32.xlu1 %v3169_v0, %s2249_s12 }
 0x2bc   :  { %1480 = vrot.lane.b32.xlu2 %v3169_v0, %s2235_s16  ;;  %1662 = vrot.lane.b32.xlu0 %v3169_v0, %s2248_s0 }
 0x2bd   :  { %1566 = vrot.lane.b32.xlu1 %v3169_v0, %s2253_s27 }
 0x2c4   :  { %1552 = vrot.lane.b32.xlu2 %v3169_v0, %s3477_s24  ;;  %1468 = vrot.lane.b32.xlu0 %v3169_v0, %s3478_s1 }
 0x2c5   :  { %1650 = vrot.lane.b32.xlu1 %v3169_v0, %s2252_s23 }
 0x2cc   :  { %1540 = vrot.lane.b32.xlu2 %v3169_v0, %s3479_s5  ;;  %1456 = vrot.lane.b32.xlu0 %v3169_v0, %s3480_s6 }
 0x2cd   :  { %1638 = vrot.lane.b32.xlu1 %v3169_v0, %s2244_s25 }
 0x2d4   :  { %1528 = vrot.lane.b32.xlu2 %v3169_v0, %s3481_s2  ;;  %1444 = vrot.lane.b32.xlu0 %v3169_v0, %s3482_s21 }
 0x2d5   :  { %1626 = vrot.lane.b32.xlu1 %v3169_v0, %s3483_s22 }
 0x2dc   :  { %1516 = vrot.lane.b32.xlu2 %v3169_v0, %s3484_s29  ;;  %1432 = vrot.lane.b32.xlu0 %v3169_v0, %s3485_s13 }
 0x2dd   :  { %1614 = vrot.lane.b32.xlu1 %v3169_v0, %s3486_s4 }
 0x2e4   :  { %1592 = vrot.lane.b32.xlu2 %v3184_v18, %s2245_s26  ;;  %1506 = vrot.lane.b32.xlu0 %v3184_v18, %s2238_s17  ;;  %s3488_s17 = smov 110  }
 0x2e5   :  { %1602 = vrot.lane.b32.xlu1 %v3169_v0, %s2255_s15 }
 0x2ec   :  { %1580 = vrot.lane.b32.xlu2 %v3184_v18, %s2249_s12  ;;  %1494 = vrot.lane.b32.xlu0 %v3184_v18, %s2240_s19 }
 0x2ed   :  { %1688 = vrot.lane.b32.xlu1 %v3184_v18, %s2254_s28 }
 0x2f4   :  { %1568 = vrot.lane.b32.xlu2 %v3184_v18, %s2253_s27  ;;  %1482 = vrot.lane.b32.xlu0 %v3184_v18, %s2235_s16  ;;  %s3487_s16 = smov 18  }
 0x2f5   :  { %1676 = vrot.lane.b32.xlu1 %v3184_v18, %s2247_s30 }
 0x2fc   :  { %1652 = vrot.lane.b32.xlu2 %v3184_v18, %s2252_s23  ;;  %1554 = vrot.lane.b32.xlu0 %v3184_v18, %s3477_s24 }
 0x2fd   :  { %1664 = vrot.lane.b32.xlu1 %v3184_v18, %s2248_s0 }
 0x304   :  { %1640 = vrot.lane.b32.xlu2 %v3184_v18, %s2244_s25  ;;  %1542 = vrot.lane.b32.xlu0 %v3184_v18, %s3479_s5 }
 0x305   :  { %1470 = vrot.lane.b32.xlu1 %v3184_v18, %s3478_s1 }
 0x306   :  { %v1505_v33 = vpop.permute.xlu2 %1504 }
 0x307   :  { %v1512_v48 = vmul.f32 %v2185_v50, %v1505_v33 }
 0x30c   :  { %1628 = vrot.lane.b32.xlu2 %v3184_v18, %s3483_s22  ;;  %1530 = vrot.lane.b32.xlu0 %v3184_v18, %s3481_s2 }
 0x30d   :  { %1458 = vrot.lane.b32.xlu1 %v3184_v18, %s3480_s6 }
 0x30e   :  { %v3262_v36 = vpop.permute.xlu2 %1492 }
 0x30f   :  { %v1500_v31 = vmul.f32 %v2186_v63, %v3262_v36 }
 0x314   :  { %1616 = vrot.lane.b32.xlu2 %v3184_v18, %s3486_s4  ;;  %1518 = vrot.lane.b32.xlu0 %v3184_v18, %s3484_s29 }
 0x315   :  { %1446 = vrot.lane.b32.xlu1 %v3184_v18, %s3482_s21 }
 0x316   :  { %v3270_v29 = vpop.permute.xlu2 %1480 }
 0x317   :  { %v1488_v19 = vmul.f32 %v2187_v39, %v3270_v29 }
 0x31c   :  { %1604 = vrot.lane.b32.xlu2 %v3184_v18, %s2255_s15  ;;  %1420 = vrot.lane.b32.xlu0 %v3169_v0, %s3487_s16 }
 0x31d   :  { %1434 = vrot.lane.b32.xlu1 %v3184_v18, %s3485_s13 }
 0x31e   :  { %v3278_v49 = vpop.permute.xlu2 %1552  ;;  %v1687_v4 = vpop.permute.xlu0 %1686 }
 0x31f   :  { %v1591_v41 = vpop.permute.xlu1 %1590  ;;  %v1694_v28 = vmul.f32 %v2189_v14, %v1687_v4 }
 0x320   :  { %v1598_v23 = vmul.f32 %v2190_v52, %v1591_v41  ;;  %v2188_v41 = vld [vmem:[%s3446_s10 + $0xb] ss:$0 sm:$0xff] }
 0x321   :  { %v1560_v29 = vmul.f32 %v2188_v41, %v3278_v49  ;;  %v2198_v49 = vld [vmem:[%s3446_s10 + $0x4] ss:$0 sm:$0xff] }
 0x324   :  { %1698 = vrot.lane.b32.xlu2 %v3169_v0, %s3488_s17  ;;  %1700 = vrot.lane.b32.xlu0 %v3184_v18, %s3488_s17 }
 0x325   :  { %1422 = vrot.lane.b32.xlu1 %v3184_v18, %s3487_s16 }
 0x326   :  { %v3286_v15 = vpop.permute.xlu2 %1540  ;;  %v3288_v22 = vpop.permute.xlu0 %1674 }
 0x327   :  { %v1579_v51 = vpop.permute.xlu1 %1578  ;;  %v1682_v18 = vmul.f32 %v2192_v13, %v3288_v22 }
 0x328   :  { %v1586_v44 = vmul.f32 %v2193_v16, %v1579_v51 }
 0x32c   :  { %1798 = vperm.xlu2 %2159, %v1790_v17   ;;  %v2195_v17 = vld [vmem:[%s3446_s10 + $0x15] ss:$0 sm:$0xff] }
 0x32d   :  { %1793 = vperm.xlu1 %2160, %v1789_v2  }
 0x32e   :  { %v3296_v43 = vpop.permute.xlu2 %1528  ;;  %v3298_v59 = vpop.permute.xlu0 %1662 }
 0x32f   :  { %v1567_v40 = vpop.permute.xlu1 %1566  ;;  %v1670_v22 = vmul.f32 %v2195_v17, %v3298_v59  ;;  %v2201_v59 = vld [vmem:[%s3446_s10 + $0x13] ss:$0 sm:$0xff] }
 0x330   :  { %v1574_v6 = vmul.f32 %v2196_v57, %v1567_v40 }
 0x336   :  { %v3300_v47 = vpop.permute.xlu2 %1516  ;;  %v3302_v5 = vpop.permute.xlu0 %1468 }
 0x337   :  { %v3304_v26 = vpop.permute.xlu1 %1650 }
 0x33e   :  { %v1593_v8 = vpop.permute.xlu2 %1592  ;;  %v3309_v45 = vpop.permute.xlu0 %1456 }
 0x33f   :  { %v1599_v32 = vmul.f32 %v2190_v52, %v1593_v8  ;;  %v3311_v37 = vpop.permute.xlu1 %1638  ;;  %v2199_v8 = vld [vmem:[%s3446_s10 + $0x14] ss:$0 sm:$0xff] }
 0x341   :  { %v1779_v54 = vpack.c.bf16 %v1599_v32, %v1598_v23 }
 0x343   :  { %1838 = vmatpush.bf16.msra.mxu2 %v1779_v54 }
 0x346   :  { %v1581_v7 = vpop.permute.xlu2 %1580  ;;  %v3316_v60 = vpop.permute.xlu0 %1444 }
 0x347   :  { %v1587_v62 = vmul.f32 %v2193_v16, %v1581_v7  ;;  %v3318_v46 = vpop.permute.xlu1 %1626  ;;  %v2191_v7 = vld [vmem:[%s3446_s10 + $0xa] ss:$0 sm:$0xff] }
 0x349   :  { %v1778_v56 = vpack.c.bf16 %v1587_v62, %v1586_v44  ;;  %v1658_v44 = vmul.f32 %v2199_v8, %v3304_v26  ;;  %v2203_v26 = vld [vmem:[%s3446_s10 + $0x12] ss:$0 sm:$0xff] }
 0x34b   :  { %1839 = vmatpush.bf16.msra.mxu2 %v1778_v56 }
 0x34e   :  { %v1569_v3 = vpop.permute.xlu2 %1568  ;;  %v3323_v34 = vpop.permute.xlu0 %1432 }
 0x34f   :  { %v1575_v55 = vmul.f32 %v2196_v57, %v1569_v3  ;;  %v3325_v38 = vpop.permute.xlu1 %1614 }
 0x351   :  { %v1777_v20 = vpack.c.bf16 %v1575_v55, %v1574_v6  ;;  %v1548_v6 = vmul.f32 %v2191_v7, %v3286_v15  ;;  %v2194_v15 = vld [vmem:[%s3446_s10 + $0x9] ss:$0 sm:$0xff] }
 0x353   :  { %1840 = vmatpush.bf16.msra.mxu2 %v1777_v20 }
 0x356   :  { %v1507_v53 = vpop.permute.xlu0 %1506  ;;  %v1653_v35 = vpop.permute.xlu2 %1652 }
 0x357   :  { %v1513_v9 = vmul.f32 %v2185_v50, %v1507_v53  ;;  %v3332_v10 = vpop.permute.xlu1 %1602  ;;  %1841 = vmatpush.bf16.msra.mxu2 %v1776_v1  ;;  %v1659_v54 = vmul.f32 %v2199_v8, %v1653_v35  ;;  %v1476_v50 = vmul.f32 %v2198_v49, %v3302_v5  ;;  %v1646_v1 = vmul.f32 %v2201_v59, %v3311_v37  ;;  %v2200_v5 = vld [vmem:[%s3446_s10 + $0x3] ss:$0 sm:$0xff] }
 0x358   :  { %v1634_v37 = vmul.f32 %v2203_v26, %v3318_v46  ;;  %v2206_v46 = vld [vmem:[%s3446_s10 + $0x10] ss:$0 sm:$0xff] }
 0x359   :  { %v1771_v12 = vpack.c.bf16 %v1513_v9, %v1512_v48  ;;  %v1784_v56 = vpack.c.bf16 %v1659_v54, %v1658_v44 }
 0x35b   :  { %1824 = vmatpush.bf16.msra.mxu1 %v1771_v12 }
 0x35e   :  { %v1495_v27 = vpop.permute.xlu0 %1494  ;;  %v1641_v58 = vpop.permute.xlu2 %1640 }
 0x35f   :  { %v1501_v25 = vmul.f32 %v2186_v63, %v1495_v27  ;;  %v1689_v24 = vpop.permute.xlu1 %1688  ;;  %v1647_v57 = vmul.f32 %v2201_v59, %v1641_v58  ;;  %v2205_v63 = vld [vmem:[%s3446_s10 + $0x11] ss:$0 sm:$0xff]  ;;  %v1464_v58 = vmul.f32 %v2200_v5, %v3309_v45  ;;  %v2202_v45 = vld [vmem:[%s3446_s10 + $0x2] ss:$0 sm:$0xff] }
 0x360   :  { %v1695_v61 = vmul.f32 %v2189_v14, %v1689_v24 }
 0x361   :  { %v1770_v42 = vpack.c.bf16 %v1501_v25, %v1500_v31  ;;  %v1783_v35 = vpack.c.bf16 %v1647_v57, %v1646_v1  ;;  %v1536_v25 = vmul.f32 %v2194_v15, %v3296_v43  ;;  %v2197_v43 = vld [vmem:[%s3446_s10 + $0x8] ss:$0 sm:$0xff]  ;;  %v2089_v57 = vld [vmem:[%s3452_s8 + $0x18] sm:$0xf0] }
 0x362   :  { %v1787_v21 = vpack.c.bf16 %v1695_v61, %v1694_v28 }
 0x363   :  { %1825 = vmatpush.bf16.msra.mxu1 %v1770_v42  ;;  %v1622_v42 = vmul.f32 %v2205_v63, %v3325_v38  ;;  %v1610_v38 = vmul.f32 %v2206_v46, %v3332_v10  ;;  %v2129_v10 = vld [vmem:[%s3452_s8 + $0x4] sm:$0xf] }
 0x364   :  { %1852 = vmatpush.bf16.msra.mxu3 %v1787_v21 }
 0x366   :  { %v1483_v0 = vpop.permute.xlu0 %1482  ;;  %v1629_v51 = vpop.permute.xlu2 %1628 }
 0x367   :  { %v1489_v11 = vmul.f32 %v2187_v39, %v1483_v0  ;;  %v1677_v30 = vpop.permute.xlu1 %1676  ;;  %v1635_v9 = vmul.f32 %v2203_v26, %v1629_v51  ;;  %v2081_v51 = vld [vmem:[%s3452_s8 + $0x10] sm:$0xf0] }
 0x368   :  { %v1683_v33 = vmul.f32 %v2192_v13, %v1677_v30  ;;  %v2132_v30 = vld [vmem:[%s3452_s8 + $0x14] sm:$0xf0] }
 0x369   :  { %v1769_v36 = vpack.c.bf16 %v1489_v11, %v1488_v19  ;;  %v1782_v14 = vpack.c.bf16 %v1635_v9, %v1634_v37  ;;  %v2087_v11 = vld [vmem:[%s3452_s8 + $0x8] sm:$0xf] }
 0x36a   :  { %v1786_v4 = vpack.c.bf16 %v1683_v33, %v1682_v18 }
 0x36b   :  { %1826 = vmatpush.bf16.msra.mxu1 %v1769_v36  ;;  %v1524_v36 = vmul.f32 %v2197_v43, %v3300_v47  ;;  %v2204_v47 = vld [vmem:[%s3446_s10 + $0x1] ss:$0 sm:$0xff] }
 0x36c   :  { %1853 = vmatpush.bf16.msra.mxu3 %v1786_v4 }
 0x36e   :  { %v1555_v2 = vpop.permute.xlu0 %1554  ;;  %v1617_v62 = vpop.permute.xlu2 %1616 }
 0x36f   :  { %v1561_v40 = vmul.f32 %v2188_v41, %v1555_v2  ;;  %v1665_v52 = vpop.permute.xlu1 %1664  ;;  %v1623_v27 = vmul.f32 %v2205_v63, %v1617_v62  ;;  %v1452_v2 = vmul.f32 %v2202_v45, %v3316_v60  ;;  %v2207_v60 = vld [vmem:[%s3446_s10 + $0x18] ss:$0 sm:$0xff] }
 0x370   :  { %v1671_v23 = vmul.f32 %v2195_v17, %v1665_v52  ;;  %v2088_v17 = vor.u32 %v2132_v30, %v2087_v11 }
 0x371   :  { %v1775_v32 = vpack.c.bf16 %v1561_v40, %v1560_v29  ;;  %v1781_v13 = vpack.c.bf16 %v1623_v27, %v1622_v42 }
 0x372   :  { %v1785_v16 = vpack.c.bf16 %v1671_v23, %v1670_v22  ;;  %v2084_v22 = vor.u32 %v2129_v10, %v2081_v51 }
 0x373   :  { %1842 = vmatpush.bf16.msra.mxu2 %v1775_v32  ;;  %v1440_v32 = vmul.f32 %v2204_v47, %v3323_v34  ;;  %v2130_v34 = vld [vmem:[%s3452_s8 + $0xc] sm:$0xf] }
 0x374   :  { %1854 = vmatpush.bf16.msra.mxu3 %v1785_v16  ;;  %v2092_v26 = vor.u32 %v2130_v34, %v2089_v57 }
 0x376   :  { %v1543_v3 = vpop.permute.xlu0 %1542  ;;  %v1605_v24 = vpop.permute.xlu2 %1604 }
 0x377   :  { %v1549_v55 = vmul.f32 %v2191_v7, %v1543_v3  ;;  %v1471_v20 = vpop.permute.xlu1 %1470  ;;  %v1611_v0 = vmul.f32 %v2206_v46, %v1605_v24 }
 0x378   :  { %v1477_v53 = vmul.f32 %v2198_v49, %v1471_v20  ;;  %1855 = vmatpush.bf16.msra.mxu3 %v1784_v56  ;;  %v2208_v49 = vld [vmem:[%s3446_s10] ss:$0 sm:$0xff]  ;;  %v2131_v20 = vld [vmem:[%s3452_s8 + $0xc] sm:$0xf0] }
 0x379   :  { %v1774_v48 = vpack.c.bf16 %v1549_v55, %v1548_v6  ;;  %v1780_v18 = vpack.c.bf16 %v1611_v0, %v1610_v38  ;;  %v2079_v55 = vld [vmem:[%s3452_s8] sm:$0xf] }
 0x37a   :  { %v1768_v12 = vpack.c.bf16 %v1477_v53, %v1476_v50  ;;  %v2080_v53 = vor.u32 %v2131_v20, %v2079_v55 }
 0x37b   :  { %1843 = vmatpush.bf16.msra.mxu2 %v1774_v48 }
 0x37c   :  { %1827 = vmatpush.bf16.msra.mxu1 %v1768_v12  ;;  %1856 = vmatpush.bf16.msra.mxu3 %v1783_v35 }
 0x37e   :  { %v1531_v31 = vpop.permute.xlu0 %1530  ;;  %v1699_v7 = vpop.permute.xlu2 %1698 }
 0x37f   :  { %v1537_v28 = vmul.f32 %v2194_v15, %v1531_v31  ;;  %v1459_v61 = vpop.permute.xlu1 %1458  ;;  %v1706_v59 = vmul.f32 %v2207_v60, %v1699_v7 }
 0x380   :  { %v1465_v21 = vmul.f32 %v2200_v5, %v1459_v61  ;;  %1857 = vmatpush.bf16.msra.mxu3 %v1782_v14 }
 0x381   :  { %v1773_v39 = vpack.c.bf16 %v1537_v28, %v1536_v25 }
 0x382   :  { %v1767_v19 = vpack.c.bf16 %v1465_v21, %v1464_v58 }
 0x383   :  { %1844 = vmatpush.bf16.msra.mxu2 %v1773_v39 }
 0x384   :  { %1828 = vmatpush.bf16.msra.mxu1 %v1767_v19  ;;  %1858 = vmatpush.bf16.msra.mxu3 %v1781_v13 }
 0x386   :  { %v1519_v33 = vpop.permute.xlu0 %1518  ;;  %v1799_v27 = vpop.permute.xlu2 %1798 }
 0x387   :  { %v1525_v4 = vmul.f32 %v2197_v43, %v1519_v33  ;;  %v1447_v41 = vpop.permute.xlu1 %1446 }
 0x388   :  { %v1453_v29 = vmul.f32 %v2202_v45, %v1447_v41  ;;  %1859 = vmatpush.bf16.msra.mxu3 %v1780_v18 }
 0x389   :  { %v1772_v40 = vpack.c.bf16 %v1525_v4, %v1524_v36 }
 0x38a   :  { %v1766_v52 = vpack.c.bf16 %v1453_v29, %v1452_v2 }
 0x38b   :  { %1845 = vmatpush.bf16.msra.mxu2 %v1772_v40  ;;  %1860 = vmatmul.bf16.vlgmr.msra.gmra.mxu3 %v2088_v17 }
 0x38c   :  { %1829 = vmatpush.bf16.msra.mxu1 %v1766_v52 }
 0x38e   :  { %v1421_v8 = vpop.permute.xlu0 %1420  ;;  %1846 = vmatmul.bf16.vlgmr.msra.gmra.mxu2 %v2084_v22 }
 0x38f   :  { %v1435_v23 = vpop.permute.xlu1 %1434  ;;  %v1428_v3 = vmul.f32 %v2208_v49, %v1421_v8 }
 0x390   :  { %v1441_v54 = vmul.f32 %v2204_v47, %v1435_v23 }
 0x392   :  { %v1765_v16 = vpack.c.bf16 %v1441_v54, %v1440_v32 }
 0x394   :  { %1830 = vmatpush.bf16.msra.mxu1 %v1765_v16 }
 0x396   :  { %v1701_v44 = vpop.permute.xlu0 %1700 }
 0x397   :  { %v1707_v62 = vmul.f32 %v2207_v60, %v1701_v44  ;;  %v1423_v56 = vpop.permute.xlu1 %1422 }
 0x398   :  { %v1429_v6 = vmul.f32 %v2208_v49, %v1423_v56 }
 0x399   :  { %v1788_v50 = vpack.c.bf16 %v1707_v62, %v1706_v59 }
 0x39a   :  { %v1764_v1 = vpack.c.bf16 %v1429_v6, %v1428_v3 }
 0x39b   :  { %1873 = vmatpush.bf16.msrb.mxu0 %v1788_v50 }
 0x39c   :  { %1831 = vmatpush.bf16.msra.mxu1 %v1764_v1 }
 0x39e   :  { %2093 = vmatmul.msk.bf16.vlgmr.msrb.gmra.mxu0 %vm1820_vm1, %v2092_v26 }
 0x39f   :  { %1832 = vmatmul.bf16.vlgmr.msra.gmra.mxu1 %v2080_v53  ;;  %v1794_v48 = vpop.permute.xlu1 %1793 }
 0x40e   :  { %v1861_v15 = vpop.f32.mrf.mxu3 }
 0x411   :  { %v1847_v9 = vpop.f32.mrf.mxu2 }
 0x416   :  { %v1863_v61 = vpop.f32.mrf.mxu3 }
 0x419   :  { %v1849_v24 = vpop.f32.mrf.mxu2 }
 0x41b   :  { %v1875_v37 = vpop.f32.mrf.mxu0 }
 0x41c   :  { %v1833_v35 = vpop.f32.mrf.mxu1 }
 0x41d   :  { %v1834_v12 = vadd.f32 %v1833_v35, %v1794_v48 }
 0x41f   :  { %v1848_v5 = vadd.f32 %v1847_v9, %v1834_v12 }
 0x421   :  { %v1862_v63 = vadd.f32 %v1861_v15, %v1848_v5 }
 0x423   :  { %v1876_v14 = vadd.f32 %v1875_v37, %v1862_v63  ;;  %v1877_v42 = vpop.f32.mrf.mxu0 }
 0x424   :  { %v1835_v31 = vpop.f32.mrf.mxu1 }
 0x425   :  { %1880 = vst [vmem:[%s3450_s11] sm:$0xff] %v1876_v14  ;;  %v1836_v25 = vadd.f32 %v1835_v31, %v1799_v27 }
 0x427   :  { %v1850_v28 = vadd.f32 %v1849_v24, %v1836_v25 }
 0x429   :  { %v1864_v58 = vadd.f32 %v1863_v61, %v1850_v28 }
 0x42b   :  { %v1878_v46 = vadd.f32 %v1877_v42, %v1864_v58 }
 0x42d   :  { %1881 = vst [vmem:[%s3450_s11 + $0x8] sm:$0xff] %v1878_v46 }

</bundles_post_ra>
